<compile_context>
chip_gen: v7x
topology: tpu7x:2x2x1
jax: 0.10.0
libtpu: 0.0.40
codegen_flags: <defaults>
</compile_context>

<pallas_src>
import jax
import jax.numpy as jnp
from jax.experimental import pallas as pl
from jax.experimental.pallas import tpu as pltpu

# ---- configuration (matches RNNModel(rnn_type='LSTM', ...)) ---------------
NTOKEN = 256          # note-token vocab size
NTOKENS_LYRICS = 200  # lyrics vocab size
NINP = 64             # embedding size
NHID = 128            # LSTM hidden size
NLAYERS = 2
SEQ = 8               # per-stream sequence length (input has 2*SEQ rows)
BSZ = 4               # logical batch
BSZP = 8              # padded batch (sublane-aligned tiles)
INSZ = 2 * NINP       # LSTM input size = (2 + 0)*ninp + 0


# ---- Pallas kernel: full 2-layer LSTM over time + batched decoder ---------
def lstm_decoder_kernel(emb_ref, h0_ref, c0_ref,
                        wih0_ref, whh0_ref, b0_ref, b1_ref, bdec_ref,
                        w1ih_hbm, w1hh_hbm, wdec_hbm,
                        dec_ref, hn_ref, cn_ref,
                        xproj_ref, slab_ref,
                        w1ih_buf, w1hh_buf, wdec_buf, dma_sem):
    bf16 = jnp.bfloat16

    # Kick off the weight DMAs that are not needed immediately; they overlap
    # with the hoisted input projection and the first recurrent step.
    cp_w1ih = pltpu.make_async_copy(w1ih_hbm, w1ih_buf, dma_sem.at[0])
    cp_w1hh = pltpu.make_async_copy(w1hh_hbm, w1hh_buf, dma_sem.at[1])
    cp_wdec = pltpu.make_async_copy(wdec_hbm, wdec_buf, dma_sem.at[2])
    cp_w1ih.start()
    cp_w1hh.start()
    cp_wdec.start()

    # Hoisted layer-0 input projection (bias folded in): one big bf16 matmul
    # with M = SEQ*BSZP = 64 instead of 8 tiny matmuls on the serial path.
    # Stored to VMEM scratch to keep vreg pressure low across the unrolled loop.
    xproj_ref[...] = (jnp.dot(emb_ref[...], wih0_ref[...],
                              preferred_element_type=jnp.float32)
                      + b0_ref[...])                       # (SEQ*BSZP, 4*NHID) f32

    # Recurrent state lives in vregs for the whole (unrolled) loop.
    h0 = h0_ref[0]
    c0 = c0_ref[0]
    h1 = h0_ref[1]
    c1 = c0_ref[1]

    def lstm_cell(gates, c_prev):
        # Gate columns are pre-permuted (wrapper) to [i, f, o, g]:
        # one wide tanh-based sigmoid over the first 3*NHID columns,
        # one tanh over the last NHID columns. sigmoid(x) = 0.5*tanh(0.5*x)+0.5.
        sg = jnp.tanh(0.5 * gates[:, :3 * NHID]) * 0.5 + 0.5
        i_g = sg[:, 0 * NHID:1 * NHID]
        f_g = sg[:, 1 * NHID:2 * NHID]
        o_g = sg[:, 2 * NHID:3 * NHID]
        g_g = jnp.tanh(gates[:, 3 * NHID:4 * NHID])
        c_new = f_g * c_prev + i_g * g_g
        h_new = o_g * jnp.tanh(c_new)
        return h_new, c_new

    # Fully unrolled time loop (SEQ = 8; no grid stepping, no scratch R/W of
    # the recurrent state).
    for t in range(SEQ):
        # layer 0: only the recurrent W_hh matmul remains per step
        g0 = (xproj_ref[t * BSZP:(t + 1) * BSZP, :]
              + jnp.dot(h0.astype(bf16), whh0_ref[...],
                        preferred_element_type=jnp.float32))
        h0, c0 = lstm_cell(g0, c0)

        if t == 0:
            # Layer-1 weights first used here; DMA has been in flight since
            # kernel entry and is hidden behind xproj0 + step-0 layer-0.
            cp_w1ih.wait()
            cp_w1hh.wait()

        # layer 1: two separate matmuls (no concat); the h1-recurrent half has
        # no dependence on h0(t) and can overlap with layer-0 of this step.
        g1 = (jnp.dot(h0.astype(bf16), w1ih_buf[...],
                      preferred_element_type=jnp.float32)
              + jnp.dot(h1.astype(bf16), w1hh_buf[...],
                        preferred_element_type=jnp.float32)
              + b1_ref[...])
        h1, c1 = lstm_cell(g1, c1)

        # stage last-layer output for the batched decoder: aligned, unmasked
        # (8,128) f32 tile store
        slab_ref[t * BSZP:(t + 1) * BSZP, :] = h1

    # Batched decoder: wait for its weight only now (fully hidden DMA), then
    # one (64,128)@(128,256) bf16 matmul with a lane-dense unmasked store.
    cp_wdec.wait()
    dec_ref[...] = (jnp.dot(slab_ref[...].astype(bf16), wdec_buf[...],
                            preferred_element_type=jnp.float32)
                    + bdec_ref[...])

    # Final states as one clean (16,128) slab per tensor (aligned stores).
    hn_ref[0:BSZP, :] = h0
    hn_ref[BSZP:2 * BSZP, :] = h1
    cn_ref[0:BSZP, :] = c0
    cn_ref[BSZP:2 * BSZP, :] = c1


# ---- wrapper ----------------------------------------------------------------
def _permute_gates(w):
    """Reorder PyTorch gate columns [i, f, g, o] -> [i, f, o, g] (last axis)."""
    return jnp.concatenate(
        [w[..., 0 * NHID:1 * NHID], w[..., 1 * NHID:2 * NHID],
         w[..., 3 * NHID:4 * NHID], w[..., 2 * NHID:3 * NHID]], axis=-1)


def rnn_forward(params, input_tokens, hidden):
    """input_tokens: (2*SEQ, BSZ) int32, hidden: (h0, c0) each (NLAYERS,BSZ,NHID)."""
    h0, c0 = hidden
    half = input_tokens.shape[0] // 2
    data = input_tokens[:half]
    data_lyrics = input_tokens[half:]

    # Embedding lookups (glue in plain JAX).  Dropout is identity in eval mode.
    emb = jnp.take(params["enc_w"], data, axis=0)              # (SEQ, BSZ, NINP)
    emb2 = jnp.take(params["enc_lyr_w"], data_lyrics, axis=0)  # (SEQ, BSZ, NINP)
    emb_combined = jnp.concatenate([emb, emb2], axis=2)        # (SEQ, BSZ, INSZ)

    # Pad batch 4 -> 8 so every in-kernel tile is a full (8,128) vreg.
    pad = BSZP - BSZ
    emb_p = jnp.pad(emb_combined, ((0, 0), (0, pad), (0, 0)))
    emb_flat = emb_p.reshape(SEQ * BSZP, INSZ).astype(jnp.bfloat16)
    h0_p = jnp.pad(h0, ((0, 0), (0, pad), (0, 0)))
    c0_p = jnp.pad(c0, ((0, 0), (0, pad), (0, 0)))

    # One-time wrapper-side weight restructuring (cheap XLA work):
    #   - gate-column permutation [i,f,g,o] -> [i,f,o,g]
    #   - pre-sum b_ih + b_hh per layer (kept f32)
    #   - bf16 cast of all MXU weight operands (f32 accumulation in-kernel)
    wih0 = _permute_gates(params["w_ih"][0]).astype(jnp.bfloat16)
    whh0 = _permute_gates(params["w_hh"][0]).astype(jnp.bfloat16)
    w1ih = _permute_gates(params["w_ih"][1]).astype(jnp.bfloat16)
    w1hh = _permute_gates(params["w_hh"][1]).astype(jnp.bfloat16)
    b0 = _permute_gates(params["b_ih"][0] + params["b_hh"][0])  # (1, 4*NHID) f32
    b1 = _permute_gates(params["b_ih"][1] + params["b_hh"][1])  # (1, 4*NHID) f32
    wdec = params["dec_w"].astype(jnp.bfloat16)                 # (NHID, NTOKEN)

    vmem = pl.BlockSpec(memory_space=pltpu.MemorySpace.VMEM)
    hbm = pl.BlockSpec(memory_space=pl.ANY)   # manual DMA, overlapped with compute

    dec_flat, hn_flat, cn_flat = pl.pallas_call(
        lstm_decoder_kernel,
        out_shape=(
            jax.ShapeDtypeStruct((SEQ * BSZP, NTOKEN), jnp.float32),
            jax.ShapeDtypeStruct((NLAYERS * BSZP, NHID), jnp.float32),
            jax.ShapeDtypeStruct((NLAYERS * BSZP, NHID), jnp.float32),
        ),
        in_specs=[vmem] * 8 + [hbm] * 3,
        out_specs=(vmem, vmem, vmem),
        scratch_shapes=[
            pltpu.VMEM((SEQ * BSZP, 4 * NHID), jnp.float32),   # xproj0 slab
            pltpu.VMEM((SEQ * BSZP, NHID), jnp.float32),       # decoder input slab
            pltpu.VMEM((NHID, 4 * NHID), jnp.bfloat16),        # w1_ih buffer
            pltpu.VMEM((NHID, 4 * NHID), jnp.bfloat16),        # w1_hh buffer
            pltpu.VMEM((NHID, NTOKEN), jnp.bfloat16),          # decoder weight buffer
            pltpu.SemaphoreType.DMA((3,)),
        ],
    )(emb_flat, h0_p, c0_p, wih0, whh0, b0, b1, params["dec_b"],
      w1ih, w1hh, wdec)

    decoded = dec_flat.reshape(SEQ, BSZP, NTOKEN)[:, :BSZ, :]
    hn = hn_flat.reshape(NLAYERS, BSZP, NHID)[:, :BSZ, :]
    cn = cn_flat.reshape(NLAYERS, BSZP, NHID)[:, :BSZ, :]
    return decoded, (hn, cn)


# ---- pure-JAX f32 reference (for numerical check) ---------------------------
def rnn_forward_ref(params, input_tokens, hidden):
    h0, c0 = hidden
    half = input_tokens.shape[0] // 2
    emb = jnp.take(params["enc_w"], input_tokens[:half], axis=0)
    emb2 = jnp.take(params["enc_lyr_w"], input_tokens[half:], axis=0)
    x_seq = jnp.concatenate([emb, emb2], axis=2)

    def step(carry, x_t):
        h, c = carry
        hs, cs = [], []
        inp = x_t
        for layer in range(NLAYERS):
            gates = (inp @ params["w_ih"][layer] + h[layer] @ params["w_hh"][layer]
                     + params["b_ih"][layer] + params["b_hh"][layer])
            i_g = jax.nn.sigmoid(gates[:, :NHID])
            f_g = jax.nn.sigmoid(gates[:, NHID:2 * NHID])
            g_g = jnp.tanh(gates[:, 2 * NHID:3 * NHID])
            o_g = jax.nn.sigmoid(gates[:, 3 * NHID:])
            c_new = f_g * c[layer] + i_g * g_g
            h_new = o_g * jnp.tanh(c_new)
            hs.append(h_new)
            cs.append(c_new)
            inp = h_new
        return (jnp.stack(hs), jnp.stack(cs)), inp

    (hn, cn), out = jax.lax.scan(step, (h0, c0), x_seq)
    decoded = out @ params["dec_w"] + params["dec_b"][0]
    return decoded, (hn, cn)


# ---- deterministic parameter init ------------------------------------------
def init_params(key):
    ks = jax.random.split(key, 8)
    initrange = 0.1
    stdv = 1.0 / jnp.sqrt(NHID)
    p = {
        # encoder / encoder_lyrics embeddings: uniform(-0.1, 0.1)
        "enc_w": jax.random.uniform(ks[0], (NTOKEN, NINP), jnp.float32,
                                    -initrange, initrange),
        "enc_lyr_w": jax.random.uniform(ks[1], (NTOKENS_LYRICS, NINP), jnp.float32,
                                        -initrange, initrange),
        # LSTM weights stored pre-transposed: (layers, in, 4*nhid) / (layers, nhid, 4*nhid)
        # (INSZ == NHID here, so both layers share the W_ih shape)
        "w_ih": jax.random.uniform(ks[2], (NLAYERS, INSZ, 4 * NHID), jnp.float32,
                                   -stdv, stdv),
        "w_hh": jax.random.uniform(ks[3], (NLAYERS, NHID, 4 * NHID), jnp.float32,
                                   -stdv, stdv),
        "b_ih": jax.random.uniform(ks[4], (NLAYERS, 1, 4 * NHID), jnp.float32,
                                   -stdv, stdv),
        "b_hh": jax.random.uniform(ks[5], (NLAYERS, 1, 4 * NHID), jnp.float32,
                                   -stdv, stdv),
        # decoder: weight uniform(-0.1, 0.1) (stored as (nhid, ntoken)), bias = 0
        "dec_w": jax.random.uniform(ks[6], (NHID, NTOKEN), jnp.float32,
                                    -initrange, initrange),
        "dec_b": jnp.zeros((1, NTOKEN), jnp.float32),
    }
    return p


if __name__ == "__main__":
    # TODO(synk): nltk VADER sentiment analyzer in __init__ is host-side text
    # processing, unused in this forward config; not translatable to Pallas.
    key = jax.random.PRNGKey(0)
    kp, kt = jax.random.split(key)
    params = init_params(kp)

    input_tokens = jax.random.randint(kt, (2 * SEQ, BSZ), 0,
                                      min(NTOKEN, NTOKENS_LYRICS), jnp.int32)
    h0 = jnp.zeros((NLAYERS, BSZ, NHID), jnp.float32)   # init_hidden()
    c0 = jnp.zeros((NLAYERS, BSZ, NHID), jnp.float32)

    decoded, (hn, cn) = rnn_forward(params, input_tokens, (h0, c0))
    jax.block_until_ready((decoded, hn, cn))

    dec_ref, (hn_ref, cn_ref) = rnn_forward_ref(params, input_tokens, (h0, c0))
    assert decoded.shape == (SEQ, BSZ, NTOKEN)
    assert hn.shape == (NLAYERS, BSZ, NHID) and cn.shape == (NLAYERS, BSZ, NHID)
    # Tolerance accounts for bf16 MXU operands (f32 accumulation); still far
    # tighter than any gate-order / permutation / state-handling bug would allow.
    assert jnp.allclose(decoded, dec_ref, atol=1e-2), "decoded mismatch"
    assert jnp.allclose(hn, hn_ref, atol=1e-2), "h_n mismatch"
    assert jnp.allclose(cn, cn_ref, atol=1e-2), "c_n mismatch"

    print("KERNEL_OK")
</pallas_src>

<mosaic_0001>
module attributes {stable_mosaic.version = 11 : i64} {
  func.func @lstm_decoder_kernel(%arg0: memref<64x128xbf16, #tpu.memory_space<vmem>>, %arg1: memref<2x8x128xf32, #tpu.memory_space<vmem>>, %arg2: memref<2x8x128xf32, #tpu.memory_space<vmem>>, %arg3: memref<128x512xbf16, #tpu.memory_space<vmem>>, %arg4: memref<128x512xbf16, #tpu.memory_space<vmem>>, %arg5: memref<1x512xf32, #tpu.memory_space<vmem>>, %arg6: memref<1x512xf32, #tpu.memory_space<vmem>>, %arg7: memref<1x256xf32, #tpu.memory_space<vmem>>, %arg8: memref<128x512xbf16, #tpu.memory_space<any>>, %arg9: memref<128x512xbf16, #tpu.memory_space<any>>, %arg10: memref<128x256xbf16, #tpu.memory_space<any>>, %arg11: memref<64x256xf32, #tpu.memory_space<vmem>>, %arg12: memref<16x128xf32, #tpu.memory_space<vmem>>, %arg13: memref<16x128xf32, #tpu.memory_space<vmem>>, %arg14: memref<64x512xf32, #tpu.memory_space<vmem>>, %arg15: memref<64x128xf32, #tpu.memory_space<vmem>>, %arg16: memref<128x512xbf16, #tpu.memory_space<vmem>>, %arg17: memref<128x512xbf16, #tpu.memory_space<vmem>>, %arg18: memref<128x256xbf16, #tpu.memory_space<vmem>>, %arg19: memref<3x!tpu.dma_semaphore, #tpu.memory_space<semaphore_mem>>) attributes {dimension_semantics = [], scalar_prefetch = 0 : i64, scratch_operands = 6 : i64, tpu.core_type = #tpu.core_type<tc>} {
    %c0_i32 = arith.constant 0 : i32
    %0 = tpu.memref_slice %arg19[%c0_i32] : memref<3x!tpu.dma_semaphore, #tpu.memory_space<semaphore_mem>> -> memref<1x!tpu.dma_semaphore, #tpu.memory_space<semaphore_mem>>
    %1 = tpu.memref_squeeze %0 : memref<1x!tpu.dma_semaphore, #tpu.memory_space<semaphore_mem>> -> memref<!tpu.dma_semaphore, #tpu.memory_space<semaphore_mem>>
    tpu.enqueue_dma source(%arg8 : memref<128x512xbf16, #tpu.memory_space<any>>) target(%arg16 : memref<128x512xbf16, #tpu.memory_space<vmem>>) target_semaphore(%1 : memref<!tpu.dma_semaphore, #tpu.memory_space<semaphore_mem>>)
    %c1_i32 = arith.constant 1 : i32
    %2 = tpu.memref_slice %arg19[%c1_i32] : memref<3x!tpu.dma_semaphore, #tpu.memory_space<semaphore_mem>> -> memref<1x!tpu.dma_semaphore, #tpu.memory_space<semaphore_mem>>
    %3 = tpu.memref_squeeze %2 : memref<1x!tpu.dma_semaphore, #tpu.memory_space<semaphore_mem>> -> memref<!tpu.dma_semaphore, #tpu.memory_space<semaphore_mem>>
    tpu.enqueue_dma source(%arg9 : memref<128x512xbf16, #tpu.memory_space<any>>) target(%arg17 : memref<128x512xbf16, #tpu.memory_space<vmem>>) target_semaphore(%3 : memref<!tpu.dma_semaphore, #tpu.memory_space<semaphore_mem>>)
    %c2_i32 = arith.constant 2 : i32
    %4 = tpu.memref_slice %arg19[%c2_i32] : memref<3x!tpu.dma_semaphore, #tpu.memory_space<semaphore_mem>> -> memref<1x!tpu.dma_semaphore, #tpu.memory_space<semaphore_mem>>
    %5 = tpu.memref_squeeze %4 : memref<1x!tpu.dma_semaphore, #tpu.memory_space<semaphore_mem>> -> memref<!tpu.dma_semaphore, #tpu.memory_space<semaphore_mem>>
    tpu.enqueue_dma source(%arg10 : memref<128x256xbf16, #tpu.memory_space<any>>) target(%arg18 : memref<128x256xbf16, #tpu.memory_space<vmem>>) target_semaphore(%5 : memref<!tpu.dma_semaphore, #tpu.memory_space<semaphore_mem>>)
    %c0 = arith.constant 0 : index
    %c0_0 = arith.constant 0 : index
    %6 = vector.load %arg0[%c0, %c0_0] : memref<64x128xbf16, #tpu.memory_space<vmem>>, vector<64x128xbf16>
    %c0_1 = arith.constant 0 : index
    %c0_2 = arith.constant 0 : index
    %7 = vector.load %arg3[%c0_1, %c0_2] : memref<128x512xbf16, #tpu.memory_space<vmem>>, vector<128x512xbf16>
    %cst = arith.constant dense<0.000000e+00> : vector<64x512xf32>
    %8 = tpu.matmul %6, %7, %cst {dimension_numbers = #tpu.dot_dimension_numbers<[1], [0], [0], [1], [0, 0, 1, 1], [], []>} : vector<64x128xbf16>, vector<128x512xbf16>, vector<64x512xf32> -> vector<64x512xf32>
    %c0_3 = arith.constant 0 : index
    %c0_4 = arith.constant 0 : index
    %9 = vector.load %arg5[%c0_3, %c0_4] : memref<1x512xf32, #tpu.memory_space<vmem>>, vector<1x512xf32>
    %10 = vector.broadcast %9 : vector<1x512xf32> to vector<64x512xf32>
    %11 = arith.addf %8, %10 : vector<64x512xf32>
    %c0_5 = arith.constant 0 : index
    %c0_6 = arith.constant 0 : index
    %12 = vector.load %arg14[%c0_5, %c0_6] : memref<64x512xf32, #tpu.memory_space<vmem>>, vector<64x512xf32>
    tpu.vector_store %arg14[%c0_5, %c0_6], %11 {strides = array<i32>} : memref<64x512xf32, #tpu.memory_space<vmem>>, vector<64x512xf32>,
    %c0_7 = arith.constant 0 : index
    %c0_8 = arith.constant 0 : index
    %c0_9 = arith.constant 0 : index
    %13 = vector.load %arg1[%c0_7, %c0_8, %c0_9] : memref<2x8x128xf32, #tpu.memory_space<vmem>>, vector<1x8x128xf32>
    %14 = vector.shape_cast %13 : vector<1x8x128xf32> to vector<8x128xf32>
    %c0_10 = arith.constant 0 : index
    %c0_11 = arith.constant 0 : index
    %c0_12 = arith.constant 0 : index
    %15 = vector.load %arg2[%c0_10, %c0_11, %c0_12] : memref<2x8x128xf32, #tpu.memory_space<vmem>>, vector<1x8x128xf32>
    %16 = vector.shape_cast %15 : vector<1x8x128xf32> to vector<8x128xf32>
    %c1 = arith.constant 1 : index
    %c0_13 = arith.constant 0 : index
    %c0_14 = arith.constant 0 : index
    %17 = vector.load %arg1[%c1, %c0_13, %c0_14] : memref<2x8x128xf32, #tpu.memory_space<vmem>>, vector<1x8x128xf32>
    %18 = vector.shape_cast %17 : vector<1x8x128xf32> to vector<8x128xf32>
    %c1_15 = arith.constant 1 : index
    %c0_16 = arith.constant 0 : index
    %c0_17 = arith.constant 0 : index
    %19 = vector.load %arg2[%c1_15, %c0_16, %c0_17] : memref<2x8x128xf32, #tpu.memory_space<vmem>>, vector<1x8x128xf32>
    %20 = vector.shape_cast %19 : vector<1x8x128xf32> to vector<8x128xf32>
    %c0_18 = arith.constant 0 : index
    %c0_19 = arith.constant 0 : index
    %21 = vector.load %arg14[%c0_18, %c0_19] : memref<64x512xf32, #tpu.memory_space<vmem>>, vector<8x512xf32>
    %22 = arith.truncf %14 : vector<8x128xf32> to vector<8x128xbf16>
    %c0_20 = arith.constant 0 : index
    %c0_21 = arith.constant 0 : index
    %23 = vector.load %arg4[%c0_20, %c0_21] : memref<128x512xbf16, #tpu.memory_space<vmem>>, vector<128x512xbf16>
    %cst_22 = arith.constant dense<0.000000e+00> : vector<8x512xf32>
    %24 = tpu.matmul %22, %23, %cst_22 {dimension_numbers = #tpu.dot_dimension_numbers<[1], [0], [0], [1], [0, 0, 1, 1], [], []>} : vector<8x128xbf16>, vector<128x512xbf16>, vector<8x512xf32> -> vector<8x512xf32>
    %25 = arith.addf %21, %24 : vector<8x512xf32>
    %26 = vector.extract_strided_slice %25 {offsets = [0, 0], sizes = [8, 384], strides = [1, 1]} : vector<8x512xf32> to vector<8x384xf32>
    %cst_23 = arith.constant 5.000000e-01 : f32
    %27 = vector.broadcast %cst_23 : f32 to vector<8x384xf32>
    %28 = arith.mulf %27, %26 : vector<8x384xf32>
    %29 = math.tanh %28 : vector<8x384xf32>
    %cst_24 = arith.constant 5.000000e-01 : f32
    %30 = vector.broadcast %cst_24 : f32 to vector<8x384xf32>
    %31 = arith.mulf %29, %30 : vector<8x384xf32>
    %cst_25 = arith.constant 5.000000e-01 : f32
    %32 = vector.broadcast %cst_25 : f32 to vector<8x384xf32>
    %33 = arith.addf %31, %32 : vector<8x384xf32>
    %34 = vector.extract_strided_slice %33 {offsets = [0, 0], sizes = [8, 128], strides = [1, 1]} : vector<8x384xf32> to vector<8x128xf32>
    %35 = vector.extract_strided_slice %33 {offsets = [0, 128], sizes = [8, 128], strides = [1, 1]} : vector<8x384xf32> to vector<8x128xf32>
    %36 = vector.extract_strided_slice %33 {offsets = [0, 256], sizes = [8, 128], strides = [1, 1]} : vector<8x384xf32> to vector<8x128xf32>
    %37 = vector.extract_strided_slice %25 {offsets = [0, 384], sizes = [8, 128], strides = [1, 1]} : vector<8x512xf32> to vector<8x128xf32>
    %38 = math.tanh %37 : vector<8x128xf32>
    %39 = arith.mulf %35, %16 : vector<8x128xf32>
    %40 = arith.mulf %34, %38 : vector<8x128xf32>
    %41 = arith.addf %39, %40 : vector<8x128xf32>
    %42 = math.tanh %41 : vector<8x128xf32>
    %43 = arith.mulf %36, %42 : vector<8x128xf32>
    %c0_i32_26 = arith.constant 0 : i32
    %44 = tpu.memref_slice %arg19[%c0_i32_26] : memref<3x!tpu.dma_semaphore, #tpu.memory_space<semaphore_mem>> -> memref<1x!tpu.dma_semaphore, #tpu.memory_space<semaphore_mem>>
    %45 = tpu.memref_squeeze %44 : memref<1x!tpu.dma_semaphore, #tpu.memory_space<semaphore_mem>> -> memref<!tpu.dma_semaphore, #tpu.memory_space<semaphore_mem>>
    tpu.wait_dma2 semaphore(%45 : memref<!tpu.dma_semaphore, #tpu.memory_space<semaphore_mem>>) src(%arg8 : memref<128x512xbf16, #tpu.memory_space<any>>) dst(%arg16 : memref<128x512xbf16, #tpu.memory_space<vmem>>)
    %c1_i32_27 = arith.constant 1 : i32
    %46 = tpu.memref_slice %arg19[%c1_i32_27] : memref<3x!tpu.dma_semaphore, #tpu.memory_space<semaphore_mem>> -> memref<1x!tpu.dma_semaphore, #tpu.memory_space<semaphore_mem>>
    %47 = tpu.memref_squeeze %46 : memref<1x!tpu.dma_semaphore, #tpu.memory_space<semaphore_mem>> -> memref<!tpu.dma_semaphore, #tpu.memory_space<semaphore_mem>>
    tpu.wait_dma2 semaphore(%47 : memref<!tpu.dma_semaphore, #tpu.memory_space<semaphore_mem>>) src(%arg9 : memref<128x512xbf16, #tpu.memory_space<any>>) dst(%arg17 : memref<128x512xbf16, #tpu.memory_space<vmem>>)
    %48 = arith.truncf %43 : vector<8x128xf32> to vector<8x128xbf16>
    %c0_28 = arith.constant 0 : index
    %c0_29 = arith.constant 0 : index
    %49 = vector.load %arg16[%c0_28, %c0_29] : memref<128x512xbf16, #tpu.memory_space<vmem>>, vector<128x512xbf16>
    %cst_30 = arith.constant dense<0.000000e+00> : vector<8x512xf32>
    %50 = tpu.matmul %48, %49, %cst_30 {dimension_numbers = #tpu.dot_dimension_numbers<[1], [0], [0], [1], [0, 0, 1, 1], [], []>} : vector<8x128xbf16>, vector<128x512xbf16>, vector<8x512xf32> -> vector<8x512xf32>
    %51 = arith.truncf %18 : vector<8x128xf32> to vector<8x128xbf16>
    %c0_31 = arith.constant 0 : index
    %c0_32 = arith.constant 0 : index
    %52 = vector.load %arg17[%c0_31, %c0_32] : memref<128x512xbf16, #tpu.memory_space<vmem>>, vector<128x512xbf16>
    %cst_33 = arith.constant dense<0.000000e+00> : vector<8x512xf32>
    %53 = tpu.matmul %51, %52, %cst_33 {dimension_numbers = #tpu.dot_dimension_numbers<[1], [0], [0], [1], [0, 0, 1, 1], [], []>} : vector<8x128xbf16>, vector<128x512xbf16>, vector<8x512xf32> -> vector<8x512xf32>
    %54 = arith.addf %50, %53 : vector<8x512xf32>
    %c0_34 = arith.constant 0 : index
    %c0_35 = arith.constant 0 : index
    %55 = vector.load %arg6[%c0_34, %c0_35] : memref<1x512xf32, #tpu.memory_space<vmem>>, vector<1x512xf32>
    %56 = vector.broadcast %55 : vector<1x512xf32> to vector<8x512xf32>
    %57 = arith.addf %54, %56 : vector<8x512xf32>
    %58 = vector.extract_strided_slice %57 {offsets = [0, 0], sizes = [8, 384], strides = [1, 1]} : vector<8x512xf32> to vector<8x384xf32>
    %cst_36 = arith.constant 5.000000e-01 : f32
    %59 = vector.broadcast %cst_36 : f32 to vector<8x384xf32>
    %60 = arith.mulf %59, %58 : vector<8x384xf32>
    %61 = math.tanh %60 : vector<8x384xf32>
    %cst_37 = arith.constant 5.000000e-01 : f32
    %62 = vector.broadcast %cst_37 : f32 to vector<8x384xf32>
    %63 = arith.mulf %61, %62 : vector<8x384xf32>
    %cst_38 = arith.constant 5.000000e-01 : f32
    %64 = vector.broadcast %cst_38 : f32 to vector<8x384xf32>
    %65 = arith.addf %63, %64 : vector<8x384xf32>
    %66 = vector.extract_strided_slice %65 {offsets = [0, 0], sizes = [8, 128], strides = [1, 1]} : vector<8x384xf32> to vector<8x128xf32>
    %67 = vector.extract_strided_slice %65 {offsets = [0, 128], sizes = [8, 128], strides = [1, 1]} : vector<8x384xf32> to vector<8x128xf32>
    %68 = vector.extract_strided_slice %65 {offsets = [0, 256], sizes = [8, 128], strides = [1, 1]} : vector<8x384xf32> to vector<8x128xf32>
    %69 = vector.extract_strided_slice %57 {offsets = [0, 384], sizes = [8, 128], strides = [1, 1]} : vector<8x512xf32> to vector<8x128xf32>
    %70 = math.tanh %69 : vector<8x128xf32>
    %71 = arith.mulf %67, %20 : vector<8x128xf32>
    %72 = arith.mulf %66, %70 : vector<8x128xf32>
    %73 = arith.addf %71, %72 : vector<8x128xf32>
    %74 = math.tanh %73 : vector<8x128xf32>
    %75 = arith.mulf %68, %74 : vector<8x128xf32>
    %c0_39 = arith.constant 0 : index
    %c0_40 = arith.constant 0 : index
    %76 = vector.load %arg15[%c0_39, %c0_40] : memref<64x128xf32, #tpu.memory_space<vmem>>, vector<8x128xf32>
    tpu.vector_store %arg15[%c0_39, %c0_40], %75 {strides = array<i32>} : memref<64x128xf32, #tpu.memory_space<vmem>>, vector<8x128xf32>,
    %c8 = arith.constant 8 : index
    %c0_41 = arith.constant 0 : index
    %77 = vector.load %arg14[%c8, %c0_41] : memref<64x512xf32, #tpu.memory_space<vmem>>, vector<8x512xf32>
    %78 = arith.truncf %43 : vector<8x128xf32> to vector<8x128xbf16>
    %c0_42 = arith.constant 0 : index
    %c0_43 = arith.constant 0 : index
    %79 = vector.load %arg4[%c0_42, %c0_43] : memref<128x512xbf16, #tpu.memory_space<vmem>>, vector<128x512xbf16>
    %cst_44 = arith.constant dense<0.000000e+00> : vector<8x512xf32>
    %80 = tpu.matmul %78, %79, %cst_44 {dimension_numbers = #tpu.dot_dimension_numbers<[1], [0], [0], [1], [0, 0, 1, 1], [], []>} : vector<8x128xbf16>, vector<128x512xbf16>, vector<8x512xf32> -> vector<8x512xf32>
    %81 = arith.addf %77, %80 : vector<8x512xf32>
    %82 = vector.extract_strided_slice %81 {offsets = [0, 0], sizes = [8, 384], strides = [1, 1]} : vector<8x512xf32> to vector<8x384xf32>
    %cst_45 = arith.constant 5.000000e-01 : f32
    %83 = vector.broadcast %cst_45 : f32 to vector<8x384xf32>
    %84 = arith.mulf %83, %82 : vector<8x384xf32>
    %85 = math.tanh %84 : vector<8x384xf32>
    %cst_46 = arith.constant 5.000000e-01 : f32
    %86 = vector.broadcast %cst_46 : f32 to vector<8x384xf32>
    %87 = arith.mulf %85, %86 : vector<8x384xf32>
    %cst_47 = arith.constant 5.000000e-01 : f32
    %88 = vector.broadcast %cst_47 : f32 to vector<8x384xf32>
    %89 = arith.addf %87, %88 : vector<8x384xf32>
    %90 = vector.extract_strided_slice %89 {offsets = [0, 0], sizes = [8, 128], strides = [1, 1]} : vector<8x384xf32> to vector<8x128xf32>
    %91 = vector.extract_strided_slice %89 {offsets = [0, 128], sizes = [8, 128], strides = [1, 1]} : vector<8x384xf32> to vector<8x128xf32>
    %92 = vector.extract_strided_slice %89 {offsets = [0, 256], sizes = [8, 128], strides = [1, 1]} : vector<8x384xf32> to vector<8x128xf32>
    %93 = vector.extract_strided_slice %81 {offsets = [0, 384], sizes = [8, 128], strides = [1, 1]} : vector<8x512xf32> to vector<8x128xf32>
    %94 = math.tanh %93 : vector<8x128xf32>
    %95 = arith.mulf %91, %41 : vector<8x128xf32>
    %96 = arith.mulf %90, %94 : vector<8x128xf32>
    %97 = arith.addf %95, %96 : vector<8x128xf32>
    %98 = math.tanh %97 : vector<8x128xf32>
    %99 = arith.mulf %92, %98 : vector<8x128xf32>
    %100 = arith.truncf %99 : vector<8x128xf32> to vector<8x128xbf16>
    %c0_48 = arith.constant 0 : index
    %c0_49 = arith.constant 0 : index
    %101 = vector.load %arg16[%c0_48, %c0_49] : memref<128x512xbf16, #tpu.memory_space<vmem>>, vector<128x512xbf16>
    %cst_50 = arith.constant dense<0.000000e+00> : vector<8x512xf32>
    %102 = tpu.matmul %100, %101, %cst_50 {dimension_numbers = #tpu.dot_dimension_numbers<[1], [0], [0], [1], [0, 0, 1, 1], [], []>} : vector<8x128xbf16>, vector<128x512xbf16>, vector<8x512xf32> -> vector<8x512xf32>
    %103 = arith.truncf %75 : vector<8x128xf32> to vector<8x128xbf16>
    %c0_51 = arith.constant 0 : index
    %c0_52 = arith.constant 0 : index
    %104 = vector.load %arg17[%c0_51, %c0_52] : memref<128x512xbf16, #tpu.memory_space<vmem>>, vector<128x512xbf16>
    %cst_53 = arith.constant dense<0.000000e+00> : vector<8x512xf32>
    %105 = tpu.matmul %103, %104, %cst_53 {dimension_numbers = #tpu.dot_dimension_numbers<[1], [0], [0], [1], [0, 0, 1, 1], [], []>} : vector<8x128xbf16>, vector<128x512xbf16>, vector<8x512xf32> -> vector<8x512xf32>
    %106 = arith.addf %102, %105 : vector<8x512xf32>
    %c0_54 = arith.constant 0 : index
    %c0_55 = arith.constant 0 : index
    %107 = vector.load %arg6[%c0_54, %c0_55] : memref<1x512xf32, #tpu.memory_space<vmem>>, vector<1x512xf32>
    %108 = vector.broadcast %107 : vector<1x512xf32> to vector<8x512xf32>
    %109 = arith.addf %106, %108 : vector<8x512xf32>
    %110 = vector.extract_strided_slice %109 {offsets = [0, 0], sizes = [8, 384], strides = [1, 1]} : vector<8x512xf32> to vector<8x384xf32>
    %cst_56 = arith.constant 5.000000e-01 : f32
    %111 = vector.broadcast %cst_56 : f32 to vector<8x384xf32>
    %112 = arith.mulf %111, %110 : vector<8x384xf32>
    %113 = math.tanh %112 : vector<8x384xf32>
    %cst_57 = arith.constant 5.000000e-01 : f32
    %114 = vector.broadcast %cst_57 : f32 to vector<8x384xf32>
    %115 = arith.mulf %113, %114 : vector<8x384xf32>
    %cst_58 = arith.constant 5.000000e-01 : f32
    %116 = vector.broadcast %cst_58 : f32 to vector<8x384xf32>
    %117 = arith.addf %115, %116 : vector<8x384xf32>
    %118 = vector.extract_strided_slice %117 {offsets = [0, 0], sizes = [8, 128], strides = [1, 1]} : vector<8x384xf32> to vector<8x128xf32>
    %119 = vector.extract_strided_slice %117 {offsets = [0, 128], sizes = [8, 128], strides = [1, 1]} : vector<8x384xf32> to vector<8x128xf32>
    %120 = vector.extract_strided_slice %117 {offsets = [0, 256], sizes = [8, 128], strides = [1, 1]} : vector<8x384xf32> to vector<8x128xf32>
    %121 = vector.extract_strided_slice %109 {offsets = [0, 384], sizes = [8, 128], strides = [1, 1]} : vector<8x512xf32> to vector<8x128xf32>
    %122 = math.tanh %121 : vector<8x128xf32>
    %123 = arith.mulf %119, %73 : vector<8x128xf32>
    %124 = arith.mulf %118, %122 : vector<8x128xf32>
    %125 = arith.addf %123, %124 : vector<8x128xf32>
    %126 = math.tanh %125 : vector<8x128xf32>
    %127 = arith.mulf %120, %126 : vector<8x128xf32>
    %c8_59 = arith.constant 8 : index
    %c0_60 = arith.constant 0 : index
    %128 = vector.load %arg15[%c8_59, %c0_60] : memref<64x128xf32, #tpu.memory_space<vmem>>, vector<8x128xf32>
    tpu.vector_store %arg15[%c8_59, %c0_60], %127 {strides = array<i32>} : memref<64x128xf32, #tpu.memory_space<vmem>>, vector<8x128xf32>,
    %c16 = arith.constant 16 : index
    %c0_61 = arith.constant 0 : index
    %129 = vector.load %arg14[%c16, %c0_61] : memref<64x512xf32, #tpu.memory_space<vmem>>, vector<8x512xf32>
    %130 = arith.truncf %99 : vector<8x128xf32> to vector<8x128xbf16>
    %c0_62 = arith.constant 0 : index
    %c0_63 = arith.constant 0 : index
    %131 = vector.load %arg4[%c0_62, %c0_63] : memref<128x512xbf16, #tpu.memory_space<vmem>>, vector<128x512xbf16>
    %cst_64 = arith.constant dense<0.000000e+00> : vector<8x512xf32>
    %132 = tpu.matmul %130, %131, %cst_64 {dimension_numbers = #tpu.dot_dimension_numbers<[1], [0], [0], [1], [0, 0, 1, 1], [], []>} : vector<8x128xbf16>, vector<128x512xbf16>, vector<8x512xf32> -> vector<8x512xf32>
    %133 = arith.addf %129, %132 : vector<8x512xf32>
    %134 = vector.extract_strided_slice %133 {offsets = [0, 0], sizes = [8, 384], strides = [1, 1]} : vector<8x512xf32> to vector<8x384xf32>
    %cst_65 = arith.constant 5.000000e-01 : f32
    %135 = vector.broadcast %cst_65 : f32 to vector<8x384xf32>
    %136 = arith.mulf %135, %134 : vector<8x384xf32>
    %137 = math.tanh %136 : vector<8x384xf32>
    %cst_66 = arith.constant 5.000000e-01 : f32
    %138 = vector.broadcast %cst_66 : f32 to vector<8x384xf32>
    %139 = arith.mulf %137, %138 : vector<8x384xf32>
    %cst_67 = arith.constant 5.000000e-01 : f32
    %140 = vector.broadcast %cst_67 : f32 to vector<8x384xf32>
    %141 = arith.addf %139, %140 : vector<8x384xf32>
    %142 = vector.extract_strided_slice %141 {offsets = [0, 0], sizes = [8, 128], strides = [1, 1]} : vector<8x384xf32> to vector<8x128xf32>
    %143 = vector.extract_strided_slice %141 {offsets = [0, 128], sizes = [8, 128], strides = [1, 1]} : vector<8x384xf32> to vector<8x128xf32>
    %144 = vector.extract_strided_slice %141 {offsets = [0, 256], sizes = [8, 128], strides = [1, 1]} : vector<8x384xf32> to vector<8x128xf32>
    %145 = vector.extract_strided_slice %133 {offsets = [0, 384], sizes = [8, 128], strides = [1, 1]} : vector<8x512xf32> to vector<8x128xf32>
    %146 = math.tanh %145 : vector<8x128xf32>
    %147 = arith.mulf %143, %97 : vector<8x128xf32>
    %148 = arith.mulf %142, %146 : vector<8x128xf32>
    %149 = arith.addf %147, %148 : vector<8x128xf32>
    %150 = math.tanh %149 : vector<8x128xf32>
    %151 = arith.mulf %144, %150 : vector<8x128xf32>
    %152 = arith.truncf %151 : vector<8x128xf32> to vector<8x128xbf16>
    %c0_68 = arith.constant 0 : index
    %c0_69 = arith.constant 0 : index
    %153 = vector.load %arg16[%c0_68, %c0_69] : memref<128x512xbf16, #tpu.memory_space<vmem>>, vector<128x512xbf16>
    %cst_70 = arith.constant dense<0.000000e+00> : vector<8x512xf32>
    %154 = tpu.matmul %152, %153, %cst_70 {dimension_numbers = #tpu.dot_dimension_numbers<[1], [0], [0], [1], [0, 0, 1, 1], [], []>} : vector<8x128xbf16>, vector<128x512xbf16>, vector<8x512xf32> -> vector<8x512xf32>
    %155 = arith.truncf %127 : vector<8x128xf32> to vector<8x128xbf16>
    %c0_71 = arith.constant 0 : index
    %c0_72 = arith.constant 0 : index
    %156 = vector.load %arg17[%c0_71, %c0_72] : memref<128x512xbf16, #tpu.memory_space<vmem>>, vector<128x512xbf16>
    %cst_73 = arith.constant dense<0.000000e+00> : vector<8x512xf32>
    %157 = tpu.matmul %155, %156, %cst_73 {dimension_numbers = #tpu.dot_dimension_numbers<[1], [0], [0], [1], [0, 0, 1, 1], [], []>} : vector<8x128xbf16>, vector<128x512xbf16>, vector<8x512xf32> -> vector<8x512xf32>
    %158 = arith.addf %154, %157 : vector<8x512xf32>
    %c0_74 = arith.constant 0 : index
    %c0_75 = arith.constant 0 : index
    %159 = vector.load %arg6[%c0_74, %c0_75] : memref<1x512xf32, #tpu.memory_space<vmem>>, vector<1x512xf32>
    %160 = vector.broadcast %159 : vector<1x512xf32> to vector<8x512xf32>
    %161 = arith.addf %158, %160 : vector<8x512xf32>
    %162 = vector.extract_strided_slice %161 {offsets = [0, 0], sizes = [8, 384], strides = [1, 1]} : vector<8x512xf32> to vector<8x384xf32>
    %cst_76 = arith.constant 5.000000e-01 : f32
    %163 = vector.broadcast %cst_76 : f32 to vector<8x384xf32>
    %164 = arith.mulf %163, %162 : vector<8x384xf32>
    %165 = math.tanh %164 : vector<8x384xf32>
    %cst_77 = arith.constant 5.000000e-01 : f32
    %166 = vector.broadcast %cst_77 : f32 to vector<8x384xf32>
    %167 = arith.mulf %165, %166 : vector<8x384xf32>
    %cst_78 = arith.constant 5.000000e-01 : f32
    %168 = vector.broadcast %cst_78 : f32 to vector<8x384xf32>
    %169 = arith.addf %167, %168 : vector<8x384xf32>
    %170 = vector.extract_strided_slice %169 {offsets = [0, 0], sizes = [8, 128], strides = [1, 1]} : vector<8x384xf32> to vector<8x128xf32>
    %171 = vector.extract_strided_slice %169 {offsets = [0, 128], sizes = [8, 128], strides = [1, 1]} : vector<8x384xf32> to vector<8x128xf32>
    %172 = vector.extract_strided_slice %169 {offsets = [0, 256], sizes = [8, 128], strides = [1, 1]} : vector<8x384xf32> to vector<8x128xf32>
    %173 = vector.extract_strided_slice %161 {offsets = [0, 384], sizes = [8, 128], strides = [1, 1]} : vector<8x512xf32> to vector<8x128xf32>
    %174 = math.tanh %173 : vector<8x128xf32>
    %175 = arith.mulf %171, %125 : vector<8x128xf32>
    %176 = arith.mulf %170, %174 : vector<8x128xf32>
    %177 = arith.addf %175, %176 : vector<8x128xf32>
    %178 = math.tanh %177 : vector<8x128xf32>
    %179 = arith.mulf %172, %178 : vector<8x128xf32>
    %c16_79 = arith.constant 16 : index
    %c0_80 = arith.constant 0 : index
    %180 = vector.load %arg15[%c16_79, %c0_80] : memref<64x128xf32, #tpu.memory_space<vmem>>, vector<8x128xf32>
    tpu.vector_store %arg15[%c16_79, %c0_80], %179 {strides = array<i32>} : memref<64x128xf32, #tpu.memory_space<vmem>>, vector<8x128xf32>,
    %c24 = arith.constant 24 : index
    %c0_81 = arith.constant 0 : index
    %181 = vector.load %arg14[%c24, %c0_81] : memref<64x512xf32, #tpu.memory_space<vmem>>, vector<8x512xf32>
    %182 = arith.truncf %151 : vector<8x128xf32> to vector<8x128xbf16>
    %c0_82 = arith.constant 0 : index
    %c0_83 = arith.constant 0 : index
    %183 = vector.load %arg4[%c0_82, %c0_83] : memref<128x512xbf16, #tpu.memory_space<vmem>>, vector<128x512xbf16>
    %cst_84 = arith.constant dense<0.000000e+00> : vector<8x512xf32>
    %184 = tpu.matmul %182, %183, %cst_84 {dimension_numbers = #tpu.dot_dimension_numbers<[1], [0], [0], [1], [0, 0, 1, 1], [], []>} : vector<8x128xbf16>, vector<128x512xbf16>, vector<8x512xf32> -> vector<8x512xf32>
    %185 = arith.addf %181, %184 : vector<8x512xf32>
    %186 = vector.extract_strided_slice %185 {offsets = [0, 0], sizes = [8, 384], strides = [1, 1]} : vector<8x512xf32> to vector<8x384xf32>
    %cst_85 = arith.constant 5.000000e-01 : f32
    %187 = vector.broadcast %cst_85 : f32 to vector<8x384xf32>
    %188 = arith.mulf %187, %186 : vector<8x384xf32>
    %189 = math.tanh %188 : vector<8x384xf32>
    %cst_86 = arith.constant 5.000000e-01 : f32
    %190 = vector.broadcast %cst_86 : f32 to vector<8x384xf32>
    %191 = arith.mulf %189, %190 : vector<8x384xf32>
    %cst_87 = arith.constant 5.000000e-01 : f32
    %192 = vector.broadcast %cst_87 : f32 to vector<8x384xf32>
    %193 = arith.addf %191, %192 : vector<8x384xf32>
    %194 = vector.extract_strided_slice %193 {offsets = [0, 0], sizes = [8, 128], strides = [1, 1]} : vector<8x384xf32> to vector<8x128xf32>
    %195 = vector.extract_strided_slice %193 {offsets = [0, 128], sizes = [8, 128], strides = [1, 1]} : vector<8x384xf32> to vector<8x128xf32>
    %196 = vector.extract_strided_slice %193 {offsets = [0, 256], sizes = [8, 128], strides = [1, 1]} : vector<8x384xf32> to vector<8x128xf32>
    %197 = vector.extract_strided_slice %185 {offsets = [0, 384], sizes = [8, 128], strides = [1, 1]} : vector<8x512xf32> to vector<8x128xf32>
    %198 = math.tanh %197 : vector<8x128xf32>
    %199 = arith.mulf %195, %149 : vector<8x128xf32>
    %200 = arith.mulf %194, %198 : vector<8x128xf32>
    %201 = arith.addf %199, %200 : vector<8x128xf32>
    %202 = math.tanh %201 : vector<8x128xf32>
    %203 = arith.mulf %196, %202 : vector<8x128xf32>
    %204 = arith.truncf %203 : vector<8x128xf32> to vector<8x128xbf16>
    %c0_88 = arith.constant 0 : index
    %c0_89 = arith.constant 0 : index
    %205 = vector.load %arg16[%c0_88, %c0_89] : memref<128x512xbf16, #tpu.memory_space<vmem>>, vector<128x512xbf16>
    %cst_90 = arith.constant dense<0.000000e+00> : vector<8x512xf32>
    %206 = tpu.matmul %204, %205, %cst_90 {dimension_numbers = #tpu.dot_dimension_numbers<[1], [0], [0], [1], [0, 0, 1, 1], [], []>} : vector<8x128xbf16>, vector<128x512xbf16>, vector<8x512xf32> -> vector<8x512xf32>
    %207 = arith.truncf %179 : vector<8x128xf32> to vector<8x128xbf16>
    %c0_91 = arith.constant 0 : index
    %c0_92 = arith.constant 0 : index
    %208 = vector.load %arg17[%c0_91, %c0_92] : memref<128x512xbf16, #tpu.memory_space<vmem>>, vector<128x512xbf16>
    %cst_93 = arith.constant dense<0.000000e+00> : vector<8x512xf32>
    %209 = tpu.matmul %207, %208, %cst_93 {dimension_numbers = #tpu.dot_dimension_numbers<[1], [0], [0], [1], [0, 0, 1, 1], [], []>} : vector<8x128xbf16>, vector<128x512xbf16>, vector<8x512xf32> -> vector<8x512xf32>
    %210 = arith.addf %206, %209 : vector<8x512xf32>
    %c0_94 = arith.constant 0 : index
    %c0_95 = arith.constant 0 : index
    %211 = vector.load %arg6[%c0_94, %c0_95] : memref<1x512xf32, #tpu.memory_space<vmem>>, vector<1x512xf32>
    %212 = vector.broadcast %211 : vector<1x512xf32> to vector<8x512xf32>
    %213 = arith.addf %210, %212 : vector<8x512xf32>
    %214 = vector.extract_strided_slice %213 {offsets = [0, 0], sizes = [8, 384], strides = [1, 1]} : vector<8x512xf32> to vector<8x384xf32>
    %cst_96 = arith.constant 5.000000e-01 : f32
    %215 = vector.broadcast %cst_96 : f32 to vector<8x384xf32>
    %216 = arith.mulf %215, %214 : vector<8x384xf32>
    %217 = math.tanh %216 : vector<8x384xf32>
    %cst_97 = arith.constant 5.000000e-01 : f32
    %218 = vector.broadcast %cst_97 : f32 to vector<8x384xf32>
    %219 = arith.mulf %217, %218 : vector<8x384xf32>
    %cst_98 = arith.constant 5.000000e-01 : f32
    %220 = vector.broadcast %cst_98 : f32 to vector<8x384xf32>
    %221 = arith.addf %219, %220 : vector<8x384xf32>
    %222 = vector.extract_strided_slice %221 {offsets = [0, 0], sizes = [8, 128], strides = [1, 1]} : vector<8x384xf32> to vector<8x128xf32>
    %223 = vector.extract_strided_slice %221 {offsets = [0, 128], sizes = [8, 128], strides = [1, 1]} : vector<8x384xf32> to vector<8x128xf32>
    %224 = vector.extract_strided_slice %221 {offsets = [0, 256], sizes = [8, 128], strides = [1, 1]} : vector<8x384xf32> to vector<8x128xf32>
    %225 = vector.extract_strided_slice %213 {offsets = [0, 384], sizes = [8, 128], strides = [1, 1]} : vector<8x512xf32> to vector<8x128xf32>
    %226 = math.tanh %225 : vector<8x128xf32>
    %227 = arith.mulf %223, %177 : vector<8x128xf32>
    %228 = arith.mulf %222, %226 : vector<8x128xf32>
    %229 = arith.addf %227, %228 : vector<8x128xf32>
    %230 = math.tanh %229 : vector<8x128xf32>
    %231 = arith.mulf %224, %230 : vector<8x128xf32>
    %c24_99 = arith.constant 24 : index
    %c0_100 = arith.constant 0 : index
    %232 = vector.load %arg15[%c24_99, %c0_100] : memref<64x128xf32, #tpu.memory_space<vmem>>, vector<8x128xf32>
    tpu.vector_store %arg15[%c24_99, %c0_100], %231 {strides = array<i32>} : memref<64x128xf32, #tpu.memory_space<vmem>>, vector<8x128xf32>,
    %c32 = arith.constant 32 : index
    %c0_101 = arith.constant 0 : index
    %233 = vector.load %arg14[%c32, %c0_101] : memref<64x512xf32, #tpu.memory_space<vmem>>, vector<8x512xf32>
    %234 = arith.truncf %203 : vector<8x128xf32> to vector<8x128xbf16>
    %c0_102 = arith.constant 0 : index
    %c0_103 = arith.constant 0 : index
    %235 = vector.load %arg4[%c0_102, %c0_103] : memref<128x512xbf16, #tpu.memory_space<vmem>>, vector<128x512xbf16>
    %cst_104 = arith.constant dense<0.000000e+00> : vector<8x512xf32>
    %236 = tpu.matmul %234, %235, %cst_104 {dimension_numbers = #tpu.dot_dimension_numbers<[1], [0], [0], [1], [0, 0, 1, 1], [], []>} : vector<8x128xbf16>, vector<128x512xbf16>, vector<8x512xf32> -> vector<8x512xf32>
    %237 = arith.addf %233, %236 : vector<8x512xf32>
    %238 = vector.extract_strided_slice %237 {offsets = [0, 0], sizes = [8, 384], strides = [1, 1]} : vector<8x512xf32> to vector<8x384xf32>
    %cst_105 = arith.constant 5.000000e-01 : f32
    %239 = vector.broadcast %cst_105 : f32 to vector<8x384xf32>
    %240 = arith.mulf %239, %238 : vector<8x384xf32>
    %241 = math.tanh %240 : vector<8x384xf32>
    %cst_106 = arith.constant 5.000000e-01 : f32
    %242 = vector.broadcast %cst_106 : f32 to vector<8x384xf32>
    %243 = arith.mulf %241, %242 : vector<8x384xf32>
    %cst_107 = arith.constant 5.000000e-01 : f32
    %244 = vector.broadcast %cst_107 : f32 to vector<8x384xf32>
    %245 = arith.addf %243, %244 : vector<8x384xf32>
    %246 = vector.extract_strided_slice %245 {offsets = [0, 0], sizes = [8, 128], strides = [1, 1]} : vector<8x384xf32> to vector<8x128xf32>
    %247 = vector.extract_strided_slice %245 {offsets = [0, 128], sizes = [8, 128], strides = [1, 1]} : vector<8x384xf32> to vector<8x128xf32>
    %248 = vector.extract_strided_slice %245 {offsets = [0, 256], sizes = [8, 128], strides = [1, 1]} : vector<8x384xf32> to vector<8x128xf32>
    %249 = vector.extract_strided_slice %237 {offsets = [0, 384], sizes = [8, 128], strides = [1, 1]} : vector<8x512xf32> to vector<8x128xf32>
    %250 = math.tanh %249 : vector<8x128xf32>
    %251 = arith.mulf %247, %201 : vector<8x128xf32>
    %252 = arith.mulf %246, %250 : vector<8x128xf32>
    %253 = arith.addf %251, %252 : vector<8x128xf32>
    %254 = math.tanh %253 : vector<8x128xf32>
    %255 = arith.mulf %248, %254 : vector<8x128xf32>
    %256 = arith.truncf %255 : vector<8x128xf32> to vector<8x128xbf16>
    %c0_108 = arith.constant 0 : index
    %c0_109 = arith.constant 0 : index
    %257 = vector.load %arg16[%c0_108, %c0_109] : memref<128x512xbf16, #tpu.memory_space<vmem>>, vector<128x512xbf16>
    %cst_110 = arith.constant dense<0.000000e+00> : vector<8x512xf32>
    %258 = tpu.matmul %256, %257, %cst_110 {dimension_numbers = #tpu.dot_dimension_numbers<[1], [0], [0], [1], [0, 0, 1, 1], [], []>} : vector<8x128xbf16>, vector<128x512xbf16>, vector<8x512xf32> -> vector<8x512xf32>
    %259 = arith.truncf %231 : vector<8x128xf32> to vector<8x128xbf16>
    %c0_111 = arith.constant 0 : index
    %c0_112 = arith.constant 0 : index
    %260 = vector.load %arg17[%c0_111, %c0_112] : memref<128x512xbf16, #tpu.memory_space<vmem>>, vector<128x512xbf16>
    %cst_113 = arith.constant dense<0.000000e+00> : vector<8x512xf32>
    %261 = tpu.matmul %259, %260, %cst_113 {dimension_numbers = #tpu.dot_dimension_numbers<[1], [0], [0], [1], [0, 0, 1, 1], [], []>} : vector<8x128xbf16>, vector<128x512xbf16>, vector<8x512xf32> -> vector<8x512xf32>
    %262 = arith.addf %258, %261 : vector<8x512xf32>
    %c0_114 = arith.constant 0 : index
    %c0_115 = arith.constant 0 : index
    %263 = vector.load %arg6[%c0_114, %c0_115] : memref<1x512xf32, #tpu.memory_space<vmem>>, vector<1x512xf32>
    %264 = vector.broadcast %263 : vector<1x512xf32> to vector<8x512xf32>
    %265 = arith.addf %262, %264 : vector<8x512xf32>
    %266 = vector.extract_strided_slice %265 {offsets = [0, 0], sizes = [8, 384], strides = [1, 1]} : vector<8x512xf32> to vector<8x384xf32>
    %cst_116 = arith.constant 5.000000e-01 : f32
    %267 = vector.broadcast %cst_116 : f32 to vector<8x384xf32>
    %268 = arith.mulf %267, %266 : vector<8x384xf32>
    %269 = math.tanh %268 : vector<8x384xf32>
    %cst_117 = arith.constant 5.000000e-01 : f32
    %270 = vector.broadcast %cst_117 : f32 to vector<8x384xf32>
    %271 = arith.mulf %269, %270 : vector<8x384xf32>
    %cst_118 = arith.constant 5.000000e-01 : f32
    %272 = vector.broadcast %cst_118 : f32 to vector<8x384xf32>
    %273 = arith.addf %271, %272 : vector<8x384xf32>
    %274 = vector.extract_strided_slice %273 {offsets = [0, 0], sizes = [8, 128], strides = [1, 1]} : vector<8x384xf32> to vector<8x128xf32>
    %275 = vector.extract_strided_slice %273 {offsets = [0, 128], sizes = [8, 128], strides = [1, 1]} : vector<8x384xf32> to vector<8x128xf32>
    %276 = vector.extract_strided_slice %273 {offsets = [0, 256], sizes = [8, 128], strides = [1, 1]} : vector<8x384xf32> to vector<8x128xf32>
    %277 = vector.extract_strided_slice %265 {offsets = [0, 384], sizes = [8, 128], strides = [1, 1]} : vector<8x512xf32> to vector<8x128xf32>
    %278 = math.tanh %277 : vector<8x128xf32>
    %279 = arith.mulf %275, %229 : vector<8x128xf32>
    %280 = arith.mulf %274, %278 : vector<8x128xf32>
    %281 = arith.addf %279, %280 : vector<8x128xf32>
    %282 = math.tanh %281 : vector<8x128xf32>
    %283 = arith.mulf %276, %282 : vector<8x128xf32>
    %c32_119 = arith.constant 32 : index
    %c0_120 = arith.constant 0 : index
    %284 = vector.load %arg15[%c32_119, %c0_120] : memref<64x128xf32, #tpu.memory_space<vmem>>, vector<8x128xf32>
    tpu.vector_store %arg15[%c32_119, %c0_120], %283 {strides = array<i32>} : memref<64x128xf32, #tpu.memory_space<vmem>>, vector<8x128xf32>,
    %c40 = arith.constant 40 : index
    %c0_121 = arith.constant 0 : index
    %285 = vector.load %arg14[%c40, %c0_121] : memref<64x512xf32, #tpu.memory_space<vmem>>, vector<8x512xf32>
    %286 = arith.truncf %255 : vector<8x128xf32> to vector<8x128xbf16>
    %c0_122 = arith.constant 0 : index
    %c0_123 = arith.constant 0 : index
    %287 = vector.load %arg4[%c0_122, %c0_123] : memref<128x512xbf16, #tpu.memory_space<vmem>>, vector<128x512xbf16>
    %cst_124 = arith.constant dense<0.000000e+00> : vector<8x512xf32>
    %288 = tpu.matmul %286, %287, %cst_124 {dimension_numbers = #tpu.dot_dimension_numbers<[1], [0], [0], [1], [0, 0, 1, 1], [], []>} : vector<8x128xbf16>, vector<128x512xbf16>, vector<8x512xf32> -> vector<8x512xf32>
    %289 = arith.addf %285, %288 : vector<8x512xf32>
    %290 = vector.extract_strided_slice %289 {offsets = [0, 0], sizes = [8, 384], strides = [1, 1]} : vector<8x512xf32> to vector<8x384xf32>
    %cst_125 = arith.constant 5.000000e-01 : f32
    %291 = vector.broadcast %cst_125 : f32 to vector<8x384xf32>
    %292 = arith.mulf %291, %290 : vector<8x384xf32>
    %293 = math.tanh %292 : vector<8x384xf32>
    %cst_126 = arith.constant 5.000000e-01 : f32
    %294 = vector.broadcast %cst_126 : f32 to vector<8x384xf32>
    %295 = arith.mulf %293, %294 : vector<8x384xf32>
    %cst_127 = arith.constant 5.000000e-01 : f32
    %296 = vector.broadcast %cst_127 : f32 to vector<8x384xf32>
    %297 = arith.addf %295, %296 : vector<8x384xf32>
    %298 = vector.extract_strided_slice %297 {offsets = [0, 0], sizes = [8, 128], strides = [1, 1]} : vector<8x384xf32> to vector<8x128xf32>
    %299 = vector.extract_strided_slice %297 {offsets = [0, 128], sizes = [8, 128], strides = [1, 1]} : vector<8x384xf32> to vector<8x128xf32>
    %300 = vector.extract_strided_slice %297 {offsets = [0, 256], sizes = [8, 128], strides = [1, 1]} : vector<8x384xf32> to vector<8x128xf32>
    %301 = vector.extract_strided_slice %289 {offsets = [0, 384], sizes = [8, 128], strides = [1, 1]} : vector<8x512xf32> to vector<8x128xf32>
    %302 = math.tanh %301 : vector<8x128xf32>
    %303 = arith.mulf %299, %253 : vector<8x128xf32>
    %304 = arith.mulf %298, %302 : vector<8x128xf32>
    %305 = arith.addf %303, %304 : vector<8x128xf32>
    %306 = math.tanh %305 : vector<8x128xf32>
    %307 = arith.mulf %300, %306 : vector<8x128xf32>
    %308 = arith.truncf %307 : vector<8x128xf32> to vector<8x128xbf16>
    %c0_128 = arith.constant 0 : index
    %c0_129 = arith.constant 0 : index
    %309 = vector.load %arg16[%c0_128, %c0_129] : memref<128x512xbf16, #tpu.memory_space<vmem>>, vector<128x512xbf16>
    %cst_130 = arith.constant dense<0.000000e+00> : vector<8x512xf32>
    %310 = tpu.matmul %308, %309, %cst_130 {dimension_numbers = #tpu.dot_dimension_numbers<[1], [0], [0], [1], [0, 0, 1, 1], [], []>} : vector<8x128xbf16>, vector<128x512xbf16>, vector<8x512xf32> -> vector<8x512xf32>
    %311 = arith.truncf %283 : vector<8x128xf32> to vector<8x128xbf16>
    %c0_131 = arith.constant 0 : index
    %c0_132 = arith.constant 0 : index
    %312 = vector.load %arg17[%c0_131, %c0_132] : memref<128x512xbf16, #tpu.memory_space<vmem>>, vector<128x512xbf16>
    %cst_133 = arith.constant dense<0.000000e+00> : vector<8x512xf32>
    %313 = tpu.matmul %311, %312, %cst_133 {dimension_numbers = #tpu.dot_dimension_numbers<[1], [0], [0], [1], [0, 0, 1, 1], [], []>} : vector<8x128xbf16>, vector<128x512xbf16>, vector<8x512xf32> -> vector<8x512xf32>
    %314 = arith.addf %310, %313 : vector<8x512xf32>
    %c0_134 = arith.constant 0 : index
    %c0_135 = arith.constant 0 : index
    %315 = vector.load %arg6[%c0_134, %c0_135] : memref<1x512xf32, #tpu.memory_space<vmem>>, vector<1x512xf32>
    %316 = vector.broadcast %315 : vector<1x512xf32> to vector<8x512xf32>
    %317 = arith.addf %314, %316 : vector<8x512xf32>
    %318 = vector.extract_strided_slice %317 {offsets = [0, 0], sizes = [8, 384], strides = [1, 1]} : vector<8x512xf32> to vector<8x384xf32>
    %cst_136 = arith.constant 5.000000e-01 : f32
    %319 = vector.broadcast %cst_136 : f32 to vector<8x384xf32>
    %320 = arith.mulf %319, %318 : vector<8x384xf32>
    %321 = math.tanh %320 : vector<8x384xf32>
    %cst_137 = arith.constant 5.000000e-01 : f32
    %322 = vector.broadcast %cst_137 : f32 to vector<8x384xf32>
    %323 = arith.mulf %321, %322 : vector<8x384xf32>
    %cst_138 = arith.constant 5.000000e-01 : f32
    %324 = vector.broadcast %cst_138 : f32 to vector<8x384xf32>
    %325 = arith.addf %323, %324 : vector<8x384xf32>
    %326 = vector.extract_strided_slice %325 {offsets = [0, 0], sizes = [8, 128], strides = [1, 1]} : vector<8x384xf32> to vector<8x128xf32>
    %327 = vector.extract_strided_slice %325 {offsets = [0, 128], sizes = [8, 128], strides = [1, 1]} : vector<8x384xf32> to vector<8x128xf32>
    %328 = vector.extract_strided_slice %325 {offsets = [0, 256], sizes = [8, 128], strides = [1, 1]} : vector<8x384xf32> to vector<8x128xf32>
    %329 = vector.extract_strided_slice %317 {offsets = [0, 384], sizes = [8, 128], strides = [1, 1]} : vector<8x512xf32> to vector<8x128xf32>
    %330 = math.tanh %329 : vector<8x128xf32>
    %331 = arith.mulf %327, %281 : vector<8x128xf32>
    %332 = arith.mulf %326, %330 : vector<8x128xf32>
    %333 = arith.addf %331, %332 : vector<8x128xf32>
    %334 = math.tanh %333 : vector<8x128xf32>
    %335 = arith.mulf %328, %334 : vector<8x128xf32>
    %c40_139 = arith.constant 40 : index
    %c0_140 = arith.constant 0 : index
    %336 = vector.load %arg15[%c40_139, %c0_140] : memref<64x128xf32, #tpu.memory_space<vmem>>, vector<8x128xf32>
    tpu.vector_store %arg15[%c40_139, %c0_140], %335 {strides = array<i32>} : memref<64x128xf32, #tpu.memory_space<vmem>>, vector<8x128xf32>,
    %c48 = arith.constant 48 : index
    %c0_141 = arith.constant 0 : index
    %337 = vector.load %arg14[%c48, %c0_141] : memref<64x512xf32, #tpu.memory_space<vmem>>, vector<8x512xf32>
    %338 = arith.truncf %307 : vector<8x128xf32> to vector<8x128xbf16>
    %c0_142 = arith.constant 0 : index
    %c0_143 = arith.constant 0 : index
    %339 = vector.load %arg4[%c0_142, %c0_143] : memref<128x512xbf16, #tpu.memory_space<vmem>>, vector<128x512xbf16>
    %cst_144 = arith.constant dense<0.000000e+00> : vector<8x512xf32>
    %340 = tpu.matmul %338, %339, %cst_144 {dimension_numbers = #tpu.dot_dimension_numbers<[1], [0], [0], [1], [0, 0, 1, 1], [], []>} : vector<8x128xbf16>, vector<128x512xbf16>, vector<8x512xf32> -> vector<8x512xf32>
    %341 = arith.addf %337, %340 : vector<8x512xf32>
    %342 = vector.extract_strided_slice %341 {offsets = [0, 0], sizes = [8, 384], strides = [1, 1]} : vector<8x512xf32> to vector<8x384xf32>
    %cst_145 = arith.constant 5.000000e-01 : f32
    %343 = vector.broadcast %cst_145 : f32 to vector<8x384xf32>
    %344 = arith.mulf %343, %342 : vector<8x384xf32>
    %345 = math.tanh %344 : vector<8x384xf32>
    %cst_146 = arith.constant 5.000000e-01 : f32
    %346 = vector.broadcast %cst_146 : f32 to vector<8x384xf32>
    %347 = arith.mulf %345, %346 : vector<8x384xf32>
    %cst_147 = arith.constant 5.000000e-01 : f32
    %348 = vector.broadcast %cst_147 : f32 to vector<8x384xf32>
    %349 = arith.addf %347, %348 : vector<8x384xf32>
    %350 = vector.extract_strided_slice %349 {offsets = [0, 0], sizes = [8, 128], strides = [1, 1]} : vector<8x384xf32> to vector<8x128xf32>
    %351 = vector.extract_strided_slice %349 {offsets = [0, 128], sizes = [8, 128], strides = [1, 1]} : vector<8x384xf32> to vector<8x128xf32>
    %352 = vector.extract_strided_slice %349 {offsets = [0, 256], sizes = [8, 128], strides = [1, 1]} : vector<8x384xf32> to vector<8x128xf32>
    %353 = vector.extract_strided_slice %341 {offsets = [0, 384], sizes = [8, 128], strides = [1, 1]} : vector<8x512xf32> to vector<8x128xf32>
    %354 = math.tanh %353 : vector<8x128xf32>
    %355 = arith.mulf %351, %305 : vector<8x128xf32>
    %356 = arith.mulf %350, %354 : vector<8x128xf32>
    %357 = arith.addf %355, %356 : vector<8x128xf32>
    %358 = math.tanh %357 : vector<8x128xf32>
    %359 = arith.mulf %352, %358 : vector<8x128xf32>
    %360 = arith.truncf %359 : vector<8x128xf32> to vector<8x128xbf16>
    %c0_148 = arith.constant 0 : index
    %c0_149 = arith.constant 0 : index
    %361 = vector.load %arg16[%c0_148, %c0_149] : memref<128x512xbf16, #tpu.memory_space<vmem>>, vector<128x512xbf16>
    %cst_150 = arith.constant dense<0.000000e+00> : vector<8x512xf32>
    %362 = tpu.matmul %360, %361, %cst_150 {dimension_numbers = #tpu.dot_dimension_numbers<[1], [0], [0], [1], [0, 0, 1, 1], [], []>} : vector<8x128xbf16>, vector<128x512xbf16>, vector<8x512xf32> -> vector<8x512xf32>
    %363 = arith.truncf %335 : vector<8x128xf32> to vector<8x128xbf16>
    %c0_151 = arith.constant 0 : index
    %c0_152 = arith.constant 0 : index
    %364 = vector.load %arg17[%c0_151, %c0_152] : memref<128x512xbf16, #tpu.memory_space<vmem>>, vector<128x512xbf16>
    %cst_153 = arith.constant dense<0.000000e+00> : vector<8x512xf32>
    %365 = tpu.matmul %363, %364, %cst_153 {dimension_numbers = #tpu.dot_dimension_numbers<[1], [0], [0], [1], [0, 0, 1, 1], [], []>} : vector<8x128xbf16>, vector<128x512xbf16>, vector<8x512xf32> -> vector<8x512xf32>
    %366 = arith.addf %362, %365 : vector<8x512xf32>
    %c0_154 = arith.constant 0 : index
    %c0_155 = arith.constant 0 : index
    %367 = vector.load %arg6[%c0_154, %c0_155] : memref<1x512xf32, #tpu.memory_space<vmem>>, vector<1x512xf32>
    %368 = vector.broadcast %367 : vector<1x512xf32> to vector<8x512xf32>
    %369 = arith.addf %366, %368 : vector<8x512xf32>
    %370 = vector.extract_strided_slice %369 {offsets = [0, 0], sizes = [8, 384], strides = [1, 1]} : vector<8x512xf32> to vector<8x384xf32>
    %cst_156 = arith.constant 5.000000e-01 : f32
    %371 = vector.broadcast %cst_156 : f32 to vector<8x384xf32>
    %372 = arith.mulf %371, %370 : vector<8x384xf32>
    %373 = math.tanh %372 : vector<8x384xf32>
    %cst_157 = arith.constant 5.000000e-01 : f32
    %374 = vector.broadcast %cst_157 : f32 to vector<8x384xf32>
    %375 = arith.mulf %373, %374 : vector<8x384xf32>
    %cst_158 = arith.constant 5.000000e-01 : f32
    %376 = vector.broadcast %cst_158 : f32 to vector<8x384xf32>
    %377 = arith.addf %375, %376 : vector<8x384xf32>
    %378 = vector.extract_strided_slice %377 {offsets = [0, 0], sizes = [8, 128], strides = [1, 1]} : vector<8x384xf32> to vector<8x128xf32>
    %379 = vector.extract_strided_slice %377 {offsets = [0, 128], sizes = [8, 128], strides = [1, 1]} : vector<8x384xf32> to vector<8x128xf32>
    %380 = vector.extract_strided_slice %377 {offsets = [0, 256], sizes = [8, 128], strides = [1, 1]} : vector<8x384xf32> to vector<8x128xf32>
    %381 = vector.extract_strided_slice %369 {offsets = [0, 384], sizes = [8, 128], strides = [1, 1]} : vector<8x512xf32> to vector<8x128xf32>
    %382 = math.tanh %381 : vector<8x128xf32>
    %383 = arith.mulf %379, %333 : vector<8x128xf32>
    %384 = arith.mulf %378, %382 : vector<8x128xf32>
    %385 = arith.addf %383, %384 : vector<8x128xf32>
    %386 = math.tanh %385 : vector<8x128xf32>
    %387 = arith.mulf %380, %386 : vector<8x128xf32>
    %c48_159 = arith.constant 48 : index
    %c0_160 = arith.constant 0 : index
    %388 = vector.load %arg15[%c48_159, %c0_160] : memref<64x128xf32, #tpu.memory_space<vmem>>, vector<8x128xf32>
    tpu.vector_store %arg15[%c48_159, %c0_160], %387 {strides = array<i32>} : memref<64x128xf32, #tpu.memory_space<vmem>>, vector<8x128xf32>,
    %c56 = arith.constant 56 : index
    %c0_161 = arith.constant 0 : index
    %389 = vector.load %arg14[%c56, %c0_161] : memref<64x512xf32, #tpu.memory_space<vmem>>, vector<8x512xf32>
    %390 = arith.truncf %359 : vector<8x128xf32> to vector<8x128xbf16>
    %c0_162 = arith.constant 0 : index
    %c0_163 = arith.constant 0 : index
    %391 = vector.load %arg4[%c0_162, %c0_163] : memref<128x512xbf16, #tpu.memory_space<vmem>>, vector<128x512xbf16>
    %cst_164 = arith.constant dense<0.000000e+00> : vector<8x512xf32>
    %392 = tpu.matmul %390, %391, %cst_164 {dimension_numbers = #tpu.dot_dimension_numbers<[1], [0], [0], [1], [0, 0, 1, 1], [], []>} : vector<8x128xbf16>, vector<128x512xbf16>, vector<8x512xf32> -> vector<8x512xf32>
    %393 = arith.addf %389, %392 : vector<8x512xf32>
    %394 = vector.extract_strided_slice %393 {offsets = [0, 0], sizes = [8, 384], strides = [1, 1]} : vector<8x512xf32> to vector<8x384xf32>
    %cst_165 = arith.constant 5.000000e-01 : f32
    %395 = vector.broadcast %cst_165 : f32 to vector<8x384xf32>
    %396 = arith.mulf %395, %394 : vector<8x384xf32>
    %397 = math.tanh %396 : vector<8x384xf32>
    %cst_166 = arith.constant 5.000000e-01 : f32
    %398 = vector.broadcast %cst_166 : f32 to vector<8x384xf32>
    %399 = arith.mulf %397, %398 : vector<8x384xf32>
    %cst_167 = arith.constant 5.000000e-01 : f32
    %400 = vector.broadcast %cst_167 : f32 to vector<8x384xf32>
    %401 = arith.addf %399, %400 : vector<8x384xf32>
    %402 = vector.extract_strided_slice %401 {offsets = [0, 0], sizes = [8, 128], strides = [1, 1]} : vector<8x384xf32> to vector<8x128xf32>
    %403 = vector.extract_strided_slice %401 {offsets = [0, 128], sizes = [8, 128], strides = [1, 1]} : vector<8x384xf32> to vector<8x128xf32>
    %404 = vector.extract_strided_slice %401 {offsets = [0, 256], sizes = [8, 128], strides = [1, 1]} : vector<8x384xf32> to vector<8x128xf32>
    %405 = vector.extract_strided_slice %393 {offsets = [0, 384], sizes = [8, 128], strides = [1, 1]} : vector<8x512xf32> to vector<8x128xf32>
    %406 = math.tanh %405 : vector<8x128xf32>
    %407 = arith.mulf %403, %357 : vector<8x128xf32>
    %408 = arith.mulf %402, %406 : vector<8x128xf32>
    %409 = arith.addf %407, %408 : vector<8x128xf32>
    %410 = math.tanh %409 : vector<8x128xf32>
    %411 = arith.mulf %404, %410 : vector<8x128xf32>
    %412 = arith.truncf %411 : vector<8x128xf32> to vector<8x128xbf16>
    %c0_168 = arith.constant 0 : index
    %c0_169 = arith.constant 0 : index
    %413 = vector.load %arg16[%c0_168, %c0_169] : memref<128x512xbf16, #tpu.memory_space<vmem>>, vector<128x512xbf16>
    %cst_170 = arith.constant dense<0.000000e+00> : vector<8x512xf32>
    %414 = tpu.matmul %412, %413, %cst_170 {dimension_numbers = #tpu.dot_dimension_numbers<[1], [0], [0], [1], [0, 0, 1, 1], [], []>} : vector<8x128xbf16>, vector<128x512xbf16>, vector<8x512xf32> -> vector<8x512xf32>
    %415 = arith.truncf %387 : vector<8x128xf32> to vector<8x128xbf16>
    %c0_171 = arith.constant 0 : index
    %c0_172 = arith.constant 0 : index
    %416 = vector.load %arg17[%c0_171, %c0_172] : memref<128x512xbf16, #tpu.memory_space<vmem>>, vector<128x512xbf16>
    %cst_173 = arith.constant dense<0.000000e+00> : vector<8x512xf32>
    %417 = tpu.matmul %415, %416, %cst_173 {dimension_numbers = #tpu.dot_dimension_numbers<[1], [0], [0], [1], [0, 0, 1, 1], [], []>} : vector<8x128xbf16>, vector<128x512xbf16>, vector<8x512xf32> -> vector<8x512xf32>
    %418 = arith.addf %414, %417 : vector<8x512xf32>
    %c0_174 = arith.constant 0 : index
    %c0_175 = arith.constant 0 : index
    %419 = vector.load %arg6[%c0_174, %c0_175] : memref<1x512xf32, #tpu.memory_space<vmem>>, vector<1x512xf32>
    %420 = vector.broadcast %419 : vector<1x512xf32> to vector<8x512xf32>
    %421 = arith.addf %418, %420 : vector<8x512xf32>
    %422 = vector.extract_strided_slice %421 {offsets = [0, 0], sizes = [8, 384], strides = [1, 1]} : vector<8x512xf32> to vector<8x384xf32>
    %cst_176 = arith.constant 5.000000e-01 : f32
    %423 = vector.broadcast %cst_176 : f32 to vector<8x384xf32>
    %424 = arith.mulf %423, %422 : vector<8x384xf32>
    %425 = math.tanh %424 : vector<8x384xf32>
    %cst_177 = arith.constant 5.000000e-01 : f32
    %426 = vector.broadcast %cst_177 : f32 to vector<8x384xf32>
    %427 = arith.mulf %425, %426 : vector<8x384xf32>
    %cst_178 = arith.constant 5.000000e-01 : f32
    %428 = vector.broadcast %cst_178 : f32 to vector<8x384xf32>
    %429 = arith.addf %427, %428 : vector<8x384xf32>
    %430 = vector.extract_strided_slice %429 {offsets = [0, 0], sizes = [8, 128], strides = [1, 1]} : vector<8x384xf32> to vector<8x128xf32>
    %431 = vector.extract_strided_slice %429 {offsets = [0, 128], sizes = [8, 128], strides = [1, 1]} : vector<8x384xf32> to vector<8x128xf32>
    %432 = vector.extract_strided_slice %429 {offsets = [0, 256], sizes = [8, 128], strides = [1, 1]} : vector<8x384xf32> to vector<8x128xf32>
    %433 = vector.extract_strided_slice %421 {offsets = [0, 384], sizes = [8, 128], strides = [1, 1]} : vector<8x512xf32> to vector<8x128xf32>
    %434 = math.tanh %433 : vector<8x128xf32>
    %435 = arith.mulf %431, %385 : vector<8x128xf32>
    %436 = arith.mulf %430, %434 : vector<8x128xf32>
    %437 = arith.addf %435, %436 : vector<8x128xf32>
    %438 = math.tanh %437 : vector<8x128xf32>
    %439 = arith.mulf %432, %438 : vector<8x128xf32>
    %c56_179 = arith.constant 56 : index
    %c0_180 = arith.constant 0 : index
    %440 = vector.load %arg15[%c56_179, %c0_180] : memref<64x128xf32, #tpu.memory_space<vmem>>, vector<8x128xf32>
    tpu.vector_store %arg15[%c56_179, %c0_180], %439 {strides = array<i32>} : memref<64x128xf32, #tpu.memory_space<vmem>>, vector<8x128xf32>,
    %c2_i32_181 = arith.constant 2 : i32
    %441 = tpu.memref_slice %arg19[%c2_i32_181] : memref<3x!tpu.dma_semaphore, #tpu.memory_space<semaphore_mem>> -> memref<1x!tpu.dma_semaphore, #tpu.memory_space<semaphore_mem>>
    %442 = tpu.memref_squeeze %441 : memref<1x!tpu.dma_semaphore, #tpu.memory_space<semaphore_mem>> -> memref<!tpu.dma_semaphore, #tpu.memory_space<semaphore_mem>>
    tpu.wait_dma2 semaphore(%442 : memref<!tpu.dma_semaphore, #tpu.memory_space<semaphore_mem>>) src(%arg10 : memref<128x256xbf16, #tpu.memory_space<any>>) dst(%arg18 : memref<128x256xbf16, #tpu.memory_space<vmem>>)
    %c0_182 = arith.constant 0 : index
    %c0_183 = arith.constant 0 : index
    %443 = vector.load %arg15[%c0_182, %c0_183] : memref<64x128xf32, #tpu.memory_space<vmem>>, vector<64x128xf32>
    %444 = arith.truncf %443 : vector<64x128xf32> to vector<64x128xbf16>
    %c0_184 = arith.constant 0 : index
    %c0_185 = arith.constant 0 : index
    %445 = vector.load %arg18[%c0_184, %c0_185] : memref<128x256xbf16, #tpu.memory_space<vmem>>, vector<128x256xbf16>
    %cst_186 = arith.constant dense<0.000000e+00> : vector<64x256xf32>
    %446 = tpu.matmul %444, %445, %cst_186 {dimension_numbers = #tpu.dot_dimension_numbers<[1], [0], [0], [1], [0, 0, 1, 1], [], []>} : vector<64x128xbf16>, vector<128x256xbf16>, vector<64x256xf32> -> vector<64x256xf32>
    %c0_187 = arith.constant 0 : index
    %c0_188 = arith.constant 0 : index
    %447 = vector.load %arg7[%c0_187, %c0_188] : memref<1x256xf32, #tpu.memory_space<vmem>>, vector<1x256xf32>
    %448 = vector.broadcast %447 : vector<1x256xf32> to vector<64x256xf32>
    %449 = arith.addf %446, %448 : vector<64x256xf32>
    %c0_189 = arith.constant 0 : index
    %c0_190 = arith.constant 0 : index
    %450 = vector.load %arg11[%c0_189, %c0_190] : memref<64x256xf32, #tpu.memory_space<vmem>>, vector<64x256xf32>
    tpu.vector_store %arg11[%c0_189, %c0_190], %449 {strides = array<i32>} : memref<64x256xf32, #tpu.memory_space<vmem>>, vector<64x256xf32>,
    %c0_191 = arith.constant 0 : index
    %c0_192 = arith.constant 0 : index
    %451 = vector.load %arg12[%c0_191, %c0_192] : memref<16x128xf32, #tpu.memory_space<vmem>>, vector<8x128xf32>
    tpu.vector_store %arg12[%c0_191, %c0_192], %411 {strides = array<i32>} : memref<16x128xf32, #tpu.memory_space<vmem>>, vector<8x128xf32>,
    %c8_193 = arith.constant 8 : index
    %c0_194 = arith.constant 0 : index
    %452 = vector.load %arg12[%c8_193, %c0_194] : memref<16x128xf32, #tpu.memory_space<vmem>>, vector<8x128xf32>
    tpu.vector_store %arg12[%c8_193, %c0_194], %439 {strides = array<i32>} : memref<16x128xf32, #tpu.memory_space<vmem>>, vector<8x128xf32>,
    %c0_195 = arith.constant 0 : index
    %c0_196 = arith.constant 0 : index
    %453 = vector.load %arg13[%c0_195, %c0_196] : memref<16x128xf32, #tpu.memory_space<vmem>>, vector<8x128xf32>
    tpu.vector_store %arg13[%c0_195, %c0_196], %409 {strides = array<i32>} : memref<16x128xf32, #tpu.memory_space<vmem>>, vector<8x128xf32>,
    %c8_197 = arith.constant 8 : index
    %c0_198 = arith.constant 0 : index
    %454 = vector.load %arg13[%c8_197, %c0_198] : memref<16x128xf32, #tpu.memory_space<vmem>>, vector<8x128xf32>
    tpu.vector_store %arg13[%c8_197, %c0_198], %437 {strides = array<i32>} : memref<16x128xf32, #tpu.memory_space<vmem>>, vector<8x128xf32>,
    return
  }
}

</mosaic_0001>

<bundles_post_ra>
// kernel: tpu_custom_call.1
= control target key start
LH: loop header
LB: loop body
LE: loop exit
PB: predicated region body
PF: predicated region fallthrough
CT: control target
= control target key end

     0   :  { %19 = vsyncpa [#allocation9], 0  ;;  %s8436_s0 = inlined_call_operand.hbm [shape: bf16[64,128], index: 0, kind: input, shape index: {}]   ;;  %s8437_s1 = inlined_call_operand.hbm [shape: f32[2,8,128], index: 1, kind: input, shape index: {}]   ;;  %s8438_s2 = inlined_call_operand.hbm [shape: f32[2,8,128], index: 2, kind: input, shape index: {}]   ;;  %s8439_s3 = inlined_call_operand.hbm [shape: bf16[128,512], index: 3, kind: input, shape index: {}]   ;;  %s8440_s4 = inlined_call_operand.hbm [shape: bf16[128,512], index: 4, kind: input, shape index: {}]   ;;  %s8441_s5 = inlined_call_operand.vmem [shape: f32[1,512], index: 5, kind: input, shape index: {}]   ;;  %s8442_s6 = inlined_call_operand.vmem [shape: f32[1,512], index: 6, kind: input, shape index: {}]   ;;  %s8443_s7 = inlined_call_operand.vmem [shape: f32[1,256], index: 7, kind: input, shape index: {}]   ;;  %s8444_s8 = inlined_call_operand.hbm [shape: bf16[128,512], index: 8, kind: input, shape index: {}]   ;;  %s8445_s9 = inlined_call_operand.hbm [shape: bf16[128,512], index: 9, kind: input, shape index: {}]   ;;  %s8446_s10 = inlined_call_operand.hbm [shape: bf16[128,256], index: 10, kind: input, shape index: {}]   ;;  %s8447_s11 = inlined_call_operand.hbm [shape: f32[64,256], index: 11, kind: output, shape index: {0}]   ;;  %s8448_s12 = inlined_call_operand.hbm [shape: f32[16,128], index: 12, kind: output, shape index: {1}]   ;;  %s8449_s13 = inlined_call_operand.hbm [shape: f32[16,128], index: 13, kind: output, shape index: {2}]  }
   0x1   :  { %20 = vsyncpa [#allocation12], 0 }
   0x2   :  { %21 = vsyncpa [#allocation15], 0 }
   0x3   :  { %22 = vsyncpa [#allocation10], 0 }
   0x4   :  { %23 = vsyncpa [#allocation19], 0  ;;  %s6425_s25 = smov [#allocation11]   ;;  %s6233_s29 = scalar_lea.hbm %s8437_s1, 256 }
   0x5   :  { %s41_s26 = sshll.u32 %s6425_s25, 4  ;;  %p6234_p0 = scmp.ne.s32.totalorder %s8437_s1, %s6233_s29  ;;  %s42_s26 = int_to_ptr.vmem [resolvable:$true] %s41_s26 }
   0x6   :  { %p6237_p1 = scmp.lt.u32.totalorder %s6233_s29, %s8437_s1 }
   0x8   :  { %p6239_p2 = pnand %p6237_p1, %p6234_p0 }
   0xa   :  { %6242 = shalt.err (!%p6239_p2)
}
   0xb   :  { %s6243_s17 = scalar_lea.vmem %s42_s26, 256  ;;  %p6248_p4 = scmp.lt.s32.totalorder %s42_s26, %s42_s26 }
   0xc   :  { %p6244_p3 = scmp.ne.s32.totalorder %s42_s26, %s6243_s17  ;;  %p6249_p5 = scmp.lt.s32.totalorder %s6243_s17, %s6243_s17 }
   0xe   :  { %p6250_p6 = por %p6249_p5, %p6248_p4 }
  0x10   :  { %p6251_p7 = pnand %p6250_p6, %p6244_p3 }
  0x12   :  { %6254 = shalt.err (!%p6251_p7)
}
  0x13   :  { %s6426_s18 = smov 128   ;;  %s6427_s19 = smov 8  }
  0x14   :  { %47 = dma.hbm_to_vmem [thread:$0]  %s8437_s1, 256, %s42_s26, [#allocation12], %s6426_s18, %s6426_s18, %s6427_s19  }
  0x15   :  { %s6428_s22 = smov [#allocation14]   ;;  %s6255_s27 = scalar_lea.hbm %s8439_s3, 4096 }
  0x16   :  { %s65_s23 = sshll.u32 %s6428_s22, 4  ;;  %p6256_p8 = scmp.ne.s32.totalorder %s8439_s3, %s6255_s27  ;;  %s66_s23 = int_to_ptr.vmem [resolvable:$true] %s65_s23 }
  0x17   :  { %p6259_p9 = scmp.lt.u32.totalorder %s6255_s27, %s8439_s3 }
  0x19   :  { %p6261_p10 = pnand %p6259_p9, %p6256_p8 }
  0x1b   :  { %6264 = shalt.err (!%p6261_p10)
}
  0x1c   :  { %s6265_s15 = scalar_lea.vmem %s66_s23, 4096  ;;  %p6270_p12 = scmp.lt.s32.totalorder %s66_s23, %s66_s23 }
  0x1d   :  { %p6266_p11 = scmp.ne.s32.totalorder %s66_s23, %s6265_s15  ;;  %p6271_p13 = scmp.lt.s32.totalorder %s6265_s15, %s6265_s15 }
  0x1f   :  { %p6272_p0 = por %p6271_p13, %p6270_p12 }
  0x21   :  { %p6273_p1 = pnand %p6272_p0, %p6266_p11 }
  0x23   :  { %6276 = shalt.err (!%p6273_p1)
}
  0x24   :  { %s8450_s1 = smov 256   ;;  %s6430_s26 = smov 16  }
  0x25   :  { %71 = dma.hbm_to_vmem [thread:$0]  %s8439_s3, 4096, %s66_s23, [#allocation15], %s8450_s1, %s8450_s1, %s6430_s26  }
  0x26   :  { %s6431_s20 = smov [#allocation8]   ;;  %s6277_s25 = scalar_lea.hbm %s8436_s0, 512 }
  0x27   :  { %s29_s21 = sshll.u32 %s6431_s20, 4  ;;  %p6278_p2 = scmp.ne.s32.totalorder %s8436_s0, %s6277_s25  ;;  %s30_s21 = int_to_ptr.vmem [resolvable:$true] %s29_s21 }
  0x28   :  { %p6281_p3 = scmp.lt.u32.totalorder %s6277_s25, %s8436_s0 }
  0x2a   :  { %p6283_p4 = pnand %p6281_p3, %p6278_p2 }
  0x2c   :  { %6286 = shalt.err (!%p6283_p4)
}
  0x2d   :  { %s6287_s14 = scalar_lea.vmem %s30_s21, 512  ;;  %p6292_p6 = scmp.lt.s32.totalorder %s30_s21, %s30_s21 }
  0x2e   :  { %p6288_p5 = scmp.ne.s32.totalorder %s30_s21, %s6287_s14  ;;  %p6293_p7 = scmp.lt.s32.totalorder %s6287_s14, %s6287_s14 }
  0x30   :  { %p6294_p8 = por %p6293_p7, %p6292_p6 }
  0x32   :  { %p6295_p9 = pnand %p6294_p8, %p6288_p5 }
  0x34   :  { %6298 = shalt.err (!%p6295_p9)
}
  0x35   :  { %s6432_s3 = smov 64   ;;  %s6433_s23 = smov 4  }
  0x36   :  { %35 = dma.hbm_to_vmem [thread:$0]  %s8436_s0, 512, %s30_s21, [#allocation9], %s6432_s3, %s6432_s3, %s6433_s23  }
  0x37   :  { %s6434_s17 = smov [#allocation13]   ;;  %s6435_s22 = smov [#allocation16]  }
  0x38   :  { %s53_s20 = sshll.u32 %s6434_s17, 4  ;;  %s77_s24 = sshll.u32 %s6435_s22, 4  ;;  %s54_s20 = int_to_ptr.vmem [resolvable:$true] %s53_s20  ;;  %s78_s24 = int_to_ptr.vmem [resolvable:$true] %s77_s24 }
  0x39   :  { %s6299_s28 = scalar_lea.hbm %s8438_s2, 256 }
  0x3a   :  { %p6300_p10 = scmp.ne.s32.totalorder %s8438_s2, %s6299_s28  ;;  %p6303_p11 = scmp.lt.u32.totalorder %s6299_s28, %s8438_s2 }
  0x3c   :  { %p6305_p12 = pnand %p6303_p11, %p6300_p10 }
  0x3e   :  { %6308 = shalt.err (!%p6305_p12)
}
  0x3f   :  { %s6309_s0 = scalar_lea.vmem %s54_s20, 256  ;;  %p6314_p0 = scmp.lt.s32.totalorder %s54_s20, %s54_s20 }
  0x40   :  { %p6310_p13 = scmp.ne.s32.totalorder %s54_s20, %s6309_s0  ;;  %p6315_p1 = scmp.lt.s32.totalorder %s6309_s0, %s6309_s0 }
  0x42   :  { %p6316_p2 = por %p6315_p1, %p6314_p0 }
  0x44   :  { %p6317_p3 = pnand %p6316_p2, %p6310_p13 }
  0x46   :  { %6320 = shalt.err (!%p6317_p3)
}
  0x47   :  { %59 = dma.hbm_to_vmem [thread:$0]  %s8438_s2, 256, %s54_s20, [#allocation12], %s6426_s18, %s6426_s18, %s6427_s19  }
  0x48   :  { %s6321_s17 = scalar_lea.hbm %s8440_s4, 4096 }
  0x49   :  { %p6322_p4 = scmp.ne.s32.totalorder %s8440_s4, %s6321_s17  ;;  %p6325_p5 = scmp.lt.u32.totalorder %s6321_s17, %s8440_s4 }
  0x4b   :  { %p6327_p6 = pnand %p6325_p5, %p6322_p4 }
  0x4d   :  { %6330 = shalt.err (!%p6327_p6)
}
  0x4e   :  { %s6331_s29 = scalar_lea.vmem %s78_s24, 4096  ;;  %p6336_p8 = scmp.lt.s32.totalorder %s78_s24, %s78_s24 }
  0x4f   :  { %p6332_p7 = scmp.ne.s32.totalorder %s78_s24, %s6331_s29  ;;  %p6337_p9 = scmp.lt.s32.totalorder %s6331_s29, %s6331_s29 }
  0x51   :  { %p6338_p10 = por %p6337_p9, %p6336_p8 }
  0x53   :  { %p6339_p11 = pnand %p6338_p10, %p6332_p7 }
  0x55   :  { %6342 = shalt.err (!%p6339_p11)
}
  0x56   :  { %s8608_s2 = smov 256  }
  0x57   :  { %83 = dma.hbm_to_vmem [thread:$0]  %s8440_s4, 4096, %s78_s24, [#allocation15], %s8608_s2, %s8608_s2, %s6430_s26  }
  0x58   :  { %6409 = dma.done.wait [#allocation9], 512  }
  0x59   :  { %6410 = vsyncadd [#allocation9], 4294966784 }
  0x5a   :  { %6411 = dma.done.wait [#allocation12], 512  }
  0x5b   :  { %6412 = vsyncadd [#allocation12], 4294966784 }
  0x5c   :  { %6413 = dma.done.wait [#allocation15], 8192  }
  0x5d   :  { %6414 = vsyncadd [#allocation15], 4294959104  ;;  %s110_s14 = sld [smem:[#allocation0]]   ;;  %126 = sst [smem:[#allocation22 + $0x2]] %s6433_s23  ;;  %v8452_v0 = vmov 0  }
  0x5e   :  { %489 = vmatprep.mubr.bf16.mxu1 %v8452_v0  ;;  %870 = vmatprep.mubr.bf16.mxu0 %v8452_v0  ;;  %128 = sst [smem:[#allocation22 + $0x3]] %s6432_s3  ;;  %s6437_s0 = smov [#allocation4]  }
  0x5f   :  { %s118_s21 = sshll.u32 %s6437_s0, 4  ;;  %130 = sst [smem:[#allocation22 + $0x4]] %s6426_s18  ;;  %s119_s21 = int_to_ptr.vmem [resolvable:$true] %s118_s21 }
  0x60   :  { %134 = sst [smem:[#allocation22 + $0x6]] %s8608_s2  ;;  %s6438_s24 = smov 512  }
  0x61   :  { %136 = sst [smem:[#allocation22 + $0x7]] %s6432_s3  ;;  %s6439_s16 = smov 2  }
  0x62   :  { %138 = sst [smem:[#allocation22 + $0x8]] %s6433_s23  ;;  %s6440_s1 = smov [#allocation7]  }
  0x63   :  { %s5454_s4 = sshll.u32 %s110_s14, 26  ;;  %122 = sst [smem:[#allocation22]] %s6438_s24 }
  0x64   :  { %s6604_s15 = sadd.s32 134217728, %s5454_s4  ;;  %124 = sst [smem:[#allocation22 + $0x1]] %s6438_s24 }
  0x65   :  { %132 = sst [smem:[#allocation22 + $0x5]] %s6439_s16  ;;  %s6441_s17 = smov [#allocation21]  }
  0x66   :  { %140 = dma.general %s8444_s8, 4096, %s119_s21, %s6440_s1, %s6441_s17, [#allocation22], %s6604_s15, 0  }
  0x67   :  { %157 = sst [smem:[#allocation24]] %s6438_s24  ;;  %s6442_s27 = smov [#allocation5]  }
  0x68   :  { %159 = sst [smem:[#allocation24 + $0x1]] %s6438_s24  ;;  %s153_s28 = sshll.u32 %s6442_s27, 4  ;;  %s154_s28 = int_to_ptr.vmem [resolvable:$true] %s153_s28 }
  0x69   :  { %161 = sst [smem:[#allocation24 + $0x2]] %s6433_s23  ;;  %s6443_s29 = smov [#allocation7 + $0x1]  }
  0x6a   :  { %163 = sst [smem:[#allocation24 + $0x3]] %s6432_s3  ;;  %s6444_s8 = smov [#allocation23]  }
  0x6b   :  { %165 = sst [smem:[#allocation24 + $0x4]] %s6426_s18  ;;  %s6445_s14 = smov [#allocation6]  }
  0x6c   :  { %167 = sst [smem:[#allocation24 + $0x5]] %s6439_s16  ;;  %s188_s0 = sshll.u32 %s6445_s14, 4  ;;  %s189_s0 = int_to_ptr.vmem [resolvable:$true] %s188_s0 }
  0x6d   :  { %169 = sst [smem:[#allocation24 + $0x6]] %s8608_s2  ;;  %s6447_s21 = smov [#allocation25]  }
  0x6e   :  { %171 = sst [smem:[#allocation24 + $0x7]] %s6432_s3 }
  0x6f   :  { %173 = sst [smem:[#allocation24 + $0x8]] %s6433_s23 }
  0x70   :  { %175 = dma.general %s8445_s9, 4096, %s154_s28, %s6443_s29, %s6444_s8, [#allocation24], %s6604_s15, 0  }
  0x71   :  { %192 = sst [smem:[#allocation26]] %s8608_s2  ;;  %s6446_s9 = smov [#allocation7 + $0x2]  }
  0x72   :  { %194 = sst [smem:[#allocation26 + $0x1]] %s8608_s2 }
  0x73   :  { %196 = sst [smem:[#allocation26 + $0x2]] %s6439_s16 }
  0x74   :  { %198 = sst [smem:[#allocation26 + $0x3]] %s6432_s3 }
  0x75   :  { %200 = sst [smem:[#allocation26 + $0x4]] %s6426_s18 }
  0x76   :  { %202 = sst [smem:[#allocation26 + $0x5]] %s6439_s16 }
  0x77   :  { %204 = sst [smem:[#allocation26 + $0x6]] %s6426_s18 }
  0x78   :  { %206 = sst [smem:[#allocation26 + $0x7]] %s6432_s3 }
  0x79   :  { %208 = sst [smem:[#allocation26 + $0x8]] %s6433_s23 }
  0x7a   :  { %210 = dma.general %s8446_s10, 2048, %s189_s0, %s6446_s9, %s6447_s21, [#allocation26], %s6604_s15, 0  }
  0x7b   :  { %v6631_v1 = vld [vmem:[#allocation11 + $0x8] sm:$0xff]  ;;  %v6633_v2 = vld [vmem:[#allocation13 + $0x8] sm:$0xff]  ;;  %v5781_v3 = vld [vmem:[#allocation14 + $0x4] ss:$16 sps:$4 sm:$0xff]  }
  0x7c   :  { %v5783_v4 = vld [vmem:[#allocation14] ss:$16 sps:$4 sm:$0xff]   ;;  %v5784_v5 = vld [vmem:[#allocation16 + $0x4] ss:$16 sps:$4 sm:$0xff]   ;;  %457 = vmatprep.subr.bf16.mxu1 %v5781_v3  ;;  %v5832_v35 = vld [vmem:[#allocation14 + $0xc] ss:$16 sps:$4 sm:$0xff]  }
  0x7d   :  { %v5786_v6 = vld [vmem:[#allocation16] ss:$16 sps:$4 sm:$0xff]   ;;  %458 = vmatpush1.bf16.msra.mxu1 %v5783_v4  ;;  %838 = vmatprep.subr.bf16.mxu0 %v5784_v5  ;;  %v5787_v7 = vld [vmem:[#allocation14 + $0x24] ss:$16 sps:$4 sm:$0xff]   ;;  %v5830_v38 = vld [vmem:[#allocation14 + $0x8] ss:$16 sps:$4 sm:$0xff]  }
  0x7e   :  { %v5789_v8 = vld [vmem:[#allocation14 + $0x20] ss:$16 sps:$4 sm:$0xff]   ;;  %839 = vmatpush1.bf16.msra.mxu0 %v5786_v6  ;;  %v5790_v9 = vld [vmem:[#allocation16 + $0x24] ss:$16 sps:$4 sm:$0xff]   ;;  %459 = vmatprep.subr.bf16.mxu1 %v5787_v7  ;;  %v5835_v40 = vld [vmem:[#allocation14 + $0x2c] ss:$16 sps:$4 sm:$0xff]  }
  0x7f   :  { %v5792_v10 = vld [vmem:[#allocation16 + $0x20] ss:$16 sps:$4 sm:$0xff]   ;;  %v5793_v11 = vld [vmem:[#allocation14 + $0x44] ss:$16 sps:$4 sm:$0xff]   ;;  %840 = vmatprep.subr.bf16.mxu0 %v5790_v9  ;;  %v5833_v41 = vld [vmem:[#allocation14 + $0x28] ss:$16 sps:$4 sm:$0xff]  }
  0x80   :  { %v5795_v12 = vld [vmem:[#allocation14 + $0x40] ss:$16 sps:$4 sm:$0xff]   ;;  %v5796_v13 = vld [vmem:[#allocation16 + $0x44] ss:$16 sps:$4 sm:$0xff]   ;;  %v5839_v42 = vld [vmem:[#allocation14 + $0x4c] ss:$16 sps:$4 sm:$0xff]  }
  0x81   :  { %460 = vmatpush1.bf16.msra.mxu1 %v5789_v8  ;;  %v5798_v14 = vld [vmem:[#allocation16 + $0x40] ss:$16 sps:$4 sm:$0xff]   ;;  %v5799_v15 = vld [vmem:[#allocation14 + $0x64] ss:$16 sps:$4 sm:$0xff]   ;;  %v5836_v43 = vld [vmem:[#allocation8 + $0x8] sm:$0xff]  }
  0x82   :  { %841 = vmatpush1.bf16.msra.mxu0 %v5792_v10  ;;  %461 = vmatprep.subr.bf16.mxu1 %v5793_v11  ;;  %v5802_v16 = vld [vmem:[#allocation16 + $0x64] ss:$16 sps:$4 sm:$0xff]   ;;  %v5801_v17 = vld [vmem:[#allocation14 + $0x60] ss:$16 sps:$4 sm:$0xff]   ;;  %v5837_v44 = vld [vmem:[#allocation14 + $0x48] ss:$16 sps:$4 sm:$0xff]  }
  0x83   :  { %842 = vmatprep.subr.bf16.mxu0 %v5796_v13  ;;  %v5804_v18 = vld [vmem:[#allocation16 + $0x60] ss:$16 sps:$4 sm:$0xff]   ;;  %v5805_v19 = vld [vmem:[#allocation14 + $0x84] ss:$16 sps:$4 sm:$0xff]   ;;  %v5842_v45 = vld [vmem:[#allocation14 + $0x6c] ss:$16 sps:$4 sm:$0xff]  }
  0x84   :  { %v5808_v20 = vld [vmem:[#allocation16 + $0x84] ss:$16 sps:$4 sm:$0xff]   ;;  %v5807_v21 = vld [vmem:[#allocation14 + $0x80] ss:$16 sps:$4 sm:$0xff]   ;;  %v5840_v46 = vld [vmem:[#allocation14 + $0x68] ss:$16 sps:$4 sm:$0xff]  }
  0x85   :  { %462 = vmatpush1.bf16.msra.mxu1 %v5795_v12  ;;  %v5810_v22 = vld [vmem:[#allocation16 + $0x80] ss:$16 sps:$4 sm:$0xff]   ;;  %v5811_v23 = vld [vmem:[#allocation14 + $0xa4] ss:$16 sps:$4 sm:$0xff]   ;;  %v5846_v47 = vld [vmem:[#allocation14 + $0x8c] ss:$16 sps:$4 sm:$0xff]   ;;  %v253_v12 = vlaneseq }
  0x86   :  { %843 = vmatpush1.bf16.msra.mxu0 %v5798_v14  ;;  %463 = vmatprep.subr.bf16.mxu1 %v5799_v15  ;;  %v5814_v24 = vld [vmem:[#allocation16 + $0xa4] ss:$16 sps:$4 sm:$0xff]   ;;  %v5813_v25 = vld [vmem:[#allocation14 + $0xa0] ss:$16 sps:$4 sm:$0xff]   ;;  %v5844_v49 = vld [vmem:[#allocation14 + $0x88] ss:$16 sps:$4 sm:$0xff]  }
  0x87   :  { %844 = vmatprep.subr.bf16.mxu0 %v5802_v16  ;;  %v5816_v26 = vld [vmem:[#allocation16 + $0xa0] ss:$16 sps:$4 sm:$0xff]   ;;  %v5817_v27 = vld [vmem:[#allocation14 + $0xc4] ss:$16 sps:$4 sm:$0xff]   ;;  %v5849_v50 = vld [vmem:[#allocation14 + $0xac] ss:$16 sps:$4 sm:$0xff]  }
  0x88   :  { %v5820_v28 = vld [vmem:[#allocation16 + $0xc4] ss:$16 sps:$4 sm:$0xff]   ;;  %v5819_v29 = vld [vmem:[#allocation14 + $0xc0] ss:$16 sps:$4 sm:$0xff]   ;;  %v5847_v51 = vld [vmem:[#allocation14 + $0xa8] ss:$16 sps:$4 sm:$0xff]  }
  0x89   :  { %464 = vmatpush1.bf16.msra.mxu1 %v5801_v17  ;;  %v5822_v30 = vld [vmem:[#allocation16 + $0xc0] ss:$16 sps:$4 sm:$0xff]   ;;  %v5823_v31 = vld [vmem:[#allocation14 + $0xe4] ss:$16 sps:$4 sm:$0xff]   ;;  %v5853_v52 = vld [vmem:[#allocation14 + $0xcc] ss:$16 sps:$4 sm:$0xff]  }
  0x8a   :  { %845 = vmatpush1.bf16.msra.mxu0 %v5804_v18  ;;  %465 = vmatprep.subr.bf16.mxu1 %v5805_v19  ;;  %v5826_v32 = vld [vmem:[#allocation16 + $0xe4] ss:$16 sps:$4 sm:$0xff]   ;;  %v5825_v33 = vld [vmem:[#allocation14 + $0xe0] ss:$16 sps:$4 sm:$0xff]   ;;  %v5850_v53 = vld [vmem:[#allocation8 + $0x18] sm:$0xff]   ;;  %v254_v13 = vshrl.u32 %v253_v12, 7 }
  0x8b   :  { %846 = vmatprep.subr.bf16.mxu0 %v5808_v20  ;;  %v5828_v34 = vld [vmem:[#allocation16 + $0xe0] ss:$16 sps:$4 sm:$0xff]   ;;  %v5851_v54 = vld [vmem:[#allocation14 + $0xc8] ss:$16 sps:$4 sm:$0xff]   ;;  %v5856_v55 = vld [vmem:[#allocation14 + $0xec] ss:$16 sps:$4 sm:$0xff]  }
  0x8c   :  { %v635_v36 = vld [vmem:[#allocation11] sm:$0xff]  ;;  %v5843_v48 = vld [vmem:[#allocation8 + $0x10] sm:$0xff]   ;;  %v5854_v56 = vld [vmem:[#allocation14 + $0xe8] ss:$16 sps:$4 sm:$0xff]   ;;  %v6647_v14 = vsub.s32 0, %v254_v13  ;;  %v6652_v16 = vsub.s32 1, %v254_v13 }
  0x8d   :  { %466 = vmatpush1.bf16.msra.mxu1 %v5807_v21  ;;  %v5829_v37 = vld [vmem:[#allocation8] sm:$0xff]   ;;  %v6635_v39 = vpack.c.bf16 %v635_v36, %v635_v36  ;;  %v5859_v57 = vld [vmem:[#allocation16 + $0xc] ss:$16 sps:$4 sm:$0xff]   ;;  %v5857_v58 = vld [vmem:[#allocation16 + $0x8] ss:$16 sps:$4 sm:$0xff]  }
  0x8e   :  { %847 = vmatpush1.bf16.msra.mxu0 %v5810_v22  ;;  %467 = vmatprep.subr.bf16.mxu1 %v5811_v23  ;;  %v5862_v59 = vld [vmem:[#allocation16 + $0x2c] ss:$16 sps:$4 sm:$0xff]   ;;  %v5860_v60 = vld [vmem:[#allocation16 + $0x28] ss:$16 sps:$4 sm:$0xff]   ;;  %8609 = vst [vmem:[#allocation35_spill] sm:$0xff] %v6647_v14  ;;  %8610 = vst [vmem:[#allocation36_spill] sm:$0xff] %v6652_v16 }
  0x8f   :  { %848 = vmatprep.subr.bf16.mxu0 %v5814_v24  ;;  %v5865_v61 = vld [vmem:[#allocation16 + $0x4c] ss:$16 sps:$4 sm:$0xff]   ;;  %v5863_v62 = vld [vmem:[#allocation16 + $0x48] ss:$16 sps:$4 sm:$0xff]   ;;  %v251_v15 = vld [vmem:[%s8441_s5] sm:$0xf] }
  0x90   :  { %v5868_v63 = vld [vmem:[#allocation16 + $0x6c] ss:$16 sps:$4 sm:$0xff]   ;;  %v5866_v3 = vld [vmem:[#allocation16 + $0x68] ss:$16 sps:$4 sm:$0xff]   ;;  %v256_v17 = vrot.slane %v251_v15, %v6647_v14  ;;  %v260_v18 = vrot.slane %v251_v15, %v6652_v16 }
  0x91   :  { %468 = vmatpush1.bf16.msra.mxu1 %v5813_v25  ;;  %v5871_v4 = vld [vmem:[#allocation16 + $0x8c] ss:$16 sps:$4 sm:$0xff]   ;;  %v5869_v5 = vld [vmem:[#allocation16 + $0x88] ss:$16 sps:$4 sm:$0xff]  }
  0x92   :  { %849 = vmatpush1.bf16.msra.mxu0 %v5816_v26  ;;  %469 = vmatprep.subr.bf16.mxu1 %v5817_v27  ;;  %v5874_v6 = vld [vmem:[#allocation16 + $0xac] ss:$16 sps:$4 sm:$0xff]   ;;  %v5872_v7 = vld [vmem:[#allocation16 + $0xa8] ss:$16 sps:$4 sm:$0xff]  }
  0x93   :  { %850 = vmatprep.subr.bf16.mxu0 %v5820_v28  ;;  %v5877_v8 = vld [vmem:[#allocation16 + $0xcc] ss:$16 sps:$4 sm:$0xff]   ;;  %v5875_v9 = vld [vmem:[#allocation16 + $0xc8] ss:$16 sps:$4 sm:$0xff]  }
  0x94   :  { %v5880_v10 = vld [vmem:[#allocation16 + $0xec] ss:$16 sps:$4 sm:$0xff]   ;;  %v5878_v11 = vld [vmem:[#allocation16 + $0xe8] ss:$16 sps:$4 sm:$0xff]  }
  0x95   :  { %470 = vmatpush1.bf16.msra.mxu1 %v5819_v29 }
  0x96   :  { %851 = vmatpush1.bf16.msra.mxu0 %v5822_v30  ;;  %471 = vmatprep.subr.bf16.mxu1 %v5823_v31 }
  0x97   :  { %852 = vmatprep.subr.bf16.mxu0 %v5826_v32 }
  0x99   :  { %472 = vmatpush1.bf16.msra.mxu1 %v5825_v33 }
  0x9a   :  { %853 = vmatpush1.bf16.msra.mxu0 %v5828_v34  ;;  %530 = vmatprep.subr.bf16.mxu1 %v5832_v35 }
  0x9c   :  { %490 = vmatmul.mubr.bf16.vlgmr.msra.gmra.mrb[0].mxu1 %v5829_v37 }
  0x9d   :  { %531 = vmatpush1.bf16.msra.mxu1 %v5830_v38  ;;  %871 = vmatmul.mubr.bf16.vlgmr.msra.gmra.mrb[0].mxu0 %v6635_v39 }
  0x9e   :  { %532 = vmatprep.subr.bf16.mxu1 %v5835_v40  ;;  %499 = vmatprep.mubr.bf16.mxu1 %v8452_v0 }
  0xa1   :  { %533 = vmatpush1.bf16.msra.mxu1 %v5833_v41 }
  0xa2   :  { %534 = vmatprep.subr.bf16.mxu1 %v5839_v42 }
  0xa4   :  { %500 = vmatmul.mubr.bf16.gmra.mrb[4].mxu1 %v5836_v43 }
  0xa5   :  { %535 = vmatpush1.bf16.msra.mxu1 %v5837_v44  ;;  %509 = vmatprep.mubr.bf16.mxu1 %v8452_v0 }
  0xa6   :  { %536 = vmatprep.subr.bf16.mxu1 %v5842_v45 }
  0xa9   :  { %537 = vmatpush1.bf16.msra.mxu1 %v5840_v46 }
  0xaa   :  { %538 = vmatprep.subr.bf16.mxu1 %v5846_v47 }
  0xac   :  { %510 = vmatmul.mubr.bf16.gmra.mrb[8].mxu1 %v5843_v48 }
  0xad   :  { %539 = vmatpush1.bf16.msra.mxu1 %v5844_v49  ;;  %519 = vmatprep.mubr.bf16.mxu1 %v8452_v0 }
  0xae   :  { %540 = vmatprep.subr.bf16.mxu1 %v5849_v50 }
  0xb1   :  { %541 = vmatpush1.bf16.msra.mxu1 %v5847_v51 }
  0xb2   :  { %542 = vmatprep.subr.bf16.mxu1 %v5853_v52 }
  0xb4   :  { %520 = vmatmul.mubr.bf16.gmra.mrb[12].mxu1 %v5850_v53 }
  0xb5   :  { %543 = vmatpush1.bf16.msra.mxu1 %v5851_v54  ;;  %562 = vmatprep.mubr.bf16.mxu1 %v8452_v0 }
  0xb6   :  { %544 = vmatprep.subr.bf16.mxu1 %v5856_v55 }
  0xb9   :  { %545 = vmatpush1.bf16.msra.mxu1 %v5854_v56 }
  0xba   :  { %879 = vmatprep.subr.bf16.mxu1 %v5859_v57  ;;  %v6684_v57 = vsub.s32 2, %v254_v13 }
  0xbc   :  { %563 = vmatmul.mubr.bf16.vlgmr.msra.gmra.mrb[16].mxu1 %v5829_v37 }
  0xbd   :  { %880 = vmatpush1.bf16.msra.mxu1 %v5857_v58  ;;  %572 = vmatprep.mubr.bf16.mxu1 %v8452_v0  ;;  %v6686_v58 = vsub.s32 3, %v254_v13 }
  0xbe   :  { %881 = vmatprep.subr.bf16.mxu1 %v5862_v59 }
  0xc1   :  { %882 = vmatpush1.bf16.msra.mxu1 %v5860_v60  ;;  %v264_v60 = vrot.slane %v251_v15, %v6684_v57 }
  0xc2   :  { %883 = vmatprep.subr.bf16.mxu1 %v5865_v61 }
  0xc4   :  { %573 = vmatmul.mubr.bf16.gmra.mrb[20].mxu1 %v5836_v43 }
  0xc5   :  { %884 = vmatpush1.bf16.msra.mxu1 %v5863_v62  ;;  %582 = vmatprep.mubr.bf16.mxu1 %v8452_v0  ;;  %v268_v62 = vrot.slane %v251_v15, %v6686_v58 }
  0xc6   :  { %885 = vmatprep.subr.bf16.mxu1 %v5868_v63 }
  0xc9   :  { %886 = vmatpush1.bf16.msra.mxu1 %v5866_v3 }
  0xca   :  { %887 = vmatprep.subr.bf16.mxu1 %v5871_v4 }
  0xcc   :  { %583 = vmatmul.mubr.bf16.gmra.mrb[24].mxu1 %v5843_v48 }
  0xcd   :  { %888 = vmatpush1.bf16.msra.mxu1 %v5869_v5  ;;  %592 = vmatprep.mubr.bf16.mxu1 %v8452_v0 }
  0xce   :  { %889 = vmatprep.subr.bf16.mxu1 %v5874_v6 }
  0xd1   :  { %890 = vmatpush1.bf16.msra.mxu1 %v5872_v7 }
  0xd2   :  { %891 = vmatprep.subr.bf16.mxu1 %v5877_v8 }
  0xd4   :  { %593 = vmatmul.mubr.bf16.gmra.mrb[28].mxu1 %v5850_v53 }
  0xd5   :  { %892 = vmatpush1.bf16.msra.mxu1 %v5875_v9  ;;  %911 = vmatprep.mubr.bf16.mxu1 %v8452_v0 }
  0xd6   :  { %893 = vmatprep.subr.bf16.mxu1 %v5880_v10 }
  0xd9   :  { %894 = vmatpush1.bf16.msra.mxu1 %v5878_v11 }
  0xdc   :  { %912 = vmatmul.mubr.bf16.vlgmr.msra.gmra.mrb[32].mxu1 %v6635_v39 }
 0x16f   :  { %v491_v19 = vpop.f32.mrb[0].mxu1 }
 0x170   :  { %v492_v20 = vadd.f32 %v491_v19, %v256_v17  ;;  %v493_v21 = vpop.f32.mrb[1].mxu1  ;;  %v872_v22 = vpop.f32.mrb[0].mxu0 }
 0x171   :  { %v494_v23 = vadd.f32 %v493_v21, %v260_v18  ;;  %v495_v24 = vpop.f32.mrb[2].mxu1  ;;  %v874_v25 = vpop.f32.mrb[1].mxu0 }
 0x172   :  { %v6656_v26 = vadd.f32 %v495_v24, %v256_v17  ;;  %v920_v27 = vadd.f32 %v872_v22, %v492_v20  ;;  %v497_v28 = vpop.f32.mrb[3].mxu1  ;;  %v876_v29 = vpop.f32.mrb[2].mxu0 }
 0x173   :  { %v6658_v30 = vadd.f32 %v497_v28, %v260_v18  ;;  %v921_v31 = vadd.f32 %v874_v25, %v494_v23  ;;  %v877_v32 = vpop.f32.mrb[3].mxu0 }
 0x174   :  { %v924_v25 = vmul.f32 0.5, %v920_v27 }
 0x175   :  { %v925_v24 = vmul.f32 0.5, %v921_v31 }
 0x177   :  { %v501_v33 = vpop.f32.mrb[4].mxu1  ;;  %5881 = vtanh.f32 %v925_v24 }
 0x178   :  { %v6660_v34 = vadd.f32 %v501_v33, %v256_v17  ;;  %v503_v35 = vpop.f32.mrb[5].mxu1  ;;  %5883 = vtanh.f32 %v924_v25 }
 0x179   :  { %v6662_v36 = vadd.f32 %v503_v35, %v260_v18  ;;  %v505_v37 = vpop.f32.mrb[6].mxu1 }
 0x17a   :  { %8611 = vst [vmem:[#allocation37_spill] sm:$0xff] %v6660_v34  ;;  %v6664_v38 = vadd.f32 %v505_v37, %v256_v17  ;;  %v507_v39 = vpop.f32.mrb[7].mxu1 }
 0x17b   :  { %8612 = vst [vmem:[#allocation38_spill] sm:$0xff] %v6662_v36  ;;  %v6666_v40 = vadd.f32 %v507_v39, %v260_v18 }
 0x17c   :  { %8613 = vst [vmem:[#allocation39_spill] sm:$0xff] %v6664_v38 }
 0x17d   :  { %8614 = vst [vmem:[#allocation40_spill] sm:$0xff] %v6666_v40 }
 0x17f   :  { %v511_v41 = vpop.f32.mrb[8].mxu1 }
 0x180   :  { %v6668_v42 = vadd.f32 %v511_v41, %v256_v17  ;;  %v513_v43 = vpop.f32.mrb[9].mxu1 }
 0x181   :  { %v6670_v44 = vadd.f32 %v513_v43, %v260_v18  ;;  %v515_v45 = vpop.f32.mrb[10].mxu1 }
 0x182   :  { %8615 = vst [vmem:[#allocation41_spill] sm:$0xff] %v6668_v42  ;;  %v6672_v46 = vadd.f32 %v515_v45, %v256_v17  ;;  %v517_v47 = vpop.f32.mrb[11].mxu1 }
 0x183   :  { %8616 = vst [vmem:[#allocation42_spill] sm:$0xff] %v6670_v44  ;;  %v6674_v48 = vadd.f32 %v517_v47, %v260_v18 }
 0x184   :  { %8617 = vst [vmem:[#allocation43_spill] sm:$0xff] %v6672_v46 }
 0x185   :  { %8618 = vst [vmem:[#allocation44_spill] sm:$0xff] %v6674_v48 }
 0x187   :  { %v521_v49 = vpop.f32.mrb[12].mxu1 }
 0x188   :  { %v6676_v50 = vadd.f32 %v521_v49, %v256_v17  ;;  %v523_v51 = vpop.f32.mrb[13].mxu1 }
 0x189   :  { %v6678_v52 = vadd.f32 %v523_v51, %v260_v18  ;;  %v525_v53 = vpop.f32.mrb[14].mxu1 }
 0x18a   :  { %8619 = vst [vmem:[#allocation45_spill] sm:$0xff] %v6676_v50  ;;  %v6680_v54 = vadd.f32 %v525_v53, %v256_v17  ;;  %v527_v55 = vpop.f32.mrb[15].mxu1 }
 0x18b   :  { %8620 = vst [vmem:[#allocation46_spill] sm:$0xff] %v6678_v52  ;;  %v6682_v56 = vadd.f32 %v527_v55, %v260_v18  ;;  %v5882_v55 = vpop.eup %5881 }
 0x18c   :  { %8621 = vst [vmem:[#allocation47_spill] sm:$0xff] %v6680_v54 }
 0x18d   :  { %8622 = vst [vmem:[#allocation48_spill] sm:$0xff] %v6682_v56 }
 0x18f   :  { %v564_v59 = vpop.f32.mrb[16].mxu1 }
 0x190   :  { %v566_v61 = vpop.f32.mrb[17].mxu1  ;;  %v565_v43 = vadd.f32 %v564_v59, %v264_v60 }
 0x191   :  { %v568_v63 = vpop.f32.mrb[18].mxu1  ;;  %v567_v45 = vadd.f32 %v566_v61, %v268_v62 }
 0x192   :  { %v6690_v3 = vadd.f32 %v568_v63, %v264_v60  ;;  %v570_v4 = vpop.f32.mrb[19].mxu1  ;;  %v5884_v63 = vpop.eup %5883 }
 0x193   :  { %v6692_v5 = vadd.f32 %v570_v4, %v268_v62  ;;  %v931_v4 = vmul.f32 0.5, %v5882_v55 }
 0x197   :  { %v574_v6 = vpop.f32.mrb[20].mxu1 }
 0x198   :  { %v6694_v7 = vadd.f32 %v574_v6, %v264_v60  ;;  %v576_v8 = vpop.f32.mrb[21].mxu1 }
 0x199   :  { %v6696_v9 = vadd.f32 %v576_v8, %v268_v62  ;;  %v578_v10 = vpop.f32.mrb[22].mxu1  ;;  %v930_v8 = vmul.f32 0.5, %v5884_v63 }
 0x19a   :  { %8623 = vst [vmem:[#allocation49_spill] sm:$0xff] %v6694_v7  ;;  %v6698_v11 = vadd.f32 %v578_v10, %v264_v60  ;;  %v580_v12 = vpop.f32.mrb[23].mxu1  ;;  %v934_v10 = vadd.f32 0.5, %v931_v4 }
 0x19b   :  { %8624 = vst [vmem:[#allocation50_spill] sm:$0xff] %v6696_v9  ;;  %v6700_v13 = vadd.f32 %v580_v12, %v268_v62  ;;  %v636_v12 = vld [vmem:[#allocation13] sm:$0xff] }
 0x19c   :  { %8625 = vst [vmem:[#allocation51_spill] sm:$0xff] %v6698_v11 }
 0x19d   :  { %8626 = vst [vmem:[#allocation52_spill] sm:$0xff] %v6700_v13 }
 0x19f   :  { %v584_v17 = vpop.f32.mrb[24].mxu1 }
 0x1a0   :  { %v6702_v15 = vadd.f32 %v584_v17, %v264_v60  ;;  %v586_v18 = vpop.f32.mrb[25].mxu1  ;;  %v933_v17 = vadd.f32 0.5, %v930_v8 }
 0x1a1   :  { %v6704_v19 = vadd.f32 %v586_v18, %v268_v62  ;;  %v588_v20 = vpop.f32.mrb[26].mxu1 }
 0x1a2   :  { %8627 = vst [vmem:[#allocation53_spill] sm:$0xff] %v6702_v15  ;;  %v6706_v21 = vadd.f32 %v588_v20, %v264_v60  ;;  %v590_v22 = vpop.f32.mrb[27].mxu1  ;;  %v937_v20 = vmul.f32 %v934_v10, %v636_v12 }
 0x1a3   :  { %8628 = vst [vmem:[#allocation54_spill] sm:$0xff] %v6704_v19  ;;  %v6708_v23 = vadd.f32 %v590_v22, %v268_v62 }
 0x1a4   :  { %8629 = vst [vmem:[#allocation55_spill] sm:$0xff] %v6706_v21 }
 0x1a5   :  { %8630 = vst [vmem:[#allocation56_spill] sm:$0xff] %v6708_v23 }
 0x1a7   :  { %v594_v28 = vpop.f32.mrb[28].mxu1 }
 0x1a8   :  { %v6710_v29 = vadd.f32 %v594_v28, %v264_v60  ;;  %v596_v32 = vpop.f32.mrb[29].mxu1 }
 0x1a9   :  { %v6712_v33 = vadd.f32 %v596_v32, %v268_v62  ;;  %v598_v35 = vpop.f32.mrb[30].mxu1 }
 0x1aa   :  { %8631 = vst [vmem:[#allocation57_spill] sm:$0xff] %v6710_v29  ;;  %v6714_v37 = vadd.f32 %v598_v35, %v264_v60  ;;  %v600_v39 = vpop.f32.mrb[31].mxu1 }
 0x1ab   :  { %8632 = vst [vmem:[#allocation58_spill] sm:$0xff] %v6712_v33  ;;  %v6716_v41 = vadd.f32 %v600_v39, %v268_v62 }
 0x1ac   :  { %8633 = vst [vmem:[#allocation59_spill] sm:$0xff] %v6714_v37 }
 0x1ad   :  { %8634 = vst [vmem:[#allocation60_spill] sm:$0xff] %v6716_v41 }
 0x1af   :  { %v913_v47 = vpop.f32.mrb[32].mxu1 }
 0x1b0   :  { %v922_v49 = vadd.f32 %v913_v47, %v565_v43  ;;  %v915_v31 = vpop.f32.mrb[33].mxu1 }
 0x1b1   :  { %v923_v27 = vadd.f32 %v915_v31, %v567_v45  ;;  %v917_v51 = vpop.f32.mrb[34].mxu1 }
 0x1b2   :  { %v918_v53 = vpop.f32.mrb[35].mxu1  ;;  %v926_v6 = vmul.f32 0.5, %v922_v49 }
 0x1b3   :  { %5885 = vtanh.f32 %v923_v27 }
 0x1b4   :  { %5887 = vtanh.f32 %v926_v6 }
 0x1bd   :  { %v5886_v18 = vpop.eup %5885 }
 0x1be   :  { %v938_v59 = vmul.f32 %v5886_v18, %v933_v17  ;;  %v5888_v61 = vpop.eup %5887 }
 0x1bf   :  { %v932_v62 = vmul.f32 0.5, %v5888_v61 }
 0x1c0   :  { %v6718_v60 = vadd.f32 %v938_v59, %v937_v20 }
 0x1c1   :  { %v935_v22 = vadd.f32 0.5, %v932_v62 }
 0x1c2   :  { %8635 = vst [vmem:[#allocation61_spill] sm:$0xff] %v6718_v60  ;;  %5889 = vtanh.f32 %v6718_v60 }
 0x1cc   :  { %v5890_v24 = vpop.eup %5889 }
 0x1cd   :  { %v6721_v25 = vmul.f32 %v5890_v24, %v935_v22 }
 0x1ce   :  { %6415 = dma.done.wait [#allocation7], 4096 }
 0x1cf   :  { %6416 = vsyncadd [#allocation7], 4294963200 }
 0x1d0   :  { %6417 = dma.done.wait [#allocation7 + $0x1], 4096 }
 0x1d1   :  { %6418 = vsyncadd [#allocation7 + $0x1], 4294963200  ;;  %1046 = vmatprep.mubr.bf16.mxu0 %v8452_v0  ;;  %1087 = vmatprep.mubr.bf16.mxu1 %v8452_v0  ;;  %v6725_v28 = vld [vmem:[#allocation5 + $0x8] sm:$0xff]  ;;  %v6727_v32 = vld [vmem:[#allocation5 + $0x18] sm:$0xff]  ;;  %v981_v52 = vpack.c.bf16 %v6631_v1, %v6631_v1  ;;  %v8638_v44 = vmov 0  }
 0x1d2   :  { %v6729_v35 = vld [vmem:[#allocation5] sm:$0xff]  ;;  %1014 = vmatprep.subr.bf16.mxu0 %v6725_v28  ;;  %1055 = vmatprep.subr.bf16.mxu1 %v6727_v32  ;;  %v6733_v39 = vld [vmem:[#allocation5 + $0x10] sm:$0xff]  ;;  %v6735_v43 = vld [vmem:[#allocation5 + $0x28] sm:$0xff] }
 0x1d3   :  { %v6737_v45 = vld [vmem:[#allocation5 + $0x38] sm:$0xff]  ;;  %1015 = vmatpush1.bf16.msra.mxu0 %v6729_v35  ;;  %1056 = vmatpush1.bf16.msra.mxu1 %v6733_v39  ;;  %v6743_v47 = vld [vmem:[#allocation5 + $0x20] sm:$0xff]  ;;  %v6745_v49 = vld [vmem:[#allocation5 + $0x30] sm:$0xff] }
 0x1d4   :  { %1016 = vmatprep.subr.bf16.mxu0 %v6735_v43  ;;  %1057 = vmatprep.subr.bf16.mxu1 %v6737_v45  ;;  %v6747_v31 = vld [vmem:[#allocation5 + $0x48] sm:$0xff]  ;;  %v6749_v27 = vld [vmem:[#allocation5 + $0x58] sm:$0xff]  ;;  %v6755_v51 = vld [vmem:[#allocation5 + $0x40] sm:$0xff] }
 0x1d5   :  { %v6757_v53 = vld [vmem:[#allocation5 + $0x50] sm:$0xff]  ;;  %v6759_v55 = vld [vmem:[#allocation5 + $0x68] sm:$0xff]  ;;  %v6761_v63 = vld [vmem:[#allocation5 + $0x78] sm:$0xff] }
 0x1d6   :  { %v6767_v4 = vld [vmem:[#allocation5 + $0x60] sm:$0xff]  ;;  %v6769_v6 = vld [vmem:[#allocation5 + $0x70] sm:$0xff]  ;;  %v6771_v8 = vld [vmem:[#allocation5 + $0x88] sm:$0xff] }
 0x1d7   :  { %1017 = vmatpush1.bf16.msra.mxu0 %v6743_v47  ;;  %1058 = vmatpush1.bf16.msra.mxu1 %v6745_v49  ;;  %v6773_v10 = vld [vmem:[#allocation5 + $0x98] sm:$0xff]  ;;  %v6779_v12 = vld [vmem:[#allocation5 + $0x80] sm:$0xff]  ;;  %v6781_v17 = vld [vmem:[#allocation5 + $0x90] sm:$0xff] }
 0x1d8   :  { %1018 = vmatprep.subr.bf16.mxu0 %v6747_v31  ;;  %1059 = vmatprep.subr.bf16.mxu1 %v6749_v27  ;;  %v6783_v18 = vld [vmem:[#allocation5 + $0xa8] sm:$0xff]  ;;  %v6785_v20 = vld [vmem:[#allocation5 + $0xb8] sm:$0xff]  ;;  %v6791_v59 = vld [vmem:[#allocation5 + $0xa0] sm:$0xff] }
 0x1d9   :  { %v6793_v61 = vld [vmem:[#allocation5 + $0xb0] sm:$0xff]  ;;  %v6795_v62 = vld [vmem:[#allocation5 + $0xc8] sm:$0xff]  ;;  %v6797_v22 = vld [vmem:[#allocation5 + $0xd8] sm:$0xff] }
 0x1da   :  { %v6801_v24 = vld [vmem:[#allocation5 + $0xc0] sm:$0xff]  ;;  %v6805_v0 = vld [vmem:[#allocation5 + $0xd0] sm:$0xff]  ;;  %v6807_v37 = vld [vmem:[#allocation5 + $0xe8] sm:$0xff] }
 0x1db   :  { %1019 = vmatpush1.bf16.msra.mxu0 %v6755_v51  ;;  %1060 = vmatpush1.bf16.msra.mxu1 %v6757_v53  ;;  %v6809_v41 = vld [vmem:[#allocation5 + $0xf8] sm:$0xff]  ;;  %v6813_v56 = vld [vmem:[#allocation5 + $0xe0] sm:$0xff]  ;;  %v6817_v54 = vld [vmem:[#allocation5 + $0xf0] sm:$0xff] }
 0x1dc   :  { %1020 = vmatprep.subr.bf16.mxu0 %v6759_v55  ;;  %1061 = vmatprep.subr.bf16.mxu1 %v6761_v63  ;;  %v6819_v29 = vld [vmem:[#allocation4 + $0x8] sm:$0xff]  ;;  %v6821_v33 = vld [vmem:[#allocation4 + $0x18] sm:$0xff]  ;;  %v6827_v50 = vld [vmem:[#allocation4] sm:$0xff] }
 0x1dd   :  { %v6831_v21 = vld [vmem:[#allocation4 + $0x10] sm:$0xff]  ;;  %v6833_v23 = vld [vmem:[#allocation4 + $0x28] sm:$0xff]  ;;  %v6835_v48 = vld [vmem:[#allocation4 + $0x38] sm:$0xff] }
 0x1de   :  { %v6839_v1 = vld [vmem:[#allocation4 + $0x20] sm:$0xff]  ;;  %v6843_v46 = vld [vmem:[#allocation4 + $0x30] sm:$0xff]  ;;  %v6845_v15 = vld [vmem:[#allocation4 + $0x48] sm:$0xff] }
 0x1df   :  { %1021 = vmatpush1.bf16.msra.mxu0 %v6767_v4  ;;  %1062 = vmatpush1.bf16.msra.mxu1 %v6769_v6  ;;  %8636 = vst [vmem:[#allocation62_spill] sm:$0xff] %v6845_v15  ;;  %v6847_v19 = vld [vmem:[#allocation4 + $0x58] sm:$0xff]  ;;  %v6857_v42 = vld [vmem:[#allocation4 + $0x50] sm:$0xff]  ;;  %v6859_v11 = vld [vmem:[#allocation4 + $0x68] sm:$0xff] }
 0x1e0   :  { %1022 = vmatprep.subr.bf16.mxu0 %v6771_v8  ;;  %1063 = vmatprep.subr.bf16.mxu1 %v6773_v10  ;;  %8637 = vst [vmem:[#allocation63_spill] sm:$0xff] %v6847_v19  ;;  %8640 = vst [vmem:[#allocation65_spill] sm:$0xff] %v6857_v42  ;;  %v6861_v13 = vld [vmem:[#allocation4 + $0x78] sm:$0xff]  ;;  %v6863_v40 = vld [vmem:[#allocation4 + $0x60] sm:$0xff] }
 0x1e1   :  { %8641 = vst [vmem:[#allocation66_spill] sm:$0xff] %v6859_v11  ;;  %8642 = vst [vmem:[#allocation67_spill] sm:$0xff] %v6861_v13  ;;  %v6865_v38 = vld [vmem:[#allocation4 + $0x70] sm:$0xff]  ;;  %v6869_v7 = vld [vmem:[#allocation4 + $0x88] sm:$0xff] }
 0x1e2   :  { %8643 = vst [vmem:[#allocation68_spill] sm:$0xff] %v6863_v40  ;;  %8644 = vst [vmem:[#allocation69_spill] sm:$0xff] %v6865_v38  ;;  %v6871_v9 = vld [vmem:[#allocation4 + $0x98] sm:$0xff]  ;;  %v6875_v36 = vld [vmem:[#allocation4 + $0x80] sm:$0xff] }
 0x1e3   :  { %1023 = vmatpush1.bf16.msra.mxu0 %v6779_v12  ;;  %1064 = vmatpush1.bf16.msra.mxu1 %v6781_v17  ;;  %8645 = vst [vmem:[#allocation70_spill] sm:$0xff] %v6869_v7  ;;  %8646 = vst [vmem:[#allocation71_spill] sm:$0xff] %v6871_v9  ;;  %v6877_v34 = vld [vmem:[#allocation4 + $0x90] sm:$0xff]  ;;  %v6881_v60 = vld [vmem:[#allocation4 + $0xa8] sm:$0xff] }
 0x1e4   :  { %1024 = vmatprep.subr.bf16.mxu0 %v6783_v18  ;;  %1065 = vmatprep.subr.bf16.mxu1 %v6785_v20  ;;  %8647 = vst [vmem:[#allocation72_spill] sm:$0xff] %v6875_v36  ;;  %8648 = vst [vmem:[#allocation73_spill] sm:$0xff] %v6877_v34 }
 0x1e5   :  { %8649 = vst [vmem:[#allocation74_spill] sm:$0xff] %v6881_v60 }
 0x1e7   :  { %1025 = vmatpush1.bf16.msra.mxu0 %v6791_v59  ;;  %1066 = vmatpush1.bf16.msra.mxu1 %v6793_v61 }
 0x1e8   :  { %1026 = vmatprep.subr.bf16.mxu0 %v6795_v62  ;;  %1067 = vmatprep.subr.bf16.mxu1 %v6797_v22 }
 0x1eb   :  { %1027 = vmatpush1.bf16.msra.mxu0 %v6801_v24  ;;  %1068 = vmatpush1.bf16.msra.mxu1 %v6805_v0 }
 0x1ec   :  { %1028 = vmatprep.subr.bf16.mxu0 %v6807_v37  ;;  %1069 = vmatprep.subr.bf16.mxu1 %v6809_v41 }
 0x1ef   :  { %1029 = vmatpush1.bf16.msra.mxu0 %v6813_v56  ;;  %1070 = vmatpush1.bf16.msra.mxu1 %v6817_v54 }
 0x1f0   :  { %1096 = vmatprep.subr.bf16.mxu0 %v6819_v29  ;;  %1137 = vmatprep.subr.bf16.mxu1 %v6821_v33 }
 0x1f2   :  { %1047 = vmatmul.mubr.bf16.vlgmr.msra.gmra.mrb[4].mxu0 %v981_v52  ;;  %1088 = vmatmul.mubr.bf16.vlgmr.msra.gmra.mrb[36].mxu1 %v981_v52  ;;  %v6853_v52 = vld [vmem:[#allocation4 + $0x40] sm:$0xff] }
 0x1f3   :  { %1097 = vmatpush1.bf16.msra.mxu0 %v6827_v50  ;;  %1138 = vmatpush1.bf16.msra.mxu1 %v6831_v21  ;;  %8639 = vst [vmem:[#allocation64_spill] sm:$0xff] %v6853_v52 }
 0x1f4   :  { %1098 = vmatprep.subr.bf16.mxu0 %v6833_v23  ;;  %1139 = vmatprep.subr.bf16.mxu1 %v6835_v48 }
 0x1f5   :  { %1128 = vmatprep.mubr.bf16.mxu0 %v8638_v44  ;;  %1169 = vmatprep.mubr.bf16.mxu1 %v8638_v44 }
 0x1f7   :  { %1099 = vmatpush1.bf16.msra.mxu0 %v6839_v1  ;;  %1140 = vmatpush1.bf16.msra.mxu1 %v6843_v46 }
 0x1f8   :  { %1100 = vmatprep.subr.bf16.mxu0 %v6845_v15  ;;  %1141 = vmatprep.subr.bf16.mxu1 %v6847_v19  ;;  %v6917_v19 = vld [vmem:[#allocation16 + $0xc] ss:$16 sps:$4 sm:$0xff]  }
 0x1f9   :  { %8661 = vst [vmem:[#allocation86_spill] sm:$0xff] %v6917_v19  ;;  %v6933_v15 = vld [vmem:[#allocation16 + $0x2c] ss:$16 sps:$4 sm:$0xff]  }
 0x1fa   :  { %8664 = vst [vmem:[#allocation89_spill] sm:$0xff] %v6933_v15 }
 0x1fb   :  { %1101 = vmatpush1.bf16.msra.mxu0 %v6853_v52  ;;  %1142 = vmatpush1.bf16.msra.mxu1 %v6857_v42  ;;  %v6883_v52 = vld [vmem:[#allocation4 + $0xb8] sm:$0xff]  ;;  %v6887_v42 = vld [vmem:[#allocation4 + $0xa0] sm:$0xff] }
 0x1fc   :  { %1102 = vmatprep.subr.bf16.mxu0 %v6859_v11  ;;  %1143 = vmatprep.subr.bf16.mxu1 %v6861_v13  ;;  %8650 = vst [vmem:[#allocation75_spill] sm:$0xff] %v6883_v52  ;;  %8651 = vst [vmem:[#allocation76_spill] sm:$0xff] %v6887_v42  ;;  %v6889_v11 = vld [vmem:[#allocation4 + $0xb0] sm:$0xff]  ;;  %v6893_v13 = vld [vmem:[#allocation4 + $0xc8] sm:$0xff] }
 0x1fd   :  { %8652 = vst [vmem:[#allocation77_spill] sm:$0xff] %v6889_v11  ;;  %8653 = vst [vmem:[#allocation78_spill] sm:$0xff] %v6893_v13 }
 0x1ff   :  { %1103 = vmatpush1.bf16.msra.mxu0 %v6863_v40  ;;  %1144 = vmatpush1.bf16.msra.mxu1 %v6865_v38  ;;  %v6895_v40 = vld [vmem:[#allocation4 + $0xd8] sm:$0xff]  ;;  %v6899_v38 = vld [vmem:[#allocation4 + $0xc0] sm:$0xff] }
 0x200   :  { %1104 = vmatprep.subr.bf16.mxu0 %v6869_v7  ;;  %1145 = vmatprep.subr.bf16.mxu1 %v6871_v9  ;;  %8654 = vst [vmem:[#allocation79_spill] sm:$0xff] %v6895_v40  ;;  %v6901_v7 = vld [vmem:[#allocation4 + $0xd0] sm:$0xff]  ;;  %v6905_v9 = vld [vmem:[#allocation4 + $0xe8] sm:$0xff] }
 0x201   :  { %8655 = vst [vmem:[#allocation80_spill] sm:$0xff] %v6901_v7  ;;  %8656 = vst [vmem:[#allocation81_spill] sm:$0xff] %v6905_v9 }
 0x203   :  { %1105 = vmatpush1.bf16.msra.mxu0 %v6875_v36  ;;  %1146 = vmatpush1.bf16.msra.mxu1 %v6877_v34  ;;  %v6907_v36 = vld [vmem:[#allocation4 + $0xf8] sm:$0xff]  ;;  %v6911_v34 = vld [vmem:[#allocation4 + $0xe0] sm:$0xff] }
 0x204   :  { %1106 = vmatprep.subr.bf16.mxu0 %v6881_v60  ;;  %1147 = vmatprep.subr.bf16.mxu1 %v6883_v52  ;;  %8657 = vst [vmem:[#allocation82_spill] sm:$0xff] %v6907_v36  ;;  %8658 = vst [vmem:[#allocation83_spill] sm:$0xff] %v6911_v34  ;;  %v6913_v60 = vld [vmem:[#allocation4 + $0xf0] sm:$0xff] }
 0x205   :  { %8659 = vst [vmem:[#allocation84_spill] sm:$0xff] %v6913_v60  ;;  %v6915_v52 = vld [vmem:[#allocation16 + $0x4] ss:$16 sps:$4 sm:$0xff]  }
 0x206   :  { %8660 = vst [vmem:[#allocation85_spill] sm:$0xff] %v6915_v52 }
 0x207   :  { %1107 = vmatpush1.bf16.msra.mxu0 %v6887_v42  ;;  %1148 = vmatpush1.bf16.msra.mxu1 %v6889_v11  ;;  %v6923_v11 = vld [vmem:[#allocation16] ss:$16 sps:$4 sm:$0xff]   ;;  %v6931_v42 = vld [vmem:[#allocation16 + $0x24] ss:$16 sps:$4 sm:$0xff]  }
 0x208   :  { %1108 = vmatprep.subr.bf16.mxu0 %v6893_v13  ;;  %1149 = vmatprep.subr.bf16.mxu1 %v6895_v40  ;;  %v6925_v13 = vld [vmem:[#allocation16 + $0x8] ss:$16 sps:$4 sm:$0xff]   ;;  %v6929_v40 = vpack.c.bf16 %v6721_v25, %v6721_v25  ;;  %8663 = vst [vmem:[#allocation88_spill] sm:$0xff] %v6931_v42  ;;  %v6945_v25 = vld [vmem:[#allocation16 + $0x44] ss:$16 sps:$4 sm:$0xff]  }
 0x209   :  { %8662 = vst [vmem:[#allocation87_spill] sm:$0xff] %v6925_v13  ;;  %8666 = vst [vmem:[#allocation91_spill] sm:$0xff] %v6945_v25 }
 0x20b   :  { %1109 = vmatpush1.bf16.msra.mxu0 %v6899_v38  ;;  %1150 = vmatpush1.bf16.msra.mxu1 %v6901_v7  ;;  %v6947_v7 = vld [vmem:[#allocation16 + $0x4c] ss:$16 sps:$4 sm:$0xff]  }
 0x20c   :  { %1110 = vmatprep.subr.bf16.mxu0 %v6905_v9  ;;  %1151 = vmatprep.subr.bf16.mxu1 %v6907_v36  ;;  %v6939_v36 = vld [vmem:[#allocation16 + $0x20] ss:$16 sps:$4 sm:$0xff]   ;;  %v6941_v9 = vld [vmem:[#allocation16 + $0x28] ss:$16 sps:$4 sm:$0xff]   ;;  %8667 = vst [vmem:[#allocation92_spill] sm:$0xff] %v6947_v7 }
 0x20d   :  { %8665 = vst [vmem:[#allocation90_spill] sm:$0xff] %v6939_v36 }
 0x20f   :  { %1111 = vmatpush1.bf16.msra.mxu0 %v6911_v34  ;;  %1152 = vmatpush1.bf16.msra.mxu1 %v6913_v60  ;;  %v6959_v60 = vld [vmem:[#allocation16 + $0x64] ss:$16 sps:$4 sm:$0xff]   ;;  %v6961_v34 = vld [vmem:[#allocation16 + $0x6c] ss:$16 sps:$4 sm:$0xff]  }
 0x210   :  { %1419 = vmatprep.subr.bf16.mxu0 %v6915_v52  ;;  %1460 = vmatprep.subr.bf16.mxu1 %v6917_v19  ;;  %v6953_v19 = vld [vmem:[#allocation16 + $0x40] ss:$16 sps:$4 sm:$0xff]   ;;  %v6955_v52 = vld [vmem:[#allocation16 + $0x48] ss:$16 sps:$4 sm:$0xff]   ;;  %8669 = vst [vmem:[#allocation94_spill] sm:$0xff] %v6959_v60  ;;  %8670 = vst [vmem:[#allocation95_spill] sm:$0xff] %v6961_v34 }
 0x211   :  { %8668 = vst [vmem:[#allocation93_spill] sm:$0xff] %v6955_v52 }
 0x212   :  { %1129 = vmatmul.mubr.bf16.vlgmr.msra.gmra.mrb[8].mxu0 %v6929_v40  ;;  %1170 = vmatmul.mubr.bf16.vlgmr.msra.gmra.mrb[40].mxu1 %v6929_v40 }
 0x213   :  { %1420 = vmatpush1.bf16.msra.mxu0 %v6923_v11  ;;  %1461 = vmatpush1.bf16.msra.mxu1 %v6925_v13  ;;  %v6974_v13 = vld [vmem:[#allocation16 + $0x84] ss:$16 sps:$4 sm:$0xff]  }
 0x214   :  { %1421 = vmatprep.subr.bf16.mxu0 %v6931_v42  ;;  %1462 = vmatprep.subr.bf16.mxu1 %v6933_v15  ;;  %v6967_v15 = vld [vmem:[#allocation16 + $0x60] ss:$16 sps:$4 sm:$0xff]   ;;  %v6971_v42 = vld [vmem:[#allocation16 + $0x68] ss:$16 sps:$4 sm:$0xff]   ;;  %8673 = vst [vmem:[#allocation98_spill] sm:$0xff] %v6974_v13 }
 0x215   :  { %1451 = vmatprep.mubr.bf16.mxu0 %v8638_v44  ;;  %1492 = vmatprep.mubr.bf16.mxu1 %v8638_v44  ;;  %8671 = vst [vmem:[#allocation96_spill] sm:$0xff] %v6967_v15  ;;  %8672 = vst [vmem:[#allocation97_spill] sm:$0xff] %v6971_v42 }
 0x217   :  { %1422 = vmatpush1.bf16.msra.mxu0 %v6939_v36  ;;  %1463 = vmatpush1.bf16.msra.mxu1 %v6941_v9  ;;  %v6977_v36 = vld [vmem:[#allocation16 + $0x8c] ss:$16 sps:$4 sm:$0xff]  }
 0x218   :  { %1423 = vmatprep.subr.bf16.mxu0 %v6945_v25  ;;  %1464 = vmatprep.subr.bf16.mxu1 %v6947_v7  ;;  %8674 = vst [vmem:[#allocation99_spill] sm:$0xff] %v6977_v36  ;;  %v6980_v25 = vld [vmem:[#allocation16 + $0x80] ss:$16 sps:$4 sm:$0xff]   ;;  %v6983_v7 = vld [vmem:[#allocation16 + $0x88] ss:$16 sps:$4 sm:$0xff]  }
 0x219   :  { %8675 = vst [vmem:[#allocation100_spill] sm:$0xff] %v6980_v25  ;;  %8676 = vst [vmem:[#allocation101_spill] sm:$0xff] %v6983_v7 }
 0x21b   :  { %1424 = vmatpush1.bf16.msra.mxu0 %v6953_v19  ;;  %1465 = vmatpush1.bf16.msra.mxu1 %v6955_v52  ;;  %v6986_v52 = vld [vmem:[#allocation16 + $0xa4] ss:$16 sps:$4 sm:$0xff]  }
 0x21c   :  { %1425 = vmatprep.subr.bf16.mxu0 %v6959_v60  ;;  %1466 = vmatprep.subr.bf16.mxu1 %v6961_v34  ;;  %8677 = vst [vmem:[#allocation102_spill] sm:$0xff] %v6986_v52  ;;  %v6989_v60 = vld [vmem:[#allocation16 + $0xac] ss:$16 sps:$4 sm:$0xff]   ;;  %v6992_v34 = vld [vmem:[#allocation16 + $0xa0] ss:$16 sps:$4 sm:$0xff]  }
 0x21d   :  { %8678 = vst [vmem:[#allocation103_spill] sm:$0xff] %v6989_v60  ;;  %8679 = vst [vmem:[#allocation104_spill] sm:$0xff] %v6992_v34 }
 0x21f   :  { %1426 = vmatpush1.bf16.msra.mxu0 %v6967_v15  ;;  %1467 = vmatpush1.bf16.msra.mxu1 %v6971_v42  ;;  %v6995_v15 = vld [vmem:[#allocation16 + $0xa8] ss:$16 sps:$4 sm:$0xff]   ;;  %v6998_v42 = vld [vmem:[#allocation16 + $0xc4] ss:$16 sps:$4 sm:$0xff]  }
 0x220   :  { %1427 = vmatprep.subr.bf16.mxu0 %v6974_v13  ;;  %1468 = vmatprep.subr.bf16.mxu1 %v6977_v36  ;;  %v7001_v13 = vld [vmem:[#allocation16 + $0xcc] ss:$16 sps:$4 sm:$0xff]   ;;  %v7004_v36 = vld [vmem:[#allocation16 + $0xc0] ss:$16 sps:$4 sm:$0xff]  }
 0x223   :  { %1428 = vmatpush1.bf16.msra.mxu0 %v6980_v25  ;;  %1469 = vmatpush1.bf16.msra.mxu1 %v6983_v7  ;;  %v7007_v25 = vld [vmem:[#allocation16 + $0xc8] ss:$16 sps:$4 sm:$0xff]   ;;  %v7010_v7 = vld [vmem:[#allocation16 + $0xe4] ss:$16 sps:$4 sm:$0xff]  }
 0x224   :  { %1429 = vmatprep.subr.bf16.mxu0 %v6986_v52  ;;  %1470 = vmatprep.subr.bf16.mxu1 %v6989_v60  ;;  %v7013_v52 = vld [vmem:[#allocation16 + $0xec] ss:$16 sps:$4 sm:$0xff]   ;;  %v7016_v60 = vld [vmem:[#allocation16 + $0xe0] ss:$16 sps:$4 sm:$0xff]  }
 0x227   :  { %1430 = vmatpush1.bf16.msra.mxu0 %v6992_v34  ;;  %1471 = vmatpush1.bf16.msra.mxu1 %v6995_v15  ;;  %v7019_v34 = vld [vmem:[#allocation16 + $0xe8] ss:$16 sps:$4 sm:$0xff]  }
 0x228   :  { %1431 = vmatprep.subr.bf16.mxu0 %v6998_v42  ;;  %1472 = vmatprep.subr.bf16.mxu1 %v7001_v13 }
 0x22b   :  { %1432 = vmatpush1.bf16.msra.mxu0 %v7004_v36  ;;  %1473 = vmatpush1.bf16.msra.mxu1 %v7007_v25 }
 0x22c   :  { %1433 = vmatprep.subr.bf16.mxu0 %v7010_v7  ;;  %1474 = vmatprep.subr.bf16.mxu1 %v7013_v52 }
 0x22f   :  { %1434 = vmatpush1.bf16.msra.mxu0 %v7016_v60  ;;  %1475 = vmatpush1.bf16.msra.mxu1 %v7019_v34 }
 0x230   :  { %1589 = vmatprep.subr.bf16.mxu0 %v6725_v28  ;;  %1630 = vmatprep.subr.bf16.mxu1 %v6727_v32 }
 0x232   :  { %1452 = vmatmul.mubr.bf16.vlgmr.msra.gmra.mrb[12].mxu0 %v6929_v40  ;;  %1493 = vmatmul.mubr.bf16.vlgmr.msra.gmra.mrb[44].mxu1 %v6929_v40 }
 0x233   :  { %1590 = vmatpush1.bf16.msra.mxu0 %v6729_v35  ;;  %1631 = vmatpush1.bf16.msra.mxu1 %v6733_v39 }
 0x234   :  { %1591 = vmatprep.subr.bf16.mxu0 %v6735_v43  ;;  %1632 = vmatprep.subr.bf16.mxu1 %v6737_v45 }
 0x235   :  { %1621 = vmatprep.mubr.bf16.mxu0 %v8638_v44  ;;  %1662 = vmatprep.mubr.bf16.mxu1 %v8638_v44 }
 0x237   :  { %1592 = vmatpush1.bf16.msra.mxu0 %v6743_v47  ;;  %1633 = vmatpush1.bf16.msra.mxu1 %v6745_v49 }
 0x238   :  { %1593 = vmatprep.subr.bf16.mxu0 %v6747_v31  ;;  %1634 = vmatprep.subr.bf16.mxu1 %v6749_v27 }
 0x23b   :  { %1594 = vmatpush1.bf16.msra.mxu0 %v6755_v51  ;;  %1635 = vmatpush1.bf16.msra.mxu1 %v6757_v53 }
 0x23c   :  { %1595 = vmatprep.subr.bf16.mxu0 %v6759_v55  ;;  %1636 = vmatprep.subr.bf16.mxu1 %v6761_v63 }
 0x23f   :  { %1596 = vmatpush1.bf16.msra.mxu0 %v6767_v4  ;;  %1637 = vmatpush1.bf16.msra.mxu1 %v6769_v6 }
 0x240   :  { %1597 = vmatprep.subr.bf16.mxu0 %v6771_v8  ;;  %1638 = vmatprep.subr.bf16.mxu1 %v6773_v10 }
 0x243   :  { %1598 = vmatpush1.bf16.msra.mxu0 %v6779_v12  ;;  %1639 = vmatpush1.bf16.msra.mxu1 %v6781_v17 }
 0x244   :  { %1599 = vmatprep.subr.bf16.mxu0 %v6783_v18  ;;  %1640 = vmatprep.subr.bf16.mxu1 %v6785_v20 }
 0x247   :  { %1600 = vmatpush1.bf16.msra.mxu0 %v6791_v59  ;;  %1641 = vmatpush1.bf16.msra.mxu1 %v6793_v61 }
 0x248   :  { %1601 = vmatprep.subr.bf16.mxu0 %v6795_v62  ;;  %1642 = vmatprep.subr.bf16.mxu1 %v6797_v22 }
 0x24b   :  { %1602 = vmatpush1.bf16.msra.mxu0 %v6801_v24  ;;  %1643 = vmatpush1.bf16.msra.mxu1 %v6805_v0 }
 0x24c   :  { %1603 = vmatprep.subr.bf16.mxu0 %v6807_v37  ;;  %1644 = vmatprep.subr.bf16.mxu1 %v6809_v41  ;;  %v1178_v37 = vld [vmem:[%s8442_s6] sm:$0xf] }
 0x24d   :  { %v1195_v4 = vrot.slane %v1178_v37, %v6686_v58  ;;  %v1191_v20 = vrot.slane %v1178_v37, %v6684_v57 }
 0x24f   :  { %1604 = vmatpush1.bf16.msra.mxu0 %v6813_v56  ;;  %1645 = vmatpush1.bf16.msra.mxu1 %v6817_v54  ;;  %v1183_v56 = vrot.slane %v1178_v37, %v6647_v14 }
 0x250   :  { %1671 = vmatprep.subr.bf16.mxu0 %v6819_v29  ;;  %1712 = vmatprep.subr.bf16.mxu1 %v6821_v33  ;;  %v1187_v29 = vrot.slane %v1178_v37, %v6652_v16 }
 0x2c5   :  { %v1048_v40 = vpop.f32.mrb[4].mxu0  ;;  %v1089_v28 = vpop.f32.mrb[36].mxu1 }
 0x2c6   :  { %v1050_v32 = vpop.f32.mrb[5].mxu0  ;;  %v1091_v35 = vpop.f32.mrb[37].mxu1 }
 0x2c7   :  { %v1052_v39 = vpop.f32.mrb[6].mxu0  ;;  %v1093_v43 = vpop.f32.mrb[38].mxu1 }
 0x2c8   :  { %v1053_v45 = vpop.f32.mrb[7].mxu0  ;;  %v1094_v0 = vpop.f32.mrb[39].mxu1 }
 0x2e5   :  { %v1130_v41 = vpop.f32.mrb[8].mxu0  ;;  %v1171_v54 = vpop.f32.mrb[40].mxu1 }
 0x2e6   :  { %v1131_v47 = vadd.f32 %v1130_v41, %v1048_v40  ;;  %v1172_v33 = vadd.f32 %v1171_v54, %v1089_v28  ;;  %v1132_v49 = vpop.f32.mrb[9].mxu0  ;;  %v1173_v31 = vpop.f32.mrb[41].mxu1 }
 0x2e7   :  { %v1133_v27 = vadd.f32 %v1132_v49, %v1050_v32  ;;  %v1174_v51 = vadd.f32 %v1173_v31, %v1091_v35  ;;  %v1134_v53 = vpop.f32.mrb[10].mxu0  ;;  %v1175_v55 = vpop.f32.mrb[42].mxu1 }
 0x2e8   :  { %v1200_v63 = vadd.f32 %v1183_v56, %v1131_v47  ;;  %v1135_v6 = vpop.f32.mrb[11].mxu0  ;;  %v1176_v8 = vpop.f32.mrb[43].mxu1  ;;  %v1202_v59 = vadd.f32 %v1191_v20, %v1172_v33  ;;  %v8683_v20 = vld [vmem:[#allocation64_spill] sm:$0xff] }
 0x2e9   :  { %v1201_v10 = vadd.f32 %v1187_v29, %v1133_v27  ;;  %v1203_v18 = vadd.f32 %v1195_v4, %v1174_v51 }
 0x2ea   :  { %v1204_v12 = vmul.f32 0.5, %v1200_v63  ;;  %v1206_v61 = vmul.f32 0.5, %v1202_v59  ;;  %v8684_v59 = vld [vmem:[#allocation65_spill] sm:$0xff] }
 0x2eb   :  { %v1205_v17 = vmul.f32 0.5, %v1201_v10 }
 0x2ec   :  { %6083 = vtanh.f32 %v1204_v12 }
 0x2ed   :  { %6085 = vtanh.f32 %v1205_v17  ;;  %v8682_v17 = vld [vmem:[#allocation63_spill] sm:$0xff] }
 0x2ee   :  { %6087 = vtanh.f32 %v1203_v18 }
 0x2ef   :  { %6089 = vtanh.f32 %v1206_v61  ;;  %v8685_v61 = vld [vmem:[#allocation61_spill] sm:$0xff] }
 0x2f6   :  { %v6084_v62 = vpop.eup %6083 }
 0x2f7   :  { %v1210_v22 = vmul.f32 0.5, %v6084_v62  ;;  %v6086_v24 = vpop.eup %6085 }
 0x2f8   :  { %v1211_v28 = vmul.f32 0.5, %v6086_v24  ;;  %v6088_v32 = vpop.eup %6087  ;;  %v8688_v24 = vld [vmem:[#allocation68_spill] sm:$0xff] }
 0x2f9   :  { %v1213_v40 = vadd.f32 0.5, %v1210_v22  ;;  %v6090_v0 = vpop.eup %6089  ;;  %v8686_v22 = vld [vmem:[#allocation66_spill] sm:$0xff] }
 0x2fa   :  { %v1214_v35 = vadd.f32 0.5, %v1211_v28  ;;  %v1212_v41 = vmul.f32 0.5, %v6090_v0  ;;  %v8690_v28 = vld [vmem:[#allocation70_spill] sm:$0xff] }
 0x2fb   :  { %v1218_v39 = vmul.f32 %v6088_v32, %v1213_v40  ;;  %v8689_v40 = vld [vmem:[#allocation69_spill] sm:$0xff]  ;;  %v8691_v32 = vld [vmem:[#allocation71_spill] sm:$0xff]  ;;  %v8694_v0 = vld [vmem:[#allocation74_spill] sm:$0xff] }
 0x2fc   :  { %v1217_v43 = vmul.f32 %v1214_v35, %v6633_v2  ;;  %v1215_v63 = vadd.f32 0.5, %v1212_v41  ;;  %v8696_v41 = vld [vmem:[#allocation76_spill] sm:$0xff] }
 0x2fe   :  { %v7071_v45 = vadd.f32 %v1218_v39, %v1217_v43  ;;  %v8692_v39 = vld [vmem:[#allocation72_spill] sm:$0xff]  ;;  %v8693_v43 = vld [vmem:[#allocation73_spill] sm:$0xff] }
 0x300   :  { %6091 = vtanh.f32 %v7071_v45 }
 0x305   :  { %v1453_v37 = vpop.f32.mrb[12].mxu0  ;;  %v1494_v56 = vpop.f32.mrb[44].mxu1 }
 0x306   :  { %v1501_v54 = vadd.f32 %v1453_v37, %v6656_v26  ;;  %v1455_v29 = vpop.f32.mrb[13].mxu0  ;;  %v1496_v47 = vpop.f32.mrb[45].mxu1  ;;  %v1503_v26 = vadd.f32 %v1494_v56, %v6690_v3  ;;  %v8695_v37 = vld [vmem:[#allocation75_spill] sm:$0xff] }
 0x307   :  { %v1502_v33 = vadd.f32 %v1455_v29, %v6658_v30  ;;  %v1457_v49 = vpop.f32.mrb[14].mxu0  ;;  %v1498_v31 = vpop.f32.mrb[46].mxu1  ;;  %v1504_v2 = vadd.f32 %v1496_v47, %v6692_v5  ;;  %v8698_v29 = vld [vmem:[#allocation78_spill] sm:$0xff]  ;;  %v8699_v47 = vld [vmem:[#allocation79_spill] sm:$0xff] }
 0x308   :  { %v1505_v27 = vmul.f32 0.5, %v1501_v54  ;;  %v1458_v51 = vpop.f32.mrb[15].mxu0  ;;  %v1499_v53 = vpop.f32.mrb[47].mxu1  ;;  %v1507_v5 = vmul.f32 0.5, %v1503_v26  ;;  %v8697_v54 = vld [vmem:[#allocation77_spill] sm:$0xff]  ;;  %v8700_v31 = vld [vmem:[#allocation80_spill] sm:$0xff] }
 0x309   :  { %v1506_v55 = vmul.f32 0.5, %v1502_v33  ;;  %v8701_v51 = vld [vmem:[#allocation81_spill] sm:$0xff]  ;;  %v8706_v26 = vld [vmem:[#allocation86_spill] sm:$0xff] }
 0x30a   :  { %6093 = vtanh.f32 %v1505_v27  ;;  %v6092_v4 = vpop.eup %6091 }
 0x30b   :  { %6095 = vtanh.f32 %v1506_v55  ;;  %v7077_v6 = vmul.f32 %v6092_v4, %v1215_v63  ;;  %v8703_v55 = vld [vmem:[#allocation83_spill] sm:$0xff]  ;;  %v8704_v63 = vld [vmem:[#allocation84_spill] sm:$0xff]  ;;  %v8705_v4 = vld [vmem:[#allocation85_spill] sm:$0xff] }
 0x30c   :  { %6097 = vtanh.f32 %v1504_v2  ;;  %v8702_v2 = vld [vmem:[#allocation82_spill] sm:$0xff] }
 0x30d   :  { %8680 = vst [vmem:[#allocation105_spill] sm:$0xff] %v7077_v6  ;;  %v1556_v30 = vpack.c.bf16 %v7077_v6, %v7077_v6  ;;  %6099 = vtanh.f32 %v1507_v5  ;;  %v8709_v5 = vld [vmem:[#allocation89_spill] sm:$0xff] }
 0x30f   :  { %1622 = vmatmul.mubr.bf16.vlgmr.msra.gmra.mrb[16].mxu0 %v1556_v30  ;;  %1663 = vmatmul.mubr.bf16.vlgmr.msra.gmra.mrb[48].mxu1 %v1556_v30  ;;  %v8708_v30 = vld [vmem:[#allocation88_spill] sm:$0xff] }
 0x310   :  { %1672 = vmatpush1.bf16.msra.mxu0 %v6827_v50  ;;  %1713 = vmatpush1.bf16.msra.mxu1 %v6831_v21  ;;  %v8681_v21 = vld [vmem:[#allocation62_spill] sm:$0xff] }
 0x311   :  { %1673 = vmatprep.subr.bf16.mxu0 %v6833_v23  ;;  %1714 = vmatprep.subr.bf16.mxu1 %v6835_v48 }
 0x312   :  { %1703 = vmatprep.mubr.bf16.mxu0 %v8638_v44  ;;  %1744 = vmatprep.mubr.bf16.mxu1 %v8638_v44 }
 0x314   :  { %v6094_v8 = vpop.eup %6093  ;;  %1674 = vmatpush1.bf16.msra.mxu0 %v6839_v1  ;;  %1715 = vmatpush1.bf16.msra.mxu1 %v6843_v46  ;;  %v8687_v1 = vld [vmem:[#allocation67_spill] sm:$0xff] }
 0x315   :  { %v6096_v3 = vpop.eup %6095  ;;  %v1511_v10 = vmul.f32 0.5, %v6094_v8  ;;  %1675 = vmatprep.subr.bf16.mxu0 %v8681_v21  ;;  %1716 = vmatprep.subr.bf16.mxu1 %v8682_v17  ;;  %v8710_v8 = vld [vmem:[#allocation90_spill] sm:$0xff]  ;;  %v8716_v21 = vld [vmem:[#allocation96_spill] sm:$0xff]  ;;  %v8717_v17 = vld [vmem:[#allocation97_spill] sm:$0xff] }
 0x316   :  { %v6098_v12 = vpop.eup %6097  ;;  %v1512_v50 = vmul.f32 0.5, %v6096_v3  ;;  %v8711_v3 = vld [vmem:[#allocation91_spill] sm:$0xff] }
 0x317   :  { %v1514_v23 = vadd.f32 0.5, %v1511_v10  ;;  %v6100_v35 = vpop.eup %6099  ;;  %v8712_v10 = vld [vmem:[#allocation92_spill] sm:$0xff] }
 0x318   :  { %v1515_v48 = vadd.f32 0.5, %v1512_v50  ;;  %1676 = vmatpush1.bf16.msra.mxu0 %v8683_v20  ;;  %1717 = vmatpush1.bf16.msra.mxu1 %v8684_v59  ;;  %v1513_v56 = vmul.f32 0.5, %v6100_v35  ;;  %v8715_v50 = vld [vmem:[#allocation95_spill] sm:$0xff]  ;;  %v8722_v20 = vld [vmem:[#allocation102_spill] sm:$0xff]  ;;  %v8724_v59 = vld [vmem:[#allocation104_spill] sm:$0xff] }
 0x319   :  { %v1519_v18 = vmul.f32 %v6098_v12, %v1514_v23  ;;  %1677 = vmatprep.subr.bf16.mxu0 %v8686_v22  ;;  %1718 = vmatprep.subr.bf16.mxu1 %v8687_v1  ;;  %v8714_v12 = vld [vmem:[#allocation94_spill] sm:$0xff]  ;;  %v7186_v22 = vld [vmem:[#allocation5 + $0x50] sm:$0xff]  ;;  %v7190_v1 = vld [vmem:[#allocation5 + $0x68] sm:$0xff] }
 0x31a   :  { %v1518_v62 = vmul.f32 %v1515_v48, %v8685_v61  ;;  %v1516_v33 = vadd.f32 0.5, %v1513_v56  ;;  %v8718_v23 = vld [vmem:[#allocation98_spill] sm:$0xff]  ;;  %v8719_v48 = vld [vmem:[#allocation99_spill] sm:$0xff] }
 0x31b   :  { %v7180_v61 = vld [vmem:[#allocation5 + $0x58] sm:$0xff]  ;;  %v7218_v56 = vld [vmem:[#allocation5 + $0xa0] sm:$0xff] }
 0x31c   :  { %v7097_v46 = vadd.f32 %v1519_v18, %v1518_v62  ;;  %1678 = vmatpush1.bf16.msra.mxu0 %v8688_v24  ;;  %1719 = vmatpush1.bf16.msra.mxu1 %v8689_v40  ;;  %v8721_v18 = vld [vmem:[#allocation101_spill] sm:$0xff]  ;;  %v7184_v62 = vld [vmem:[#allocation5 + $0x40] sm:$0xff]  ;;  %v7192_v24 = vld [vmem:[#allocation5 + $0x78] sm:$0xff] }
 0x31d   :  { %1679 = vmatprep.subr.bf16.mxu0 %v8690_v28  ;;  %1720 = vmatprep.subr.bf16.mxu1 %v8691_v32  ;;  %v7196_v40 = vld [vmem:[#allocation5 + $0x60] sm:$0xff]  ;;  %v7198_v28 = vld [vmem:[#allocation5 + $0x70] sm:$0xff]  ;;  %v7202_v32 = vld [vmem:[#allocation5 + $0x88] sm:$0xff] }
 0x31e   :  { %6101 = vtanh.f32 %v7097_v46  ;;  %v7204_v35 = vld [vmem:[#allocation5 + $0x98] sm:$0xff] }
 0x320   :  { %1680 = vmatpush1.bf16.msra.mxu0 %v8692_v39  ;;  %1721 = vmatpush1.bf16.msra.mxu1 %v8693_v43  ;;  %v7208_v39 = vld [vmem:[#allocation5 + $0x80] sm:$0xff]  ;;  %v7210_v43 = vld [vmem:[#allocation5 + $0x90] sm:$0xff] }
 0x321   :  { %1681 = vmatprep.subr.bf16.mxu0 %v8694_v0  ;;  %1722 = vmatprep.subr.bf16.mxu1 %v8695_v37  ;;  %v7214_v0 = vld [vmem:[#allocation5 + $0xa8] sm:$0xff]  ;;  %v7216_v37 = vld [vmem:[#allocation5 + $0xb8] sm:$0xff] }
 0x324   :  { %1682 = vmatpush1.bf16.msra.mxu0 %v8696_v41  ;;  %1723 = vmatpush1.bf16.msra.mxu1 %v8697_v54  ;;  %v7222_v41 = vld [vmem:[#allocation5 + $0xb0] sm:$0xff]  ;;  %v7226_v54 = vld [vmem:[#allocation5 + $0xc8] sm:$0xff] }
 0x325   :  { %1683 = vmatprep.subr.bf16.mxu0 %v8698_v29  ;;  %1724 = vmatprep.subr.bf16.mxu1 %v8699_v47  ;;  %v7228_v29 = vld [vmem:[#allocation5 + $0xd8] sm:$0xff]  ;;  %v7232_v47 = vld [vmem:[#allocation5 + $0xc0] sm:$0xff] }
 0x328   :  { %v6102_v49 = vpop.eup %6101  ;;  %1684 = vmatpush1.bf16.msra.mxu0 %v6899_v38  ;;  %1725 = vmatpush1.bf16.msra.mxu1 %v8700_v31  ;;  %v8707_v38 = vld [vmem:[#allocation87_spill] sm:$0xff]  ;;  %v7240_v31 = vld [vmem:[#allocation5 + $0xf8] sm:$0xff] }
 0x329   :  { %v1522_v27 = vmul.f32 %v6102_v49, %v1516_v33  ;;  %1685 = vmatprep.subr.bf16.mxu0 %v8701_v51  ;;  %1726 = vmatprep.subr.bf16.mxu1 %v8702_v2  ;;  %v7234_v33 = vld [vmem:[#allocation5 + $0xd0] sm:$0xff]  ;;  %v7238_v49 = vld [vmem:[#allocation5 + $0xe8] sm:$0xff] }
 0x32a   :  { %v7246_v51 = vld [vmem:[#allocation5 + $0xf0] sm:$0xff]  ;;  %v7250_v2 = vld [vmem:[#allocation4 + $0x8] sm:$0xff] }
 0x32b   :  { %v1523_v53 = vpack.c.bf16 %v1522_v27, %v1522_v27  ;;  %v7244_v27 = vld [vmem:[#allocation5 + $0xe0] sm:$0xff] }
 0x32c   :  { %1686 = vmatpush1.bf16.msra.mxu0 %v8703_v55  ;;  %1727 = vmatpush1.bf16.msra.mxu1 %v8704_v63 }
 0x32d   :  { %1994 = vmatprep.subr.bf16.mxu0 %v8705_v4  ;;  %2035 = vmatprep.subr.bf16.mxu1 %v8706_v26 }
 0x32f   :  { %1704 = vmatmul.mubr.bf16.vlgmr.msra.gmra.mrb[20].mxu0 %v1523_v53  ;;  %1745 = vmatmul.mubr.bf16.vlgmr.msra.gmra.mrb[52].mxu1 %v1523_v53 }
 0x330   :  { %1995 = vmatpush1.bf16.msra.mxu0 %v6923_v11  ;;  %2036 = vmatpush1.bf16.msra.mxu1 %v8707_v38  ;;  %v8713_v11 = vld [vmem:[#allocation93_spill] sm:$0xff] }
 0x331   :  { %1996 = vmatprep.subr.bf16.mxu0 %v8708_v30  ;;  %2037 = vmatprep.subr.bf16.mxu1 %v8709_v5 }
 0x332   :  { %2026 = vmatprep.mubr.bf16.mxu0 %v8638_v44  ;;  %2067 = vmatprep.mubr.bf16.mxu1 %v8638_v44 }
 0x334   :  { %1997 = vmatpush1.bf16.msra.mxu0 %v8710_v8  ;;  %2038 = vmatpush1.bf16.msra.mxu1 %v6941_v9  ;;  %v8720_v9 = vld [vmem:[#allocation100_spill] sm:$0xff] }
 0x335   :  { %1998 = vmatprep.subr.bf16.mxu0 %v8711_v3  ;;  %2039 = vmatprep.subr.bf16.mxu1 %v8712_v10  ;;  %v1753_v3 = vld [vmem:[%s8442_s6] sm:$0xf] }
 0x336   :  { %v1758_v10 = vrot.slane %v1753_v3, %v6647_v14 }
 0x338   :  { %1999 = vmatpush1.bf16.msra.mxu0 %v6953_v19  ;;  %2040 = vmatpush1.bf16.msra.mxu1 %v8713_v11  ;;  %v8723_v19 = vld [vmem:[#allocation103_spill] sm:$0xff] }
 0x339   :  { %2000 = vmatprep.subr.bf16.mxu0 %v8714_v12  ;;  %2041 = vmatprep.subr.bf16.mxu1 %v8715_v50  ;;  %v1762_v50 = vrot.slane %v1753_v3, %v6652_v16  ;;  %v1766_v16 = vrot.slane %v1753_v3, %v6684_v57 }
 0x33c   :  { %2001 = vmatpush1.bf16.msra.mxu0 %v8716_v21  ;;  %2042 = vmatpush1.bf16.msra.mxu1 %v8717_v17 }
 0x33d   :  { %2002 = vmatprep.subr.bf16.mxu0 %v8718_v23  ;;  %2043 = vmatprep.subr.bf16.mxu1 %v8719_v48 }
 0x340   :  { %2003 = vmatpush1.bf16.msra.mxu0 %v8720_v9  ;;  %2044 = vmatpush1.bf16.msra.mxu1 %v8721_v18 }
 0x341   :  { %2004 = vmatprep.subr.bf16.mxu0 %v8722_v20  ;;  %2045 = vmatprep.subr.bf16.mxu1 %v8723_v19 }
 0x344   :  { %2005 = vmatpush1.bf16.msra.mxu0 %v8724_v59  ;;  %2046 = vmatpush1.bf16.msra.mxu1 %v6995_v15  ;;  %v7168_v15 = vld [vmem:[#allocation5 + $0x38] sm:$0xff] }
 0x345   :  { %2006 = vmatprep.subr.bf16.mxu0 %v6998_v42  ;;  %2047 = vmatprep.subr.bf16.mxu1 %v7001_v13  ;;  %v7154_v42 = vld [vmem:[#allocation5 + $0x8] sm:$0xff]  ;;  %v7156_v13 = vld [vmem:[#allocation5 + $0x18] sm:$0xff] }
 0x348   :  { %2007 = vmatpush1.bf16.msra.mxu0 %v7004_v36  ;;  %2048 = vmatpush1.bf16.msra.mxu1 %v7007_v25  ;;  %v7160_v36 = vld [vmem:[#allocation5] sm:$0xff]  ;;  %v7178_v25 = vld [vmem:[#allocation5 + $0x48] sm:$0xff] }
 0x349   :  { %2008 = vmatprep.subr.bf16.mxu0 %v7010_v7  ;;  %2049 = vmatprep.subr.bf16.mxu1 %v7013_v52  ;;  %v7162_v7 = vld [vmem:[#allocation5 + $0x10] sm:$0xff] }
 0x34a   :  { %v7174_v52 = vld [vmem:[#allocation5 + $0x30] sm:$0xff] }
 0x34c   :  { %2009 = vmatpush1.bf16.msra.mxu0 %v7016_v60  ;;  %2050 = vmatpush1.bf16.msra.mxu1 %v7019_v34  ;;  %v7166_v34 = vld [vmem:[#allocation5 + $0x28] sm:$0xff]  ;;  %v7172_v60 = vld [vmem:[#allocation5 + $0x20] sm:$0xff] }
 0x34d   :  { %2164 = vmatprep.subr.bf16.mxu0 %v7154_v42  ;;  %2205 = vmatprep.subr.bf16.mxu1 %v7156_v13 }
 0x34f   :  { %2027 = vmatmul.mubr.bf16.vlgmr.msra.gmra.mrb[24].mxu0 %v1523_v53  ;;  %2068 = vmatmul.mubr.bf16.vlgmr.msra.gmra.mrb[56].mxu1 %v1523_v53  ;;  %v7252_v53 = vld [vmem:[#allocation4 + $0x18] sm:$0xff] }
 0x350   :  { %2196 = vmatprep.mubr.bf16.mxu0 %v8638_v44  ;;  %2237 = vmatprep.mubr.bf16.mxu1 %v8638_v44  ;;  %8725 = vst [vmem:[#allocation62_spill] sm:$0xff] %v7252_v53 }
 0x351   :  { %2165 = vmatpush1.bf16.msra.mxu0 %v7160_v36  ;;  %2206 = vmatpush1.bf16.msra.mxu1 %v7162_v7 }
 0x352   :  { %2166 = vmatprep.subr.bf16.mxu0 %v7166_v34  ;;  %2207 = vmatprep.subr.bf16.mxu1 %v7168_v15 }
 0x355   :  { %2167 = vmatpush1.bf16.msra.mxu0 %v7172_v60  ;;  %2208 = vmatpush1.bf16.msra.mxu1 %v7174_v52 }
 0x356   :  { %2168 = vmatprep.subr.bf16.mxu0 %v7178_v25  ;;  %2209 = vmatprep.subr.bf16.mxu1 %v7180_v61 }
 0x359   :  { %2169 = vmatpush1.bf16.msra.mxu0 %v7184_v62  ;;  %2210 = vmatpush1.bf16.msra.mxu1 %v7186_v22 }
 0x35a   :  { %2170 = vmatprep.subr.bf16.mxu0 %v7190_v1  ;;  %2211 = vmatprep.subr.bf16.mxu1 %v7192_v24 }
 0x35d   :  { %2171 = vmatpush1.bf16.msra.mxu0 %v7196_v40  ;;  %2212 = vmatpush1.bf16.msra.mxu1 %v7198_v28 }
 0x35e   :  { %2172 = vmatprep.subr.bf16.mxu0 %v7202_v32  ;;  %2213 = vmatprep.subr.bf16.mxu1 %v7204_v35 }
 0x361   :  { %2173 = vmatpush1.bf16.msra.mxu0 %v7208_v39  ;;  %2214 = vmatpush1.bf16.msra.mxu1 %v7210_v43 }
 0x362   :  { %2174 = vmatprep.subr.bf16.mxu0 %v7214_v0  ;;  %2215 = vmatprep.subr.bf16.mxu1 %v7216_v37 }
 0x365   :  { %2175 = vmatpush1.bf16.msra.mxu0 %v7218_v56  ;;  %2216 = vmatpush1.bf16.msra.mxu1 %v7222_v41 }
 0x366   :  { %2176 = vmatprep.subr.bf16.mxu0 %v7226_v54  ;;  %2217 = vmatprep.subr.bf16.mxu1 %v7228_v29 }
 0x369   :  { %2177 = vmatpush1.bf16.msra.mxu0 %v7232_v47  ;;  %2218 = vmatpush1.bf16.msra.mxu1 %v7234_v33 }
 0x36a   :  { %2178 = vmatprep.subr.bf16.mxu0 %v7238_v49  ;;  %2219 = vmatprep.subr.bf16.mxu1 %v7240_v31 }
 0x36d   :  { %2179 = vmatpush1.bf16.msra.mxu0 %v7244_v27  ;;  %2220 = vmatpush1.bf16.msra.mxu1 %v7246_v51 }
 0x36e   :  { %2246 = vmatprep.subr.bf16.mxu0 %v7250_v2  ;;  %2287 = vmatprep.subr.bf16.mxu1 %v7252_v53 }
 0x3e2   :  { %v1623_v55 = vpop.f32.mrb[16].mxu0  ;;  %v1664_v63 = vpop.f32.mrb[48].mxu1 }
 0x3e3   :  { %v1625_v4 = vpop.f32.mrb[17].mxu0  ;;  %v1666_v26 = vpop.f32.mrb[49].mxu1 }
 0x3e4   :  { %v1627_v38 = vpop.f32.mrb[18].mxu0  ;;  %v1668_v30 = vpop.f32.mrb[50].mxu1 }
 0x3e5   :  { %v1628_v5 = vpop.f32.mrb[19].mxu0  ;;  %v1669_v8 = vpop.f32.mrb[51].mxu1  ;;  %v1770_v38 = vrot.slane %v1753_v3, %v6686_v58  ;;  %v8726_v3 = vld [vmem:[#allocation37_spill] sm:$0xff] }
 0x402   :  { %v1705_v11 = vpop.f32.mrb[20].mxu0  ;;  %v1746_v12 = vpop.f32.mrb[52].mxu1 }
 0x403   :  { %v1706_v21 = vadd.f32 %v1705_v11, %v1623_v55  ;;  %v1747_v17 = vadd.f32 %v1746_v12, %v1664_v63  ;;  %v1707_v23 = vpop.f32.mrb[21].mxu0  ;;  %v1748_v48 = vpop.f32.mrb[53].mxu1 }
 0x404   :  { %v1708_v9 = vadd.f32 %v1707_v23, %v1625_v4  ;;  %v1749_v18 = vadd.f32 %v1748_v48, %v1666_v26  ;;  %v1709_v20 = vpop.f32.mrb[22].mxu0  ;;  %v1750_v19 = vpop.f32.mrb[54].mxu1 }
 0x405   :  { %v1775_v59 = vadd.f32 %v1758_v10, %v1706_v21  ;;  %v1710_v30 = vpop.f32.mrb[23].mxu0  ;;  %v1751_v5 = vpop.f32.mrb[55].mxu1  ;;  %v1777_v55 = vadd.f32 %v1766_v16, %v1747_v17  ;;  %v8727_v19 = vld [vmem:[#allocation38_spill] sm:$0xff] }
 0x406   :  { %v1776_v8 = vadd.f32 %v1762_v50, %v1708_v9  ;;  %v1778_v53 = vadd.f32 %v1770_v38, %v1749_v18 }
 0x407   :  { %v1779_v6 = vmul.f32 0.5, %v1775_v59  ;;  %v1781_v63 = vmul.f32 0.5, %v1777_v55 }
 0x408   :  { %v1780_v14 = vmul.f32 0.5, %v1776_v8 }
 0x409   :  { %6103 = vtanh.f32 %v1779_v6 }
 0x40a   :  { %6105 = vtanh.f32 %v1780_v14 }
 0x40b   :  { %6107 = vtanh.f32 %v1778_v53 }
 0x40c   :  { %6109 = vtanh.f32 %v1781_v63 }
 0x413   :  { %v6104_v4 = vpop.eup %6103 }
 0x414   :  { %v1785_v26 = vmul.f32 0.5, %v6104_v4  ;;  %v6106_v11 = vpop.eup %6105  ;;  %v8728_v4 = vld [vmem:[#allocation50_spill] sm:$0xff] }
 0x415   :  { %v1786_v10 = vmul.f32 0.5, %v6106_v11  ;;  %v6108_v21 = vpop.eup %6107 }
 0x416   :  { %v1788_v12 = vadd.f32 0.5, %v1785_v26  ;;  %v6110_v6 = vpop.eup %6109 }
 0x417   :  { %v1789_v23 = vadd.f32 0.5, %v1786_v10  ;;  %v1787_v16 = vmul.f32 0.5, %v6110_v6  ;;  %v7279_v6 = vld [vmem:[#allocation4 + $0x28] sm:$0xff] }
 0x418   :  { %v1793_v48 = vmul.f32 %v6108_v21, %v1788_v12  ;;  %v7274_v21 = vld [vmem:[#allocation4] sm:$0xff] }
 0x419   :  { %v1792_v50 = vmul.f32 %v1789_v23, %v7071_v45  ;;  %v1790_v63 = vadd.f32 0.5, %v1787_v16  ;;  %v7276_v23 = vld [vmem:[#allocation4 + $0x10] sm:$0xff]  ;;  %v7287_v16 = vld [vmem:[#allocation4 + $0x20] sm:$0xff] }
 0x41b   :  { %v7264_v9 = vadd.f32 %v1793_v48, %v1792_v50  ;;  %v8730_v48 = vld [vmem:[#allocation49_spill] sm:$0xff] }
 0x41d   :  { %6111 = vtanh.f32 %v7264_v9 }
 0x422   :  { %v2028_v14 = vpop.f32.mrb[24].mxu0  ;;  %v2069_v53 = vpop.f32.mrb[56].mxu1 }
 0x423   :  { %v2076_v17 = vadd.f32 %v2028_v14, %v8726_v3  ;;  %v2030_v18 = vpop.f32.mrb[25].mxu0  ;;  %v2071_v20 = vpop.f32.mrb[57].mxu1  ;;  %v2078_v50 = vadd.f32 %v2069_v53, %v8730_v48  ;;  %v7281_v14 = vld [vmem:[#allocation4 + $0x38] sm:$0xff]  ;;  %v7289_v3 = vld [vmem:[#allocation4 + $0x30] sm:$0xff]  ;;  %v7291_v53 = vld [vmem:[#allocation4 + $0x48] sm:$0xff] }
 0x424   :  { %v2077_v59 = vadd.f32 %v2030_v18, %v8727_v19  ;;  %v2032_v38 = vpop.f32.mrb[26].mxu0  ;;  %v2073_v30 = vpop.f32.mrb[58].mxu1  ;;  %v2079_v26 = vadd.f32 %v2071_v20, %v8728_v4  ;;  %v7293_v18 = vld [vmem:[#allocation4 + $0x58] sm:$0xff] }
 0x425   :  { %v2080_v5 = vmul.f32 0.5, %v2076_v17  ;;  %v2033_v8 = vpop.f32.mrb[27].mxu0  ;;  %v2074_v55 = vpop.f32.mrb[59].mxu1  ;;  %v2082_v17 = vmul.f32 0.5, %v2078_v50  ;;  %v7301_v38 = vld [vmem:[#allocation4 + $0x40] sm:$0xff]  ;;  %v7303_v30 = vld [vmem:[#allocation4 + $0x50] sm:$0xff] }
 0x426   :  { %v2081_v45 = vmul.f32 0.5, %v2077_v59  ;;  %v7305_v55 = vld [vmem:[#allocation4 + $0x68] sm:$0xff] }
 0x427   :  { %6113 = vtanh.f32 %v2080_v5  ;;  %v6112_v11 = vpop.eup %6111  ;;  %v7318_v50 = vld [vmem:[#allocation4 + $0x88] sm:$0xff] }
 0x428   :  { %6115 = vtanh.f32 %v2081_v45  ;;  %v7270_v12 = vmul.f32 %v6112_v11, %v1790_v63  ;;  %v7307_v45 = vld [vmem:[#allocation4 + $0x78] sm:$0xff]  ;;  %v7313_v11 = vld [vmem:[#allocation4 + $0x60] sm:$0xff]  ;;  %8732 = vst [vmem:[#allocation65_spill] sm:$0xff] %v7318_v50 }
 0x429   :  { %6117 = vtanh.f32 %v2079_v26 }
 0x42a   :  { %8729 = vst [vmem:[#allocation63_spill] sm:$0xff] %v7270_v12  ;;  %v2131_v10 = vpack.c.bf16 %v7270_v12, %v7270_v12  ;;  %6119 = vtanh.f32 %v2082_v17  ;;  %v7320_v17 = vld [vmem:[#allocation4 + $0x98] sm:$0xff] }
 0x42b   :  { %8733 = vst [vmem:[#allocation61_spill] sm:$0xff] %v7320_v17 }
 0x42c   :  { %2197 = vmatmul.mubr.bf16.vlgmr.msra.gmra.mrb[28].mxu0 %v2131_v10  ;;  %2238 = vmatmul.mubr.bf16.vlgmr.msra.gmra.mrb[60].mxu1 %v2131_v10  ;;  %v7315_v10 = vld [vmem:[#allocation4 + $0x70] sm:$0xff] }
 0x42d   :  { %2247 = vmatpush1.bf16.msra.mxu0 %v7274_v21  ;;  %2288 = vmatpush1.bf16.msra.mxu1 %v7276_v23  ;;  %8731 = vst [vmem:[#allocation64_spill] sm:$0xff] %v7315_v10 }
 0x42e   :  { %2248 = vmatprep.subr.bf16.mxu0 %v7279_v6  ;;  %2289 = vmatprep.subr.bf16.mxu1 %v7281_v14 }
 0x42f   :  { %2278 = vmatprep.mubr.bf16.mxu0 %v8638_v44  ;;  %2319 = vmatprep.mubr.bf16.mxu1 %v8638_v44 }
 0x431   :  { %v6114_v20 = vpop.eup %6113  ;;  %2249 = vmatpush1.bf16.msra.mxu0 %v7287_v16  ;;  %2290 = vmatpush1.bf16.msra.mxu1 %v7289_v3 }
 0x432   :  { %v2086_v19 = vmul.f32 0.5, %v6114_v20  ;;  %v6116_v59 = vpop.eup %6115  ;;  %2250 = vmatprep.subr.bf16.mxu0 %v7291_v53  ;;  %2291 = vmatprep.subr.bf16.mxu1 %v7293_v18 }
 0x433   :  { %v2087_v8 = vmul.f32 0.5, %v6116_v59  ;;  %v6118_v63 = vpop.eup %6117  ;;  %v7330_v59 = vld [vmem:[#allocation4 + $0x90] sm:$0xff] }
 0x434   :  { %v2089_v5 = vadd.f32 0.5, %v2086_v19  ;;  %v7328_v19 = vld [vmem:[#allocation4 + $0x80] sm:$0xff]  ;;  %8735 = vst [vmem:[#allocation67_spill] sm:$0xff] %v7330_v59 }
 0x435   :  { %v2090_v4 = vadd.f32 0.5, %v2087_v8  ;;  %2251 = vmatpush1.bf16.msra.mxu0 %v7301_v38  ;;  %2292 = vmatpush1.bf16.msra.mxu1 %v7303_v30  ;;  %8734 = vst [vmem:[#allocation66_spill] sm:$0xff] %v7328_v19  ;;  %v6120_v8 = vpop.eup %6119 }
 0x436   :  { %v2094_v26 = vmul.f32 %v6118_v63, %v2089_v5  ;;  %2252 = vmatprep.subr.bf16.mxu0 %v7305_v55  ;;  %2293 = vmatprep.subr.bf16.mxu1 %v7307_v45  ;;  %v7335_v5 = vld [vmem:[#allocation4 + $0xb8] sm:$0xff]  ;;  %v7341_v63 = vld [vmem:[#allocation4 + $0xa0] sm:$0xff]  ;;  %v2088_v12 = vmul.f32 0.5, %v6120_v8 }
 0x437   :  { %v2093_v48 = vmul.f32 %v2090_v4, %v7097_v46  ;;  %v7333_v46 = vld [vmem:[#allocation4 + $0xa8] sm:$0xff]  ;;  %8737 = vst [vmem:[#allocation69_spill] sm:$0xff] %v7335_v5  ;;  %8738 = vst [vmem:[#allocation70_spill] sm:$0xff] %v7341_v63  ;;  %v7343_v4 = vld [vmem:[#allocation4 + $0xb0] sm:$0xff] }
 0x438   :  { %8736 = vst [vmem:[#allocation68_spill] sm:$0xff] %v7333_v46  ;;  %8739 = vst [vmem:[#allocation71_spill] sm:$0xff] %v7343_v4  ;;  %v7363_v8 = vld [vmem:[#allocation4 + $0xe0] sm:$0xff] }
 0x439   :  { %v7322_v20 = vadd.f32 %v2094_v26, %v2093_v48  ;;  %2253 = vmatpush1.bf16.msra.mxu0 %v7313_v11  ;;  %2294 = vmatpush1.bf16.msra.mxu1 %v7315_v10  ;;  %v7345_v26 = vld [vmem:[#allocation4 + $0xc8] sm:$0xff]  ;;  %v7347_v48 = vld [vmem:[#allocation4 + $0xd8] sm:$0xff] }
 0x43a   :  { %2254 = vmatprep.subr.bf16.mxu0 %v7318_v50  ;;  %2295 = vmatprep.subr.bf16.mxu1 %v7320_v17  ;;  %8740 = vst [vmem:[#allocation72_spill] sm:$0xff] %v7345_v26  ;;  %8741 = vst [vmem:[#allocation73_spill] sm:$0xff] %v7347_v48  ;;  %v2091_v17 = vadd.f32 0.5, %v2088_v12  ;;  %v7377_v12 = vld [vmem:[#allocation16] ss:$16 sps:$4 sm:$0xff]  }
 0x43b   :  { %6121 = vtanh.f32 %v7322_v20  ;;  %8747 = vst [vmem:[#allocation79_spill] sm:$0xff] %v7377_v12 }
 0x43d   :  { %2255 = vmatpush1.bf16.msra.mxu0 %v7328_v19  ;;  %2296 = vmatpush1.bf16.msra.mxu1 %v7330_v59  ;;  %v7357_v59 = vld [vmem:[#allocation4 + $0xe8] sm:$0xff]  ;;  %v7359_v19 = vld [vmem:[#allocation4 + $0xf8] sm:$0xff] }
 0x43e   :  { %2256 = vmatprep.subr.bf16.mxu0 %v7333_v46  ;;  %2297 = vmatprep.subr.bf16.mxu1 %v7335_v5  ;;  %v7353_v46 = vld [vmem:[#allocation4 + $0xc0] sm:$0xff]  ;;  %v7355_v5 = vld [vmem:[#allocation4 + $0xd0] sm:$0xff]  ;;  %8743 = vst [vmem:[#allocation75_spill] sm:$0xff] %v7359_v19 }
 0x43f   :  { %8742 = vst [vmem:[#allocation74_spill] sm:$0xff] %v7355_v5 }
 0x441   :  { %2257 = vmatpush1.bf16.msra.mxu0 %v7341_v63  ;;  %2298 = vmatpush1.bf16.msra.mxu1 %v7343_v4  ;;  %v7369_v4 = vld [vmem:[#allocation16 + $0x4] ss:$16 sps:$4 sm:$0xff]   ;;  %v7371_v63 = vld [vmem:[#allocation16 + $0xc] ss:$16 sps:$4 sm:$0xff]  }
 0x442   :  { %2258 = vmatprep.subr.bf16.mxu0 %v7345_v26  ;;  %2299 = vmatprep.subr.bf16.mxu1 %v7347_v48  ;;  %v7367_v48 = vld [vmem:[#allocation4 + $0xf0] sm:$0xff]  ;;  %8745 = vst [vmem:[#allocation77_spill] sm:$0xff] %v7369_v4  ;;  %8746 = vst [vmem:[#allocation78_spill] sm:$0xff] %v7371_v63 }
 0x443   :  { %8744 = vst [vmem:[#allocation76_spill] sm:$0xff] %v7367_v48 }
 0x445   :  { %v6122_v50 = vpop.eup %6121  ;;  %2259 = vmatpush1.bf16.msra.mxu0 %v7353_v46  ;;  %2300 = vmatpush1.bf16.msra.mxu1 %v7355_v5  ;;  %v7379_v5 = vld [vmem:[#allocation16 + $0x8] ss:$16 sps:$4 sm:$0xff]  }
 0x446   :  { %2260 = vmatprep.subr.bf16.mxu0 %v7357_v59  ;;  %2301 = vmatprep.subr.bf16.mxu1 %v7359_v19  ;;  %v2097_v26 = vmul.f32 %v6122_v50, %v2091_v17  ;;  %8748 = vst [vmem:[#allocation80_spill] sm:$0xff] %v7379_v5  ;;  %v7383_v19 = vld [vmem:[#allocation16 + $0x24] ss:$16 sps:$4 sm:$0xff]   ;;  %v7385_v50 = vld [vmem:[#allocation16 + $0x2c] ss:$16 sps:$4 sm:$0xff]  }
 0x447   :  { %8749 = vst [vmem:[#allocation81_spill] sm:$0xff] %v7383_v19  ;;  %8750 = vst [vmem:[#allocation82_spill] sm:$0xff] %v7385_v50  ;;  %v7391_v17 = vld [vmem:[#allocation16 + $0x20] ss:$16 sps:$4 sm:$0xff]  }
 0x448   :  { %v7373_v10 = vpack.c.bf16 %v2097_v26, %v2097_v26  ;;  %8751 = vst [vmem:[#allocation83_spill] sm:$0xff] %v7391_v17  ;;  %v7393_v26 = vld [vmem:[#allocation16 + $0x28] ss:$16 sps:$4 sm:$0xff]  }
 0x449   :  { %2261 = vmatpush1.bf16.msra.mxu0 %v7363_v8  ;;  %2302 = vmatpush1.bf16.msra.mxu1 %v7367_v48  ;;  %8752 = vst [vmem:[#allocation84_spill] sm:$0xff] %v7393_v26  ;;  %v7417_v48 = vld [vmem:[#allocation16 + $0x60] ss:$16 sps:$4 sm:$0xff]  }
 0x44a   :  { %2569 = vmatprep.subr.bf16.mxu0 %v7369_v4  ;;  %2610 = vmatprep.subr.bf16.mxu1 %v7371_v63  ;;  %v7397_v63 = vld [vmem:[#allocation16 + $0x44] ss:$16 sps:$4 sm:$0xff]   ;;  %v7399_v4 = vld [vmem:[#allocation16 + $0x4c] ss:$16 sps:$4 sm:$0xff]   ;;  %8759 = vst [vmem:[#allocation91_spill] sm:$0xff] %v7417_v48 }
 0x44b   :  { %8753 = vst [vmem:[#allocation85_spill] sm:$0xff] %v7397_v63  ;;  %8754 = vst [vmem:[#allocation86_spill] sm:$0xff] %v7399_v4 }
 0x44c   :  { %2279 = vmatmul.mubr.bf16.vlgmr.msra.gmra.mrb[32].mxu0 %v7373_v10  ;;  %2320 = vmatmul.mubr.bf16.vlgmr.msra.gmra.mrb[64].mxu1 %v7373_v10 }
 0x44d   :  { %2570 = vmatpush1.bf16.msra.mxu0 %v7377_v12  ;;  %2611 = vmatpush1.bf16.msra.mxu1 %v7379_v5  ;;  %v7405_v5 = vld [vmem:[#allocation16 + $0x40] ss:$16 sps:$4 sm:$0xff]   ;;  %v7407_v12 = vld [vmem:[#allocation16 + $0x48] ss:$16 sps:$4 sm:$0xff]  }
 0x44e   :  { %2571 = vmatprep.subr.bf16.mxu0 %v7383_v19  ;;  %2612 = vmatprep.subr.bf16.mxu1 %v7385_v50  ;;  %8755 = vst [vmem:[#allocation87_spill] sm:$0xff] %v7405_v5  ;;  %8756 = vst [vmem:[#allocation88_spill] sm:$0xff] %v7407_v12  ;;  %v7411_v50 = vld [vmem:[#allocation16 + $0x64] ss:$16 sps:$4 sm:$0xff]   ;;  %v7413_v19 = vld [vmem:[#allocation16 + $0x6c] ss:$16 sps:$4 sm:$0xff]  }
 0x44f   :  { %2601 = vmatprep.mubr.bf16.mxu0 %v8638_v44  ;;  %2642 = vmatprep.mubr.bf16.mxu1 %v8638_v44  ;;  %8757 = vst [vmem:[#allocation89_spill] sm:$0xff] %v7411_v50  ;;  %8758 = vst [vmem:[#allocation90_spill] sm:$0xff] %v7413_v19 }
 0x451   :  { %2572 = vmatpush1.bf16.msra.mxu0 %v7391_v17  ;;  %2613 = vmatpush1.bf16.msra.mxu1 %v7393_v26  ;;  %v7419_v17 = vld [vmem:[#allocation16 + $0x68] ss:$16 sps:$4 sm:$0xff]   ;;  %v7423_v26 = vld [vmem:[#allocation16 + $0x84] ss:$16 sps:$4 sm:$0xff]  }
 0x452   :  { %2573 = vmatprep.subr.bf16.mxu0 %v7397_v63  ;;  %2614 = vmatprep.subr.bf16.mxu1 %v7399_v4  ;;  %8760 = vst [vmem:[#allocation92_spill] sm:$0xff] %v7419_v17  ;;  %8761 = vst [vmem:[#allocation93_spill] sm:$0xff] %v7423_v26  ;;  %v7425_v63 = vld [vmem:[#allocation16 + $0x8c] ss:$16 sps:$4 sm:$0xff]   ;;  %v7429_v4 = vld [vmem:[#allocation16 + $0x80] ss:$16 sps:$4 sm:$0xff]  }
 0x453   :  { %8762 = vst [vmem:[#allocation94_spill] sm:$0xff] %v7425_v63  ;;  %8763 = vst [vmem:[#allocation95_spill] sm:$0xff] %v7429_v4 }
 0x455   :  { %2574 = vmatpush1.bf16.msra.mxu0 %v7405_v5  ;;  %2615 = vmatpush1.bf16.msra.mxu1 %v7407_v12  ;;  %v7431_v5 = vld [vmem:[#allocation16 + $0x88] ss:$16 sps:$4 sm:$0xff]   ;;  %v7435_v12 = vld [vmem:[#allocation16 + $0xa4] ss:$16 sps:$4 sm:$0xff]  }
 0x456   :  { %2575 = vmatprep.subr.bf16.mxu0 %v7411_v50  ;;  %2616 = vmatprep.subr.bf16.mxu1 %v7413_v19  ;;  %8764 = vst [vmem:[#allocation96_spill] sm:$0xff] %v7431_v5  ;;  %8765 = vst [vmem:[#allocation97_spill] sm:$0xff] %v7435_v12  ;;  %v7437_v50 = vld [vmem:[#allocation16 + $0xac] ss:$16 sps:$4 sm:$0xff]   ;;  %v7441_v19 = vld [vmem:[#allocation16 + $0xa0] ss:$16 sps:$4 sm:$0xff]  }
 0x457   :  { %8766 = vst [vmem:[#allocation98_spill] sm:$0xff] %v7437_v50  ;;  %8767 = vst [vmem:[#allocation99_spill] sm:$0xff] %v7441_v19 }
 0x459   :  { %2576 = vmatpush1.bf16.msra.mxu0 %v7417_v48  ;;  %2617 = vmatpush1.bf16.msra.mxu1 %v7419_v17  ;;  %v7443_v48 = vld [vmem:[#allocation16 + $0xa8] ss:$16 sps:$4 sm:$0xff]   ;;  %v7447_v17 = vld [vmem:[#allocation16 + $0xc4] ss:$16 sps:$4 sm:$0xff]  }
 0x45a   :  { %2577 = vmatprep.subr.bf16.mxu0 %v7423_v26  ;;  %2618 = vmatprep.subr.bf16.mxu1 %v7425_v63  ;;  %v7449_v26 = vld [vmem:[#allocation16 + $0xcc] ss:$16 sps:$4 sm:$0xff]   ;;  %v7453_v63 = vld [vmem:[#allocation16 + $0xc0] ss:$16 sps:$4 sm:$0xff]  }
 0x45d   :  { %2578 = vmatpush1.bf16.msra.mxu0 %v7429_v4  ;;  %2619 = vmatpush1.bf16.msra.mxu1 %v7431_v5  ;;  %v7455_v4 = vld [vmem:[#allocation16 + $0xc8] ss:$16 sps:$4 sm:$0xff]   ;;  %v7459_v5 = vld [vmem:[#allocation16 + $0xe4] ss:$16 sps:$4 sm:$0xff]  }
 0x45e   :  { %2579 = vmatprep.subr.bf16.mxu0 %v7435_v12  ;;  %2620 = vmatprep.subr.bf16.mxu1 %v7437_v50  ;;  %v7461_v12 = vld [vmem:[#allocation16 + $0xec] ss:$16 sps:$4 sm:$0xff]   ;;  %v7465_v50 = vld [vmem:[#allocation16 + $0xe0] ss:$16 sps:$4 sm:$0xff]  }
 0x461   :  { %2580 = vmatpush1.bf16.msra.mxu0 %v7441_v19  ;;  %2621 = vmatpush1.bf16.msra.mxu1 %v7443_v48  ;;  %v7467_v19 = vld [vmem:[#allocation16 + $0xe8] ss:$16 sps:$4 sm:$0xff]  }
 0x462   :  { %2581 = vmatprep.subr.bf16.mxu0 %v7447_v17  ;;  %2622 = vmatprep.subr.bf16.mxu1 %v7449_v26 }
 0x465   :  { %2582 = vmatpush1.bf16.msra.mxu0 %v7453_v63  ;;  %2623 = vmatpush1.bf16.msra.mxu1 %v7455_v4 }
 0x466   :  { %2583 = vmatprep.subr.bf16.mxu0 %v7459_v5  ;;  %2624 = vmatprep.subr.bf16.mxu1 %v7461_v12 }
 0x469   :  { %2584 = vmatpush1.bf16.msra.mxu0 %v7465_v50  ;;  %2625 = vmatpush1.bf16.msra.mxu1 %v7467_v19 }
 0x46a   :  { %2739 = vmatprep.subr.bf16.mxu0 %v7154_v42  ;;  %2780 = vmatprep.subr.bf16.mxu1 %v7156_v13  ;;  %v8768_v42 = vld [vmem:[#allocation62_spill] sm:$0xff] }
 0x46c   :  { %2602 = vmatmul.mubr.bf16.vlgmr.msra.gmra.mrb[36].mxu0 %v7373_v10  ;;  %2643 = vmatmul.mubr.bf16.vlgmr.msra.gmra.mrb[68].mxu1 %v7373_v10 }
 0x46d   :  { %2740 = vmatpush1.bf16.msra.mxu0 %v7160_v36  ;;  %2781 = vmatpush1.bf16.msra.mxu1 %v7162_v7 }
 0x46e   :  { %2741 = vmatprep.subr.bf16.mxu0 %v7166_v34  ;;  %2782 = vmatprep.subr.bf16.mxu1 %v7168_v15 }
 0x46f   :  { %2771 = vmatprep.mubr.bf16.mxu0 %v8638_v44  ;;  %2812 = vmatprep.mubr.bf16.mxu1 %v8638_v44 }
 0x471   :  { %2742 = vmatpush1.bf16.msra.mxu0 %v7172_v60  ;;  %2783 = vmatpush1.bf16.msra.mxu1 %v7174_v52 }
 0x472   :  { %2743 = vmatprep.subr.bf16.mxu0 %v7178_v25  ;;  %2784 = vmatprep.subr.bf16.mxu1 %v7180_v61  ;;  %v2328_v61 = vld [vmem:[%s8442_s6] sm:$0xf] }
 0x475   :  { %2744 = vmatpush1.bf16.msra.mxu0 %v7184_v62  ;;  %2785 = vmatpush1.bf16.msra.mxu1 %v7186_v22  ;;  %v8769_v62 = vld [vmem:[#allocation35_spill] sm:$0xff] }
 0x476   :  { %2745 = vmatprep.subr.bf16.mxu0 %v7190_v1  ;;  %2786 = vmatprep.subr.bf16.mxu1 %v7192_v24  ;;  %v2333_v22 = vrot.slane %v2328_v61, %v8769_v62 }
 0x479   :  { %2746 = vmatpush1.bf16.msra.mxu0 %v7196_v40  ;;  %2787 = vmatpush1.bf16.msra.mxu1 %v7198_v28  ;;  %v8770_v40 = vld [vmem:[#allocation36_spill] sm:$0xff] }
 0x47a   :  { %2747 = vmatprep.subr.bf16.mxu0 %v7202_v32  ;;  %2788 = vmatprep.subr.bf16.mxu1 %v7204_v35  ;;  %v2337_v28 = vrot.slane %v2328_v61, %v8770_v40 }
 0x47d   :  { %2748 = vmatpush1.bf16.msra.mxu0 %v7208_v39  ;;  %2789 = vmatpush1.bf16.msra.mxu1 %v7210_v43 }
 0x47e   :  { %2749 = vmatprep.subr.bf16.mxu0 %v7214_v0  ;;  %2790 = vmatprep.subr.bf16.mxu1 %v7216_v37 }
 0x481   :  { %2750 = vmatpush1.bf16.msra.mxu0 %v7218_v56  ;;  %2791 = vmatpush1.bf16.msra.mxu1 %v7222_v41 }
 0x482   :  { %2751 = vmatprep.subr.bf16.mxu0 %v7226_v54  ;;  %2792 = vmatprep.subr.bf16.mxu1 %v7228_v29  ;;  %v2345_v29 = vrot.slane %v2328_v61, %v6686_v58 }
 0x485   :  { %2752 = vmatpush1.bf16.msra.mxu0 %v7232_v47  ;;  %2793 = vmatpush1.bf16.msra.mxu1 %v7234_v33 }
 0x486   :  { %2753 = vmatprep.subr.bf16.mxu0 %v7238_v49  ;;  %2794 = vmatprep.subr.bf16.mxu1 %v7240_v31 }
 0x489   :  { %2754 = vmatpush1.bf16.msra.mxu0 %v7244_v27  ;;  %2795 = vmatpush1.bf16.msra.mxu1 %v7246_v51 }
 0x48a   :  { %2821 = vmatprep.subr.bf16.mxu0 %v7250_v2  ;;  %2862 = vmatprep.subr.bf16.mxu1 %v8768_v42  ;;  %v2341_v2 = vrot.slane %v2328_v61, %v6684_v57 }
 0x4ff   :  { %v2198_v13 = vpop.f32.mrb[28].mxu0  ;;  %v2239_v36 = vpop.f32.mrb[60].mxu1 }
 0x500   :  { %v2200_v7 = vpop.f32.mrb[29].mxu0  ;;  %v2241_v34 = vpop.f32.mrb[61].mxu1 }
 0x501   :  { %v2202_v15 = vpop.f32.mrb[30].mxu0  ;;  %v2243_v60 = vpop.f32.mrb[62].mxu1 }
 0x502   :  { %v2203_v52 = vpop.f32.mrb[31].mxu0  ;;  %v2244_v25 = vpop.f32.mrb[63].mxu1 }
 0x51f   :  { %v2280_v1 = vpop.f32.mrb[32].mxu0  ;;  %v2321_v24 = vpop.f32.mrb[64].mxu1 }
 0x520   :  { %v2281_v32 = vadd.f32 %v2280_v1, %v2198_v13  ;;  %v2322_v35 = vadd.f32 %v2321_v24, %v2239_v36  ;;  %v2282_v39 = vpop.f32.mrb[33].mxu0  ;;  %v2323_v43 = vpop.f32.mrb[65].mxu1 }
 0x521   :  { %v2283_v0 = vadd.f32 %v2282_v39, %v2200_v7  ;;  %v2324_v37 = vadd.f32 %v2323_v43, %v2241_v34  ;;  %v2284_v56 = vpop.f32.mrb[34].mxu0  ;;  %v2325_v41 = vpop.f32.mrb[66].mxu1 }
 0x522   :  { %v2350_v54 = vadd.f32 %v2333_v22, %v2281_v32  ;;  %v2285_v47 = vpop.f32.mrb[35].mxu0  ;;  %v2326_v33 = vpop.f32.mrb[67].mxu1  ;;  %v2352_v10 = vadd.f32 %v2341_v2, %v2322_v35  ;;  %v8771_v35 = vld [vmem:[#allocation39_spill] sm:$0xff] }
 0x523   :  { %v2351_v49 = vadd.f32 %v2337_v28, %v2283_v0  ;;  %v2353_v51 = vadd.f32 %v2345_v29, %v2324_v37  ;;  %v8772_v37 = vld [vmem:[#allocation40_spill] sm:$0xff] }
 0x524   :  { %v2354_v31 = vmul.f32 0.5, %v2350_v54  ;;  %v2356_v42 = vmul.f32 0.5, %v2352_v10 }
 0x525   :  { %v2355_v27 = vmul.f32 0.5, %v2351_v49 }
 0x526   :  { %6123 = vtanh.f32 %v2354_v31  ;;  %v8773_v31 = vld [vmem:[#allocation52_spill] sm:$0xff] }
 0x527   :  { %6125 = vtanh.f32 %v2355_v27 }
 0x528   :  { %6127 = vtanh.f32 %v2353_v51 }
 0x529   :  { %6129 = vtanh.f32 %v2356_v42  ;;  %v8775_v42 = vld [vmem:[#allocation51_spill] sm:$0xff] }
 0x530   :  { %v6124_v13 = vpop.eup %6123 }
 0x531   :  { %v2360_v36 = vmul.f32 0.5, %v6124_v13  ;;  %v6126_v7 = vpop.eup %6125 }
 0x532   :  { %v2361_v15 = vmul.f32 0.5, %v6126_v7  ;;  %v6128_v60 = vpop.eup %6127 }
 0x533   :  { %v2363_v34 = vadd.f32 0.5, %v2360_v36  ;;  %v6130_v61 = vpop.eup %6129 }
 0x534   :  { %v2364_v52 = vadd.f32 0.5, %v2361_v15  ;;  %v2362_v32 = vmul.f32 0.5, %v6130_v61  ;;  %v8785_v61 = vld [vmem:[#allocation72_spill] sm:$0xff] }
 0x535   :  { %v2368_v25 = vmul.f32 %v6128_v60, %v2363_v34 }
 0x536   :  { %v2367_v22 = vmul.f32 %v2364_v52, %v7264_v9  ;;  %v2365_v49 = vadd.f32 0.5, %v2362_v32  ;;  %v8778_v52 = vld [vmem:[#allocation61_spill] sm:$0xff] }
 0x538   :  { %v7519_v1 = vadd.f32 %v2368_v25, %v2367_v22  ;;  %v8783_v22 = vld [vmem:[#allocation70_spill] sm:$0xff] }
 0x53a   :  { %6131 = vtanh.f32 %v7519_v1 }
 0x53f   :  { %v2603_v24 = vpop.f32.mrb[36].mxu0  ;;  %v2644_v28 = vpop.f32.mrb[68].mxu1 }
 0x540   :  { %v2651_v39 = vadd.f32 %v2603_v24, %v8771_v35  ;;  %v2605_v43 = vpop.f32.mrb[37].mxu0  ;;  %v2646_v0 = vpop.f32.mrb[69].mxu1  ;;  %v2653_v13 = vadd.f32 %v2644_v28, %v8775_v42  ;;  %v8786_v24 = vld [vmem:[#allocation73_spill] sm:$0xff]  ;;  %v8787_v35 = vld [vmem:[#allocation74_spill] sm:$0xff]  ;;  %v8805_v42 = vld [vmem:[#allocation92_spill] sm:$0xff] }
 0x541   :  { %v2652_v56 = vadd.f32 %v2605_v43, %v8772_v37  ;;  %v2607_v41 = vpop.f32.mrb[38].mxu0  ;;  %v2648_v54 = vpop.f32.mrb[70].mxu1  ;;  %v2654_v27 = vadd.f32 %v2646_v0, %v8773_v31  ;;  %v8789_v37 = vld [vmem:[#allocation76_spill] sm:$0xff] }
 0x542   :  { %v2655_v29 = vmul.f32 0.5, %v2651_v39  ;;  %v2608_v47 = vpop.f32.mrb[39].mxu0  ;;  %v2649_v33 = vpop.f32.mrb[71].mxu1  ;;  %v2657_v36 = vmul.f32 0.5, %v2653_v13  ;;  %v8788_v39 = vld [vmem:[#allocation75_spill] sm:$0xff]  ;;  %v8791_v41 = vld [vmem:[#allocation78_spill] sm:$0xff] }
 0x543   :  { %v2656_v9 = vmul.f32 0.5, %v2652_v56  ;;  %v8790_v56 = vld [vmem:[#allocation77_spill] sm:$0xff]  ;;  %v8792_v54 = vld [vmem:[#allocation79_spill] sm:$0xff]  ;;  %v8797_v47 = vld [vmem:[#allocation84_spill] sm:$0xff] }
 0x544   :  { %6133 = vtanh.f32 %v2655_v29  ;;  %v6132_v51 = vpop.eup %6131  ;;  %v8794_v29 = vld [vmem:[#allocation81_spill] sm:$0xff]  ;;  %v8801_v31 = vld [vmem:[#allocation88_spill] sm:$0xff] }
 0x545   :  { %6135 = vtanh.f32 %v2656_v9  ;;  %v7525_v2 = vmul.f32 %v6132_v51, %v2365_v49  ;;  %v8798_v33 = vld [vmem:[#allocation85_spill] sm:$0xff]  ;;  %v8799_v9 = vld [vmem:[#allocation86_spill] sm:$0xff]  ;;  %v8800_v49 = vld [vmem:[#allocation87_spill] sm:$0xff] }
 0x546   :  { %6137 = vtanh.f32 %v2654_v27  ;;  %v8802_v27 = vld [vmem:[#allocation89_spill] sm:$0xff]  ;;  %v8803_v51 = vld [vmem:[#allocation90_spill] sm:$0xff] }
 0x547   :  { %8774 = vst [vmem:[#allocation100_spill] sm:$0xff] %v7525_v2  ;;  %v2706_v10 = vpack.c.bf16 %v7525_v2, %v7525_v2  ;;  %6139 = vtanh.f32 %v2657_v36  ;;  %v8806_v13 = vld [vmem:[#allocation93_spill] sm:$0xff]  ;;  %v8807_v36 = vld [vmem:[#allocation94_spill] sm:$0xff] }
 0x549   :  { %2772 = vmatmul.mubr.bf16.vlgmr.msra.gmra.mrb[40].mxu0 %v2706_v10  ;;  %2813 = vmatmul.mubr.bf16.vlgmr.msra.gmra.mrb[72].mxu1 %v2706_v10  ;;  %v8804_v10 = vld [vmem:[#allocation91_spill] sm:$0xff] }
 0x54a   :  { %2822 = vmatpush1.bf16.msra.mxu0 %v7274_v21  ;;  %2863 = vmatpush1.bf16.msra.mxu1 %v7276_v23 }
 0x54b   :  { %2823 = vmatprep.subr.bf16.mxu0 %v7279_v6  ;;  %2864 = vmatprep.subr.bf16.mxu1 %v7281_v14 }
 0x54c   :  { %2853 = vmatprep.mubr.bf16.mxu0 %v8638_v44  ;;  %2894 = vmatprep.mubr.bf16.mxu1 %v8638_v44 }
 0x54e   :  { %v6134_v7 = vpop.eup %6133  ;;  %2824 = vmatpush1.bf16.msra.mxu0 %v7287_v16  ;;  %2865 = vmatpush1.bf16.msra.mxu1 %v7289_v3 }
 0x54f   :  { %v2661_v34 = vmul.f32 0.5, %v6134_v7  ;;  %v6136_v15 = vpop.eup %6135  ;;  %2825 = vmatprep.subr.bf16.mxu0 %v7291_v53  ;;  %2866 = vmatprep.subr.bf16.mxu1 %v7293_v18  ;;  %v8776_v53 = vld [vmem:[#allocation64_spill] sm:$0xff]  ;;  %v8777_v18 = vld [vmem:[#allocation65_spill] sm:$0xff]  ;;  %v8808_v7 = vld [vmem:[#allocation95_spill] sm:$0xff] }
 0x550   :  { %v2662_v23 = vmul.f32 0.5, %v6136_v15  ;;  %v6138_v6 = vpop.eup %6137  ;;  %v8810_v15 = vld [vmem:[#allocation97_spill] sm:$0xff] }
 0x551   :  { %v2664_v21 = vadd.f32 0.5, %v2661_v34  ;;  %v8809_v34 = vld [vmem:[#allocation96_spill] sm:$0xff] }
 0x552   :  { %v2665_v14 = vadd.f32 0.5, %v2662_v23  ;;  %2826 = vmatpush1.bf16.msra.mxu0 %v7301_v38  ;;  %2867 = vmatpush1.bf16.msra.mxu1 %v7303_v30  ;;  %v6140_v38 = vpop.eup %6139  ;;  %v8779_v30 = vld [vmem:[#allocation66_spill] sm:$0xff]  ;;  %v8812_v23 = vld [vmem:[#allocation99_spill] sm:$0xff] }
 0x553   :  { %v2669_v60 = vmul.f32 %v6138_v6, %v2664_v21  ;;  %2827 = vmatprep.subr.bf16.mxu0 %v7305_v55  ;;  %2868 = vmatprep.subr.bf16.mxu1 %v7307_v45  ;;  %v8780_v55 = vld [vmem:[#allocation67_spill] sm:$0xff]  ;;  %v8781_v45 = vld [vmem:[#allocation68_spill] sm:$0xff]  ;;  %v2663_v25 = vmul.f32 0.5, %v6140_v38  ;;  %v8811_v21 = vld [vmem:[#allocation98_spill] sm:$0xff] }
 0x554   :  { %v2668_v16 = vmul.f32 %v2665_v14, %v7322_v20  ;;  %v8782_v20 = vld [vmem:[#allocation69_spill] sm:$0xff]  ;;  %v7628_v6 = vld [vmem:[#allocation5 + $0x58] sm:$0xff]  ;;  %v7632_v14 = vld [vmem:[#allocation5 + $0x40] sm:$0xff] }
 0x555   :  { %v2666_v28 = vadd.f32 0.5, %v2663_v25  ;;  %v7650_v38 = vld [vmem:[#allocation5 + $0x88] sm:$0xff]  ;;  %v7664_v25 = vld [vmem:[#allocation5 + $0xb8] sm:$0xff] }
 0x556   :  { %v7545_v3 = vadd.f32 %v2669_v60, %v2668_v16  ;;  %2828 = vmatpush1.bf16.msra.mxu0 %v7313_v11  ;;  %2869 = vmatpush1.bf16.msra.mxu1 %v8776_v53  ;;  %v8784_v11 = vld [vmem:[#allocation71_spill] sm:$0xff]  ;;  %v7634_v60 = vld [vmem:[#allocation5 + $0x50] sm:$0xff]  ;;  %v7638_v16 = vld [vmem:[#allocation5 + $0x68] sm:$0xff] }
 0x557   :  { %2829 = vmatprep.subr.bf16.mxu0 %v8777_v18  ;;  %2870 = vmatprep.subr.bf16.mxu1 %v8778_v52  ;;  %v7640_v53 = vld [vmem:[#allocation5 + $0x78] sm:$0xff]  ;;  %v7644_v18 = vld [vmem:[#allocation5 + $0x60] sm:$0xff]  ;;  %v7646_v52 = vld [vmem:[#allocation5 + $0x70] sm:$0xff] }
 0x558   :  { %6141 = vtanh.f32 %v7545_v3 }
 0x55a   :  { %2830 = vmatpush1.bf16.msra.mxu0 %v8779_v30  ;;  %2871 = vmatpush1.bf16.msra.mxu1 %v8780_v55  ;;  %v7652_v30 = vld [vmem:[#allocation5 + $0x98] sm:$0xff]  ;;  %v7656_v55 = vld [vmem:[#allocation5 + $0x80] sm:$0xff] }
 0x55b   :  { %2831 = vmatprep.subr.bf16.mxu0 %v8781_v45  ;;  %2872 = vmatprep.subr.bf16.mxu1 %v8782_v20  ;;  %v7658_v45 = vld [vmem:[#allocation5 + $0x90] sm:$0xff]  ;;  %v7662_v20 = vld [vmem:[#allocation5 + $0xa8] sm:$0xff] }
 0x55e   :  { %2832 = vmatpush1.bf16.msra.mxu0 %v8783_v22  ;;  %2873 = vmatpush1.bf16.msra.mxu1 %v8784_v11  ;;  %v7666_v22 = vld [vmem:[#allocation5 + $0xa0] sm:$0xff]  ;;  %v7670_v11 = vld [vmem:[#allocation5 + $0xb0] sm:$0xff] }
 0x55f   :  { %2833 = vmatprep.subr.bf16.mxu0 %v8785_v61  ;;  %2874 = vmatprep.subr.bf16.mxu1 %v8786_v24  ;;  %v7674_v61 = vld [vmem:[#allocation5 + $0xc8] sm:$0xff]  ;;  %v7676_v24 = vld [vmem:[#allocation5 + $0xd8] sm:$0xff] }
 0x562   :  { %v6142_v32 = vpop.eup %6141  ;;  %2834 = vmatpush1.bf16.msra.mxu0 %v7353_v46  ;;  %2875 = vmatpush1.bf16.msra.mxu1 %v8787_v35  ;;  %v8793_v46 = vld [vmem:[#allocation80_spill] sm:$0xff] }
 0x563   :  { %2835 = vmatprep.subr.bf16.mxu0 %v7357_v59  ;;  %2876 = vmatprep.subr.bf16.mxu1 %v8788_v39  ;;  %v2672_v43 = vmul.f32 %v6142_v32, %v2666_v28  ;;  %v8795_v59 = vld [vmem:[#allocation82_spill] sm:$0xff]  ;;  %v7680_v28 = vld [vmem:[#allocation5 + $0xc0] sm:$0xff]  ;;  %v7682_v32 = vld [vmem:[#allocation5 + $0xd0] sm:$0xff] }
 0x564   :  { %v7686_v35 = vld [vmem:[#allocation5 + $0xe8] sm:$0xff]  ;;  %v7688_v39 = vld [vmem:[#allocation5 + $0xf8] sm:$0xff] }
 0x565   :  { %v2673_v0 = vpack.c.bf16 %v2672_v43, %v2672_v43  ;;  %v7692_v43 = vld [vmem:[#allocation5 + $0xe0] sm:$0xff] }
 0x566   :  { %2836 = vmatpush1.bf16.msra.mxu0 %v7363_v8  ;;  %2877 = vmatpush1.bf16.msra.mxu1 %v8789_v37  ;;  %v8796_v8 = vld [vmem:[#allocation83_spill] sm:$0xff]  ;;  %v7698_v37 = vld [vmem:[#allocation4 + $0x8] sm:$0xff] }
 0x567   :  { %3144 = vmatprep.subr.bf16.mxu0 %v8790_v56  ;;  %3185 = vmatprep.subr.bf16.mxu1 %v8791_v41  ;;  %v7700_v56 = vld [vmem:[#allocation4 + $0x18] sm:$0xff] }
 0x568   :  { %8813 = vst [vmem:[#allocation101_spill] sm:$0xff] %v7700_v56 }
 0x569   :  { %2854 = vmatmul.mubr.bf16.vlgmr.msra.gmra.mrb[44].mxu0 %v2673_v0  ;;  %2895 = vmatmul.mubr.bf16.vlgmr.msra.gmra.mrb[76].mxu1 %v2673_v0 }
 0x56a   :  { %3145 = vmatpush1.bf16.msra.mxu0 %v8792_v54  ;;  %3186 = vmatpush1.bf16.msra.mxu1 %v8793_v46 }
 0x56b   :  { %3146 = vmatprep.subr.bf16.mxu0 %v8794_v29  ;;  %3187 = vmatprep.subr.bf16.mxu1 %v8795_v59 }
 0x56c   :  { %3176 = vmatprep.mubr.bf16.mxu0 %v8638_v44  ;;  %3217 = vmatprep.mubr.bf16.mxu1 %v8638_v44 }
 0x56e   :  { %3147 = vmatpush1.bf16.msra.mxu0 %v8796_v8  ;;  %3188 = vmatpush1.bf16.msra.mxu1 %v8797_v47 }
 0x56f   :  { %3148 = vmatprep.subr.bf16.mxu0 %v8798_v33  ;;  %3189 = vmatprep.subr.bf16.mxu1 %v8799_v9  ;;  %v2903_v9 = vld [vmem:[%s8442_s6] sm:$0xf] }
 0x572   :  { %3149 = vmatpush1.bf16.msra.mxu0 %v8800_v49  ;;  %3190 = vmatpush1.bf16.msra.mxu1 %v8801_v31  ;;  %v2908_v49 = vrot.slane %v2903_v9, %v8769_v62 }
 0x573   :  { %3150 = vmatprep.subr.bf16.mxu0 %v8802_v27  ;;  %3191 = vmatprep.subr.bf16.mxu1 %v8803_v51  ;;  %v2912_v51 = vrot.slane %v2903_v9, %v8770_v40  ;;  %v2916_v40 = vrot.slane %v2903_v9, %v6684_v57 }
 0x576   :  { %3151 = vmatpush1.bf16.msra.mxu0 %v8804_v10  ;;  %3192 = vmatpush1.bf16.msra.mxu1 %v8805_v42 }
 0x577   :  { %3152 = vmatprep.subr.bf16.mxu0 %v8806_v13  ;;  %3193 = vmatprep.subr.bf16.mxu1 %v8807_v36 }
 0x57a   :  { %3153 = vmatpush1.bf16.msra.mxu0 %v8808_v7  ;;  %3194 = vmatpush1.bf16.msra.mxu1 %v8809_v34 }
 0x57b   :  { %3154 = vmatprep.subr.bf16.mxu0 %v8810_v15  ;;  %3195 = vmatprep.subr.bf16.mxu1 %v8811_v21 }
 0x57e   :  { %3155 = vmatpush1.bf16.msra.mxu0 %v8812_v23  ;;  %3196 = vmatpush1.bf16.msra.mxu1 %v7443_v48  ;;  %v7602_v48 = vld [vmem:[#allocation5 + $0x8] sm:$0xff] }
 0x57f   :  { %3156 = vmatprep.subr.bf16.mxu0 %v7447_v17  ;;  %3197 = vmatprep.subr.bf16.mxu1 %v7449_v26  ;;  %v7604_v17 = vld [vmem:[#allocation5 + $0x18] sm:$0xff]  ;;  %v7626_v26 = vld [vmem:[#allocation5 + $0x48] sm:$0xff] }
 0x582   :  { %3157 = vmatpush1.bf16.msra.mxu0 %v7453_v63  ;;  %3198 = vmatpush1.bf16.msra.mxu1 %v7455_v4  ;;  %v7610_v63 = vld [vmem:[#allocation5 + $0x10] sm:$0xff]  ;;  %v7616_v4 = vld [vmem:[#allocation5 + $0x38] sm:$0xff] }
 0x583   :  { %3158 = vmatprep.subr.bf16.mxu0 %v7459_v5  ;;  %3199 = vmatprep.subr.bf16.mxu1 %v7461_v12  ;;  %v7608_v5 = vld [vmem:[#allocation5] sm:$0xff] }
 0x584   :  { %v7620_v12 = vld [vmem:[#allocation5 + $0x20] sm:$0xff] }
 0x586   :  { %3159 = vmatpush1.bf16.msra.mxu0 %v7465_v50  ;;  %3200 = vmatpush1.bf16.msra.mxu1 %v7467_v19  ;;  %v7614_v19 = vld [vmem:[#allocation5 + $0x28] sm:$0xff]  ;;  %v7622_v50 = vld [vmem:[#allocation5 + $0x30] sm:$0xff] }
 0x587   :  { %3314 = vmatprep.subr.bf16.mxu0 %v7602_v48  ;;  %3355 = vmatprep.subr.bf16.mxu1 %v7604_v17 }
 0x589   :  { %3177 = vmatmul.mubr.bf16.vlgmr.msra.gmra.mrb[48].mxu0 %v2673_v0  ;;  %3218 = vmatmul.mubr.bf16.vlgmr.msra.gmra.mrb[80].mxu1 %v2673_v0  ;;  %v7694_v0 = vld [vmem:[#allocation5 + $0xf0] sm:$0xff] }
 0x58a   :  { %3346 = vmatprep.mubr.bf16.mxu0 %v8638_v44  ;;  %3387 = vmatprep.mubr.bf16.mxu1 %v8638_v44 }
 0x58b   :  { %3315 = vmatpush1.bf16.msra.mxu0 %v7608_v5  ;;  %3356 = vmatpush1.bf16.msra.mxu1 %v7610_v63 }
 0x58c   :  { %3316 = vmatprep.subr.bf16.mxu0 %v7614_v19  ;;  %3357 = vmatprep.subr.bf16.mxu1 %v7616_v4 }
 0x58f   :  { %3317 = vmatpush1.bf16.msra.mxu0 %v7620_v12  ;;  %3358 = vmatpush1.bf16.msra.mxu1 %v7622_v50 }
 0x590   :  { %3318 = vmatprep.subr.bf16.mxu0 %v7626_v26  ;;  %3359 = vmatprep.subr.bf16.mxu1 %v7628_v6 }
 0x593   :  { %3319 = vmatpush1.bf16.msra.mxu0 %v7632_v14  ;;  %3360 = vmatpush1.bf16.msra.mxu1 %v7634_v60 }
 0x594   :  { %3320 = vmatprep.subr.bf16.mxu0 %v7638_v16  ;;  %3361 = vmatprep.subr.bf16.mxu1 %v7640_v53 }
 0x597   :  { %3321 = vmatpush1.bf16.msra.mxu0 %v7644_v18  ;;  %3362 = vmatpush1.bf16.msra.mxu1 %v7646_v52 }
 0x598   :  { %3322 = vmatprep.subr.bf16.mxu0 %v7650_v38  ;;  %3363 = vmatprep.subr.bf16.mxu1 %v7652_v30 }
 0x59b   :  { %3323 = vmatpush1.bf16.msra.mxu0 %v7656_v55  ;;  %3364 = vmatpush1.bf16.msra.mxu1 %v7658_v45 }
 0x59c   :  { %3324 = vmatprep.subr.bf16.mxu0 %v7662_v20  ;;  %3365 = vmatprep.subr.bf16.mxu1 %v7664_v25 }
 0x59f   :  { %3325 = vmatpush1.bf16.msra.mxu0 %v7666_v22  ;;  %3366 = vmatpush1.bf16.msra.mxu1 %v7670_v11 }
 0x5a0   :  { %3326 = vmatprep.subr.bf16.mxu0 %v7674_v61  ;;  %3367 = vmatprep.subr.bf16.mxu1 %v7676_v24 }
 0x5a3   :  { %3327 = vmatpush1.bf16.msra.mxu0 %v7680_v28  ;;  %3368 = vmatpush1.bf16.msra.mxu1 %v7682_v32 }
 0x5a4   :  { %3328 = vmatprep.subr.bf16.mxu0 %v7686_v35  ;;  %3369 = vmatprep.subr.bf16.mxu1 %v7688_v39 }
 0x5a7   :  { %3329 = vmatpush1.bf16.msra.mxu0 %v7692_v43  ;;  %3370 = vmatpush1.bf16.msra.mxu1 %v7694_v0 }
 0x5a8   :  { %3396 = vmatprep.subr.bf16.mxu0 %v7698_v37  ;;  %3437 = vmatprep.subr.bf16.mxu1 %v7700_v56 }
 0x61c   :  { %v2773_v41 = vpop.f32.mrb[40].mxu0  ;;  %v2814_v54 = vpop.f32.mrb[72].mxu1 }
 0x61d   :  { %v2775_v46 = vpop.f32.mrb[41].mxu0  ;;  %v2816_v29 = vpop.f32.mrb[73].mxu1 }
 0x61e   :  { %v2777_v59 = vpop.f32.mrb[42].mxu0  ;;  %v2818_v8 = vpop.f32.mrb[74].mxu1 }
 0x61f   :  { %v2778_v47 = vpop.f32.mrb[43].mxu0  ;;  %v2819_v33 = vpop.f32.mrb[75].mxu1  ;;  %v2920_v59 = vrot.slane %v2903_v9, %v6686_v58  ;;  %v8814_v9 = vld [vmem:[#allocation41_spill] sm:$0xff] }
 0x63c   :  { %v2855_v31 = vpop.f32.mrb[44].mxu0  ;;  %v2896_v27 = vpop.f32.mrb[76].mxu1 }
 0x63d   :  { %v2856_v10 = vadd.f32 %v2855_v31, %v2773_v41  ;;  %v2897_v42 = vadd.f32 %v2896_v27, %v2814_v54  ;;  %v2857_v13 = vpop.f32.mrb[45].mxu0  ;;  %v2898_v36 = vpop.f32.mrb[77].mxu1 }
 0x63e   :  { %v2858_v7 = vadd.f32 %v2857_v13, %v2775_v46  ;;  %v2899_v34 = vadd.f32 %v2898_v36, %v2816_v29  ;;  %v2859_v15 = vpop.f32.mrb[46].mxu0  ;;  %v2900_v21 = vpop.f32.mrb[78].mxu1 }
 0x63f   :  { %v2925_v23 = vadd.f32 %v2908_v49, %v2856_v10  ;;  %v2860_v8 = vpop.f32.mrb[47].mxu0  ;;  %v2901_v47 = vpop.f32.mrb[79].mxu1  ;;  %v2927_v41 = vadd.f32 %v2916_v40, %v2897_v42  ;;  %v8815_v21 = vld [vmem:[#allocation42_spill] sm:$0xff] }
 0x640   :  { %v2926_v33 = vadd.f32 %v2912_v51, %v2858_v7  ;;  %v2928_v56 = vadd.f32 %v2920_v59, %v2899_v34 }
 0x641   :  { %v2929_v2 = vmul.f32 0.5, %v2925_v23  ;;  %v2931_v54 = vmul.f32 0.5, %v2927_v41 }
 0x642   :  { %v2930_v62 = vmul.f32 0.5, %v2926_v33 }
 0x643   :  { %6143 = vtanh.f32 %v2929_v2 }
 0x644   :  { %6145 = vtanh.f32 %v2930_v62 }
 0x645   :  { %6147 = vtanh.f32 %v2928_v56 }
 0x646   :  { %6149 = vtanh.f32 %v2931_v54 }
 0x64d   :  { %v6144_v46 = vpop.eup %6143 }
 0x64e   :  { %v2935_v29 = vmul.f32 0.5, %v6144_v46  ;;  %v6146_v31 = vpop.eup %6145  ;;  %v8816_v46 = vld [vmem:[#allocation54_spill] sm:$0xff] }
 0x64f   :  { %v2936_v49 = vmul.f32 0.5, %v6146_v31  ;;  %v6148_v10 = vpop.eup %6147 }
 0x650   :  { %v2938_v27 = vadd.f32 0.5, %v2935_v29  ;;  %v6150_v2 = vpop.eup %6149 }
 0x651   :  { %v2939_v13 = vadd.f32 0.5, %v2936_v49  ;;  %v2937_v40 = vmul.f32 0.5, %v6150_v2  ;;  %v7727_v2 = vld [vmem:[#allocation4 + $0x28] sm:$0xff] }
 0x652   :  { %v2943_v36 = vmul.f32 %v6148_v10, %v2938_v27  ;;  %v7722_v10 = vld [vmem:[#allocation4] sm:$0xff] }
 0x653   :  { %v2942_v51 = vmul.f32 %v2939_v13, %v7519_v1  ;;  %v2940_v54 = vadd.f32 0.5, %v2937_v40  ;;  %v7724_v13 = vld [vmem:[#allocation4 + $0x10] sm:$0xff]  ;;  %v7735_v40 = vld [vmem:[#allocation4 + $0x20] sm:$0xff] }
 0x655   :  { %v7712_v7 = vadd.f32 %v2943_v36, %v2942_v51  ;;  %v8818_v36 = vld [vmem:[#allocation53_spill] sm:$0xff] }
 0x657   :  { %6151 = vtanh.f32 %v7712_v7 }
 0x65c   :  { %v3178_v62 = vpop.f32.mrb[48].mxu0  ;;  %v3219_v56 = vpop.f32.mrb[80].mxu1 }
 0x65d   :  { %v3226_v42 = vadd.f32 %v3178_v62, %v8814_v9  ;;  %v3180_v34 = vpop.f32.mrb[49].mxu0  ;;  %v3221_v15 = vpop.f32.mrb[81].mxu1  ;;  %v3228_v51 = vadd.f32 %v3219_v56, %v8818_v36  ;;  %v7729_v62 = vld [vmem:[#allocation4 + $0x38] sm:$0xff]  ;;  %v7737_v9 = vld [vmem:[#allocation4 + $0x30] sm:$0xff]  ;;  %v7739_v56 = vld [vmem:[#allocation4 + $0x48] sm:$0xff] }
 0x65e   :  { %v3227_v23 = vadd.f32 %v3180_v34, %v8815_v21  ;;  %v3182_v59 = vpop.f32.mrb[50].mxu0  ;;  %v3223_v8 = vpop.f32.mrb[82].mxu1  ;;  %v3229_v29 = vadd.f32 %v3221_v15, %v8816_v46  ;;  %v7741_v34 = vld [vmem:[#allocation4 + $0x58] sm:$0xff] }
 0x65f   :  { %v3230_v47 = vmul.f32 0.5, %v3226_v42  ;;  %v3183_v33 = vpop.f32.mrb[51].mxu0  ;;  %v3224_v41 = vpop.f32.mrb[83].mxu1  ;;  %v3232_v42 = vmul.f32 0.5, %v3228_v51  ;;  %v7749_v59 = vld [vmem:[#allocation4 + $0x40] sm:$0xff]  ;;  %v7751_v8 = vld [vmem:[#allocation4 + $0x50] sm:$0xff] }
 0x660   :  { %v3231_v1 = vmul.f32 0.5, %v3227_v23  ;;  %v7753_v41 = vld [vmem:[#allocation4 + $0x68] sm:$0xff] }
 0x661   :  { %6153 = vtanh.f32 %v3230_v47  ;;  %v6152_v31 = vpop.eup %6151  ;;  %v7766_v51 = vld [vmem:[#allocation4 + $0x88] sm:$0xff] }
 0x662   :  { %6155 = vtanh.f32 %v3231_v1  ;;  %v7718_v27 = vmul.f32 %v6152_v31, %v2940_v54  ;;  %v7755_v1 = vld [vmem:[#allocation4 + $0x78] sm:$0xff]  ;;  %v7761_v31 = vld [vmem:[#allocation4 + $0x60] sm:$0xff]  ;;  %8820 = vst [vmem:[#allocation104_spill] sm:$0xff] %v7766_v51 }
 0x663   :  { %6157 = vtanh.f32 %v3229_v29 }
 0x664   :  { %8817 = vst [vmem:[#allocation102_spill] sm:$0xff] %v7718_v27  ;;  %v3281_v49 = vpack.c.bf16 %v7718_v27, %v7718_v27  ;;  %6159 = vtanh.f32 %v3232_v42  ;;  %v7768_v42 = vld [vmem:[#allocation4 + $0x98] sm:$0xff] }
 0x665   :  { %8821 = vst [vmem:[#allocation37_spill] sm:$0xff] %v7768_v42 }
 0x666   :  { %3347 = vmatmul.mubr.bf16.vlgmr.msra.gmra.mrb[52].mxu0 %v3281_v49  ;;  %3388 = vmatmul.mubr.bf16.vlgmr.msra.gmra.mrb[84].mxu1 %v3281_v49  ;;  %v7763_v49 = vld [vmem:[#allocation4 + $0x70] sm:$0xff] }
 0x667   :  { %3397 = vmatpush1.bf16.msra.mxu0 %v7722_v10  ;;  %3438 = vmatpush1.bf16.msra.mxu1 %v7724_v13  ;;  %8819 = vst [vmem:[#allocation103_spill] sm:$0xff] %v7763_v49 }
 0x668   :  { %3398 = vmatprep.subr.bf16.mxu0 %v7727_v2  ;;  %3439 = vmatprep.subr.bf16.mxu1 %v7729_v62 }
 0x669   :  { %3428 = vmatprep.mubr.bf16.mxu0 %v8638_v44  ;;  %3469 = vmatprep.mubr.bf16.mxu1 %v8638_v44 }
 0x66b   :  { %v6154_v15 = vpop.eup %6153  ;;  %3399 = vmatpush1.bf16.msra.mxu0 %v7735_v40  ;;  %3440 = vmatpush1.bf16.msra.mxu1 %v7737_v9 }
 0x66c   :  { %v3236_v21 = vmul.f32 0.5, %v6154_v15  ;;  %v6156_v23 = vpop.eup %6155  ;;  %3400 = vmatprep.subr.bf16.mxu0 %v7739_v56  ;;  %3441 = vmatprep.subr.bf16.mxu1 %v7741_v34 }
 0x66d   :  { %v3237_v33 = vmul.f32 0.5, %v6156_v23  ;;  %v6158_v54 = vpop.eup %6157  ;;  %v7778_v23 = vld [vmem:[#allocation4 + $0x90] sm:$0xff] }
 0x66e   :  { %v3239_v47 = vadd.f32 0.5, %v3236_v21  ;;  %v7776_v21 = vld [vmem:[#allocation4 + $0x80] sm:$0xff]  ;;  %8823 = vst [vmem:[#allocation50_spill] sm:$0xff] %v7778_v23 }
 0x66f   :  { %v3240_v46 = vadd.f32 0.5, %v3237_v33  ;;  %3401 = vmatpush1.bf16.msra.mxu0 %v7749_v59  ;;  %3442 = vmatpush1.bf16.msra.mxu1 %v7751_v8  ;;  %8822 = vst [vmem:[#allocation38_spill] sm:$0xff] %v7776_v21  ;;  %v6160_v33 = vpop.eup %6159 }
 0x670   :  { %v3244_v29 = vmul.f32 %v6158_v54, %v3239_v47  ;;  %3402 = vmatprep.subr.bf16.mxu0 %v7753_v41  ;;  %3443 = vmatprep.subr.bf16.mxu1 %v7755_v1  ;;  %v7783_v47 = vld [vmem:[#allocation4 + $0xb8] sm:$0xff]  ;;  %v7789_v54 = vld [vmem:[#allocation4 + $0xa0] sm:$0xff]  ;;  %v3238_v27 = vmul.f32 0.5, %v6160_v33 }
 0x671   :  { %v3243_v36 = vmul.f32 %v3240_v46, %v7545_v3  ;;  %v7781_v3 = vld [vmem:[#allocation4 + $0xa8] sm:$0xff]  ;;  %8825 = vst [vmem:[#allocation62_spill] sm:$0xff] %v7783_v47  ;;  %8826 = vst [vmem:[#allocation39_spill] sm:$0xff] %v7789_v54  ;;  %v7791_v46 = vld [vmem:[#allocation4 + $0xb0] sm:$0xff] }
 0x672   :  { %8824 = vst [vmem:[#allocation49_spill] sm:$0xff] %v7781_v3  ;;  %8827 = vst [vmem:[#allocation40_spill] sm:$0xff] %v7791_v46  ;;  %v7811_v33 = vld [vmem:[#allocation4 + $0xe0] sm:$0xff] }
 0x673   :  { %v7770_v15 = vadd.f32 %v3244_v29, %v3243_v36  ;;  %3403 = vmatpush1.bf16.msra.mxu0 %v7761_v31  ;;  %3444 = vmatpush1.bf16.msra.mxu1 %v7763_v49  ;;  %v7793_v29 = vld [vmem:[#allocation4 + $0xc8] sm:$0xff]  ;;  %v7795_v36 = vld [vmem:[#allocation4 + $0xd8] sm:$0xff] }
 0x674   :  { %3404 = vmatprep.subr.bf16.mxu0 %v7766_v51  ;;  %3445 = vmatprep.subr.bf16.mxu1 %v7768_v42  ;;  %8828 = vst [vmem:[#allocation52_spill] sm:$0xff] %v7793_v29  ;;  %8829 = vst [vmem:[#allocation51_spill] sm:$0xff] %v7795_v36  ;;  %v3241_v42 = vadd.f32 0.5, %v3238_v27  ;;  %v7825_v27 = vld [vmem:[#allocation16] ss:$16 sps:$4 sm:$0xff]  }
 0x675   :  { %6161 = vtanh.f32 %v7770_v15  ;;  %8835 = vst [vmem:[#allocation68_spill] sm:$0xff] %v7825_v27 }
 0x677   :  { %3405 = vmatpush1.bf16.msra.mxu0 %v7776_v21  ;;  %3446 = vmatpush1.bf16.msra.mxu1 %v7778_v23  ;;  %v7805_v23 = vld [vmem:[#allocation4 + $0xe8] sm:$0xff]  ;;  %v7807_v21 = vld [vmem:[#allocation4 + $0xf8] sm:$0xff] }
 0x678   :  { %3406 = vmatprep.subr.bf16.mxu0 %v7781_v3  ;;  %3447 = vmatprep.subr.bf16.mxu1 %v7783_v47  ;;  %v7801_v3 = vld [vmem:[#allocation4 + $0xc0] sm:$0xff]  ;;  %v7803_v47 = vld [vmem:[#allocation4 + $0xd0] sm:$0xff]  ;;  %8831 = vst [vmem:[#allocation65_spill] sm:$0xff] %v7807_v21 }
 0x679   :  { %8830 = vst [vmem:[#allocation64_spill] sm:$0xff] %v7803_v47 }
 0x67b   :  { %3407 = vmatpush1.bf16.msra.mxu0 %v7789_v54  ;;  %3448 = vmatpush1.bf16.msra.mxu1 %v7791_v46  ;;  %v7817_v46 = vld [vmem:[#allocation16 + $0x4] ss:$16 sps:$4 sm:$0xff]   ;;  %v7819_v54 = vld [vmem:[#allocation16 + $0xc] ss:$16 sps:$4 sm:$0xff]  }
 0x67c   :  { %3408 = vmatprep.subr.bf16.mxu0 %v7793_v29  ;;  %3449 = vmatprep.subr.bf16.mxu1 %v7795_v36  ;;  %v7815_v36 = vld [vmem:[#allocation4 + $0xf0] sm:$0xff]  ;;  %8833 = vst [vmem:[#allocation66_spill] sm:$0xff] %v7817_v46  ;;  %8834 = vst [vmem:[#allocation67_spill] sm:$0xff] %v7819_v54 }
 0x67d   :  { %8832 = vst [vmem:[#allocation61_spill] sm:$0xff] %v7815_v36 }
 0x67f   :  { %v6162_v51 = vpop.eup %6161  ;;  %3409 = vmatpush1.bf16.msra.mxu0 %v7801_v3  ;;  %3450 = vmatpush1.bf16.msra.mxu1 %v7803_v47  ;;  %v7827_v47 = vld [vmem:[#allocation16 + $0x8] ss:$16 sps:$4 sm:$0xff]  }
 0x680   :  { %3410 = vmatprep.subr.bf16.mxu0 %v7805_v23  ;;  %3451 = vmatprep.subr.bf16.mxu1 %v7807_v21  ;;  %v3247_v29 = vmul.f32 %v6162_v51, %v3241_v42  ;;  %8836 = vst [vmem:[#allocation69_spill] sm:$0xff] %v7827_v47  ;;  %v7831_v21 = vld [vmem:[#allocation16 + $0x24] ss:$16 sps:$4 sm:$0xff]   ;;  %v7833_v51 = vld [vmem:[#allocation16 + $0x2c] ss:$16 sps:$4 sm:$0xff]  }
 0x681   :  { %8837 = vst [vmem:[#allocation70_spill] sm:$0xff] %v7831_v21  ;;  %8838 = vst [vmem:[#allocation71_spill] sm:$0xff] %v7833_v51  ;;  %v7839_v42 = vld [vmem:[#allocation16 + $0x20] ss:$16 sps:$4 sm:$0xff]  }
 0x682   :  { %v7821_v49 = vpack.c.bf16 %v3247_v29, %v3247_v29  ;;  %8839 = vst [vmem:[#allocation72_spill] sm:$0xff] %v7839_v42  ;;  %v7841_v29 = vld [vmem:[#allocation16 + $0x28] ss:$16 sps:$4 sm:$0xff]  }
 0x683   :  { %3411 = vmatpush1.bf16.msra.mxu0 %v7811_v33  ;;  %3452 = vmatpush1.bf16.msra.mxu1 %v7815_v36  ;;  %8840 = vst [vmem:[#allocation73_spill] sm:$0xff] %v7841_v29  ;;  %v7865_v36 = vld [vmem:[#allocation16 + $0x60] ss:$16 sps:$4 sm:$0xff]  }
 0x684   :  { %3719 = vmatprep.subr.bf16.mxu0 %v7817_v46  ;;  %3760 = vmatprep.subr.bf16.mxu1 %v7819_v54  ;;  %v7845_v54 = vld [vmem:[#allocation16 + $0x44] ss:$16 sps:$4 sm:$0xff]   ;;  %v7847_v46 = vld [vmem:[#allocation16 + $0x4c] ss:$16 sps:$4 sm:$0xff]   ;;  %8847 = vst [vmem:[#allocation80_spill] sm:$0xff] %v7865_v36 }
 0x685   :  { %8841 = vst [vmem:[#allocation74_spill] sm:$0xff] %v7845_v54  ;;  %8842 = vst [vmem:[#allocation75_spill] sm:$0xff] %v7847_v46 }
 0x686   :  { %3429 = vmatmul.mubr.bf16.vlgmr.msra.gmra.mrb[56].mxu0 %v7821_v49  ;;  %3470 = vmatmul.mubr.bf16.vlgmr.msra.gmra.mrb[88].mxu1 %v7821_v49 }
 0x687   :  { %3720 = vmatpush1.bf16.msra.mxu0 %v7825_v27  ;;  %3761 = vmatpush1.bf16.msra.mxu1 %v7827_v47  ;;  %v7853_v47 = vld [vmem:[#allocation16 + $0x40] ss:$16 sps:$4 sm:$0xff]   ;;  %v7855_v27 = vld [vmem:[#allocation16 + $0x48] ss:$16 sps:$4 sm:$0xff]  }
 0x688   :  { %3721 = vmatprep.subr.bf16.mxu0 %v7831_v21  ;;  %3762 = vmatprep.subr.bf16.mxu1 %v7833_v51  ;;  %8843 = vst [vmem:[#allocation76_spill] sm:$0xff] %v7853_v47  ;;  %8844 = vst [vmem:[#allocation77_spill] sm:$0xff] %v7855_v27  ;;  %v7859_v51 = vld [vmem:[#allocation16 + $0x64] ss:$16 sps:$4 sm:$0xff]   ;;  %v7861_v21 = vld [vmem:[#allocation16 + $0x6c] ss:$16 sps:$4 sm:$0xff]  }
 0x689   :  { %3751 = vmatprep.mubr.bf16.mxu0 %v8638_v44  ;;  %3792 = vmatprep.mubr.bf16.mxu1 %v8638_v44  ;;  %8845 = vst [vmem:[#allocation78_spill] sm:$0xff] %v7859_v51  ;;  %8846 = vst [vmem:[#allocation79_spill] sm:$0xff] %v7861_v21 }
 0x68b   :  { %3722 = vmatpush1.bf16.msra.mxu0 %v7839_v42  ;;  %3763 = vmatpush1.bf16.msra.mxu1 %v7841_v29  ;;  %v7867_v42 = vld [vmem:[#allocation16 + $0x68] ss:$16 sps:$4 sm:$0xff]   ;;  %v7871_v29 = vld [vmem:[#allocation16 + $0x84] ss:$16 sps:$4 sm:$0xff]  }
 0x68c   :  { %3723 = vmatprep.subr.bf16.mxu0 %v7845_v54  ;;  %3764 = vmatprep.subr.bf16.mxu1 %v7847_v46  ;;  %8848 = vst [vmem:[#allocation81_spill] sm:$0xff] %v7867_v42  ;;  %8849 = vst [vmem:[#allocation82_spill] sm:$0xff] %v7871_v29  ;;  %v7873_v54 = vld [vmem:[#allocation16 + $0x8c] ss:$16 sps:$4 sm:$0xff]   ;;  %v7877_v46 = vld [vmem:[#allocation16 + $0x80] ss:$16 sps:$4 sm:$0xff]  }
 0x68d   :  { %8850 = vst [vmem:[#allocation83_spill] sm:$0xff] %v7873_v54  ;;  %8851 = vst [vmem:[#allocation84_spill] sm:$0xff] %v7877_v46 }
 0x68f   :  { %3724 = vmatpush1.bf16.msra.mxu0 %v7853_v47  ;;  %3765 = vmatpush1.bf16.msra.mxu1 %v7855_v27  ;;  %v7879_v47 = vld [vmem:[#allocation16 + $0x88] ss:$16 sps:$4 sm:$0xff]   ;;  %v7883_v27 = vld [vmem:[#allocation16 + $0xa4] ss:$16 sps:$4 sm:$0xff]  }
 0x690   :  { %3725 = vmatprep.subr.bf16.mxu0 %v7859_v51  ;;  %3766 = vmatprep.subr.bf16.mxu1 %v7861_v21  ;;  %8852 = vst [vmem:[#allocation85_spill] sm:$0xff] %v7879_v47  ;;  %8853 = vst [vmem:[#allocation86_spill] sm:$0xff] %v7883_v27  ;;  %v7885_v51 = vld [vmem:[#allocation16 + $0xac] ss:$16 sps:$4 sm:$0xff]   ;;  %v7889_v21 = vld [vmem:[#allocation16 + $0xa0] ss:$16 sps:$4 sm:$0xff]  }
 0x691   :  { %8854 = vst [vmem:[#allocation87_spill] sm:$0xff] %v7885_v51  ;;  %8855 = vst [vmem:[#allocation88_spill] sm:$0xff] %v7889_v21 }
 0x693   :  { %3726 = vmatpush1.bf16.msra.mxu0 %v7865_v36  ;;  %3767 = vmatpush1.bf16.msra.mxu1 %v7867_v42  ;;  %v7891_v36 = vld [vmem:[#allocation16 + $0xa8] ss:$16 sps:$4 sm:$0xff]   ;;  %v7895_v42 = vld [vmem:[#allocation16 + $0xc4] ss:$16 sps:$4 sm:$0xff]  }
 0x694   :  { %3727 = vmatprep.subr.bf16.mxu0 %v7871_v29  ;;  %3768 = vmatprep.subr.bf16.mxu1 %v7873_v54  ;;  %v7897_v29 = vld [vmem:[#allocation16 + $0xcc] ss:$16 sps:$4 sm:$0xff]   ;;  %v7901_v54 = vld [vmem:[#allocation16 + $0xc0] ss:$16 sps:$4 sm:$0xff]  }
 0x697   :  { %3728 = vmatpush1.bf16.msra.mxu0 %v7877_v46  ;;  %3769 = vmatpush1.bf16.msra.mxu1 %v7879_v47  ;;  %v7903_v46 = vld [vmem:[#allocation16 + $0xc8] ss:$16 sps:$4 sm:$0xff]   ;;  %v7907_v47 = vld [vmem:[#allocation16 + $0xe4] ss:$16 sps:$4 sm:$0xff]  }
 0x698   :  { %3729 = vmatprep.subr.bf16.mxu0 %v7883_v27  ;;  %3770 = vmatprep.subr.bf16.mxu1 %v7885_v51  ;;  %v7909_v27 = vld [vmem:[#allocation16 + $0xec] ss:$16 sps:$4 sm:$0xff]   ;;  %v7913_v51 = vld [vmem:[#allocation16 + $0xe0] ss:$16 sps:$4 sm:$0xff]  }
 0x69b   :  { %3730 = vmatpush1.bf16.msra.mxu0 %v7889_v21  ;;  %3771 = vmatpush1.bf16.msra.mxu1 %v7891_v36  ;;  %v7915_v21 = vld [vmem:[#allocation16 + $0xe8] ss:$16 sps:$4 sm:$0xff]  }
 0x69c   :  { %3731 = vmatprep.subr.bf16.mxu0 %v7895_v42  ;;  %3772 = vmatprep.subr.bf16.mxu1 %v7897_v29 }
 0x69f   :  { %3732 = vmatpush1.bf16.msra.mxu0 %v7901_v54  ;;  %3773 = vmatpush1.bf16.msra.mxu1 %v7903_v46 }
 0x6a0   :  { %3733 = vmatprep.subr.bf16.mxu0 %v7907_v47  ;;  %3774 = vmatprep.subr.bf16.mxu1 %v7909_v27 }
 0x6a3   :  { %3734 = vmatpush1.bf16.msra.mxu0 %v7913_v51  ;;  %3775 = vmatpush1.bf16.msra.mxu1 %v7915_v21 }
 0x6a4   :  { %3889 = vmatprep.subr.bf16.mxu0 %v7602_v48  ;;  %3930 = vmatprep.subr.bf16.mxu1 %v7604_v17  ;;  %v8856_v48 = vld [vmem:[#allocation101_spill] sm:$0xff] }
 0x6a6   :  { %3752 = vmatmul.mubr.bf16.vlgmr.msra.gmra.mrb[60].mxu0 %v7821_v49  ;;  %3793 = vmatmul.mubr.bf16.vlgmr.msra.gmra.mrb[92].mxu1 %v7821_v49 }
 0x6a7   :  { %3890 = vmatpush1.bf16.msra.mxu0 %v7608_v5  ;;  %3931 = vmatpush1.bf16.msra.mxu1 %v7610_v63 }
 0x6a8   :  { %3891 = vmatprep.subr.bf16.mxu0 %v7614_v19  ;;  %3932 = vmatprep.subr.bf16.mxu1 %v7616_v4 }
 0x6a9   :  { %3921 = vmatprep.mubr.bf16.mxu0 %v8638_v44  ;;  %3962 = vmatprep.mubr.bf16.mxu1 %v8638_v44 }
 0x6ab   :  { %3892 = vmatpush1.bf16.msra.mxu0 %v7620_v12  ;;  %3933 = vmatpush1.bf16.msra.mxu1 %v7622_v50 }
 0x6ac   :  { %3893 = vmatprep.subr.bf16.mxu0 %v7626_v26  ;;  %3934 = vmatprep.subr.bf16.mxu1 %v7628_v6  ;;  %v3478_v6 = vld [vmem:[%s8442_s6] sm:$0xf] }
 0x6af   :  { %3894 = vmatpush1.bf16.msra.mxu0 %v7632_v14  ;;  %3935 = vmatpush1.bf16.msra.mxu1 %v7634_v60  ;;  %v8857_v14 = vld [vmem:[#allocation35_spill] sm:$0xff] }
 0x6b0   :  { %3895 = vmatprep.subr.bf16.mxu0 %v7638_v16  ;;  %3936 = vmatprep.subr.bf16.mxu1 %v7640_v53  ;;  %v3483_v60 = vrot.slane %v3478_v6, %v8857_v14 }
 0x6b3   :  { %3896 = vmatpush1.bf16.msra.mxu0 %v7644_v18  ;;  %3937 = vmatpush1.bf16.msra.mxu1 %v7646_v52  ;;  %v8858_v18 = vld [vmem:[#allocation36_spill] sm:$0xff] }
 0x6b4   :  { %3897 = vmatprep.subr.bf16.mxu0 %v7650_v38  ;;  %3938 = vmatprep.subr.bf16.mxu1 %v7652_v30  ;;  %v3487_v52 = vrot.slane %v3478_v6, %v8858_v18 }
 0x6b7   :  { %3898 = vmatpush1.bf16.msra.mxu0 %v7656_v55  ;;  %3939 = vmatpush1.bf16.msra.mxu1 %v7658_v45 }
 0x6b8   :  { %3899 = vmatprep.subr.bf16.mxu0 %v7662_v20  ;;  %3940 = vmatprep.subr.bf16.mxu1 %v7664_v25 }
 0x6bb   :  { %3900 = vmatpush1.bf16.msra.mxu0 %v7666_v22  ;;  %3941 = vmatpush1.bf16.msra.mxu1 %v7670_v11 }
 0x6bc   :  { %3901 = vmatprep.subr.bf16.mxu0 %v7674_v61  ;;  %3942 = vmatprep.subr.bf16.mxu1 %v7676_v24  ;;  %v3495_v24 = vrot.slane %v3478_v6, %v6686_v58 }
 0x6bf   :  { %3902 = vmatpush1.bf16.msra.mxu0 %v7680_v28  ;;  %3943 = vmatpush1.bf16.msra.mxu1 %v7682_v32 }
 0x6c0   :  { %3903 = vmatprep.subr.bf16.mxu0 %v7686_v35  ;;  %3944 = vmatprep.subr.bf16.mxu1 %v7688_v39 }
 0x6c3   :  { %3904 = vmatpush1.bf16.msra.mxu0 %v7692_v43  ;;  %3945 = vmatpush1.bf16.msra.mxu1 %v7694_v0 }
 0x6c4   :  { %3971 = vmatprep.subr.bf16.mxu0 %v7698_v37  ;;  %4012 = vmatprep.subr.bf16.mxu1 %v8856_v48  ;;  %v3491_v37 = vrot.slane %v3478_v6, %v6684_v57 }
 0x739   :  { %v3348_v17 = vpop.f32.mrb[52].mxu0  ;;  %v3389_v5 = vpop.f32.mrb[84].mxu1 }
 0x73a   :  { %v3350_v63 = vpop.f32.mrb[53].mxu0  ;;  %v3391_v19 = vpop.f32.mrb[85].mxu1 }
 0x73b   :  { %v3352_v4 = vpop.f32.mrb[54].mxu0  ;;  %v3393_v12 = vpop.f32.mrb[86].mxu1 }
 0x73c   :  { %v3353_v50 = vpop.f32.mrb[55].mxu0  ;;  %v3394_v26 = vpop.f32.mrb[87].mxu1 }
 0x759   :  { %v3430_v16 = vpop.f32.mrb[56].mxu0  ;;  %v3471_v53 = vpop.f32.mrb[88].mxu1 }
 0x75a   :  { %v3431_v38 = vadd.f32 %v3430_v16, %v3348_v17  ;;  %v3472_v30 = vadd.f32 %v3471_v53, %v3389_v5  ;;  %v3432_v55 = vpop.f32.mrb[57].mxu0  ;;  %v3473_v45 = vpop.f32.mrb[89].mxu1 }
 0x75b   :  { %v3433_v20 = vadd.f32 %v3432_v55, %v3350_v63  ;;  %v3474_v25 = vadd.f32 %v3473_v45, %v3391_v19  ;;  %v3434_v22 = vpop.f32.mrb[58].mxu0  ;;  %v3475_v11 = vpop.f32.mrb[90].mxu1 }
 0x75c   :  { %v3500_v61 = vadd.f32 %v3483_v60, %v3431_v38  ;;  %v3435_v28 = vpop.f32.mrb[59].mxu0  ;;  %v3476_v32 = vpop.f32.mrb[91].mxu1  ;;  %v3502_v49 = vadd.f32 %v3491_v37, %v3472_v30  ;;  %v8859_v30 = vld [vmem:[#allocation43_spill] sm:$0xff] }
 0x75d   :  { %v3501_v35 = vadd.f32 %v3487_v52, %v3433_v20  ;;  %v3503_v0 = vadd.f32 %v3495_v24, %v3474_v25  ;;  %v8860_v25 = vld [vmem:[#allocation44_spill] sm:$0xff] }
 0x75e   :  { %v3504_v39 = vmul.f32 0.5, %v3500_v61  ;;  %v3506_v48 = vmul.f32 0.5, %v3502_v49 }
 0x75f   :  { %v3505_v43 = vmul.f32 0.5, %v3501_v35 }
 0x760   :  { %6163 = vtanh.f32 %v3504_v39  ;;  %v8861_v39 = vld [vmem:[#allocation56_spill] sm:$0xff] }
 0x761   :  { %6165 = vtanh.f32 %v3505_v43 }
 0x762   :  { %6167 = vtanh.f32 %v3503_v0 }
 0x763   :  { %6169 = vtanh.f32 %v3506_v48  ;;  %v8863_v48 = vld [vmem:[#allocation55_spill] sm:$0xff] }
 0x76a   :  { %v6164_v17 = vpop.eup %6163 }
 0x76b   :  { %v3510_v5 = vmul.f32 0.5, %v6164_v17  ;;  %v6166_v63 = vpop.eup %6165 }
 0x76c   :  { %v3511_v4 = vmul.f32 0.5, %v6166_v63  ;;  %v6168_v12 = vpop.eup %6167 }
 0x76d   :  { %v3513_v19 = vadd.f32 0.5, %v3510_v5  ;;  %v6170_v6 = vpop.eup %6169 }
 0x76e   :  { %v3514_v50 = vadd.f32 0.5, %v3511_v4  ;;  %v3512_v38 = vmul.f32 0.5, %v6170_v6  ;;  %v8873_v6 = vld [vmem:[#allocation52_spill] sm:$0xff] }
 0x76f   :  { %v3518_v26 = vmul.f32 %v6168_v12, %v3513_v19 }
 0x770   :  { %v3517_v60 = vmul.f32 %v3514_v50, %v7712_v7  ;;  %v3515_v35 = vadd.f32 0.5, %v3512_v38  ;;  %v8866_v50 = vld [vmem:[#allocation37_spill] sm:$0xff] }
 0x772   :  { %v7967_v16 = vadd.f32 %v3518_v26, %v3517_v60  ;;  %v8871_v60 = vld [vmem:[#allocation39_spill] sm:$0xff] }
 0x774   :  { %6171 = vtanh.f32 %v7967_v16 }
 0x779   :  { %v3753_v53 = vpop.f32.mrb[60].mxu0  ;;  %v3794_v52 = vpop.f32.mrb[92].mxu1 }
 0x77a   :  { %v3801_v55 = vadd.f32 %v3753_v53, %v8859_v30  ;;  %v3755_v45 = vpop.f32.mrb[61].mxu0  ;;  %v3796_v20 = vpop.f32.mrb[93].mxu1  ;;  %v3803_v17 = vadd.f32 %v3794_v52, %v8863_v48  ;;  %v8874_v53 = vld [vmem:[#allocation51_spill] sm:$0xff]  ;;  %v8875_v30 = vld [vmem:[#allocation64_spill] sm:$0xff]  ;;  %v8893_v48 = vld [vmem:[#allocation81_spill] sm:$0xff] }
 0x77b   :  { %v3802_v22 = vadd.f32 %v3755_v45, %v8860_v25  ;;  %v3757_v11 = vpop.f32.mrb[62].mxu0  ;;  %v3798_v61 = vpop.f32.mrb[94].mxu1  ;;  %v3804_v43 = vadd.f32 %v3796_v20, %v8861_v39  ;;  %v8877_v25 = vld [vmem:[#allocation61_spill] sm:$0xff] }
 0x77c   :  { %v3805_v24 = vmul.f32 0.5, %v3801_v55  ;;  %v3758_v28 = vpop.f32.mrb[63].mxu0  ;;  %v3799_v32 = vpop.f32.mrb[95].mxu1  ;;  %v3807_v5 = vmul.f32 0.5, %v3803_v17  ;;  %v8876_v55 = vld [vmem:[#allocation65_spill] sm:$0xff]  ;;  %v8879_v11 = vld [vmem:[#allocation67_spill] sm:$0xff] }
 0x77d   :  { %v3806_v7 = vmul.f32 0.5, %v3802_v22  ;;  %v8878_v22 = vld [vmem:[#allocation66_spill] sm:$0xff]  ;;  %v8880_v61 = vld [vmem:[#allocation68_spill] sm:$0xff]  ;;  %v8885_v28 = vld [vmem:[#allocation73_spill] sm:$0xff] }
 0x77e   :  { %6173 = vtanh.f32 %v3805_v24  ;;  %v6172_v0 = vpop.eup %6171  ;;  %v8882_v24 = vld [vmem:[#allocation70_spill] sm:$0xff]  ;;  %v8889_v39 = vld [vmem:[#allocation77_spill] sm:$0xff] }
 0x77f   :  { %6175 = vtanh.f32 %v3806_v7  ;;  %v7973_v37 = vmul.f32 %v6172_v0, %v3515_v35  ;;  %v8886_v32 = vld [vmem:[#allocation74_spill] sm:$0xff]  ;;  %v8887_v7 = vld [vmem:[#allocation75_spill] sm:$0xff]  ;;  %v8888_v35 = vld [vmem:[#allocation76_spill] sm:$0xff] }
 0x780   :  { %6177 = vtanh.f32 %v3804_v43  ;;  %v8890_v43 = vld [vmem:[#allocation78_spill] sm:$0xff]  ;;  %v8891_v0 = vld [vmem:[#allocation79_spill] sm:$0xff] }
 0x781   :  { %8862 = vst [vmem:[#allocation89_spill] sm:$0xff] %v7973_v37  ;;  %v3856_v49 = vpack.c.bf16 %v7973_v37, %v7973_v37  ;;  %6179 = vtanh.f32 %v3807_v5  ;;  %v8894_v17 = vld [vmem:[#allocation82_spill] sm:$0xff]  ;;  %v8895_v5 = vld [vmem:[#allocation83_spill] sm:$0xff] }
 0x783   :  { %3922 = vmatmul.mubr.bf16.vlgmr.msra.gmra.mrb[64].mxu0 %v3856_v49  ;;  %3963 = vmatmul.mubr.bf16.vlgmr.msra.gmra.mrb[96].mxu1 %v3856_v49  ;;  %v8892_v49 = vld [vmem:[#allocation80_spill] sm:$0xff] }
 0x784   :  { %3972 = vmatpush1.bf16.msra.mxu0 %v7722_v10  ;;  %4013 = vmatpush1.bf16.msra.mxu1 %v7724_v13 }
 0x785   :  { %3973 = vmatprep.subr.bf16.mxu0 %v7727_v2  ;;  %4014 = vmatprep.subr.bf16.mxu1 %v7729_v62 }
 0x786   :  { %4003 = vmatprep.mubr.bf16.mxu0 %v8638_v44  ;;  %4044 = vmatprep.mubr.bf16.mxu1 %v8638_v44 }
 0x788   :  { %v6174_v63 = vpop.eup %6173  ;;  %3974 = vmatpush1.bf16.msra.mxu0 %v7735_v40  ;;  %4015 = vmatpush1.bf16.msra.mxu1 %v7737_v9 }
 0x789   :  { %v3811_v19 = vmul.f32 0.5, %v6174_v63  ;;  %v6176_v4 = vpop.eup %6175  ;;  %3975 = vmatprep.subr.bf16.mxu0 %v7739_v56  ;;  %4016 = vmatprep.subr.bf16.mxu1 %v7741_v34  ;;  %v8864_v56 = vld [vmem:[#allocation103_spill] sm:$0xff]  ;;  %v8865_v34 = vld [vmem:[#allocation104_spill] sm:$0xff] }
 0x78a   :  { %v3812_v13 = vmul.f32 0.5, %v6176_v4  ;;  %v6178_v2 = vpop.eup %6177  ;;  %v8896_v63 = vld [vmem:[#allocation84_spill] sm:$0xff]  ;;  %v8898_v4 = vld [vmem:[#allocation86_spill] sm:$0xff] }
 0x78b   :  { %v3814_v10 = vadd.f32 0.5, %v3811_v19  ;;  %v8897_v19 = vld [vmem:[#allocation85_spill] sm:$0xff] }
 0x78c   :  { %v3815_v62 = vadd.f32 0.5, %v3812_v13  ;;  %3976 = vmatpush1.bf16.msra.mxu0 %v7749_v59  ;;  %4017 = vmatpush1.bf16.msra.mxu1 %v7751_v8  ;;  %v6180_v59 = vpop.eup %6179  ;;  %v8867_v8 = vld [vmem:[#allocation38_spill] sm:$0xff]  ;;  %v8900_v13 = vld [vmem:[#allocation88_spill] sm:$0xff] }
 0x78d   :  { %v3819_v12 = vmul.f32 %v6178_v2, %v3814_v10  ;;  %3977 = vmatprep.subr.bf16.mxu0 %v7753_v41  ;;  %4018 = vmatprep.subr.bf16.mxu1 %v7755_v1  ;;  %v8868_v41 = vld [vmem:[#allocation50_spill] sm:$0xff]  ;;  %v8869_v1 = vld [vmem:[#allocation49_spill] sm:$0xff]  ;;  %v3813_v26 = vmul.f32 0.5, %v6180_v59  ;;  %v8899_v10 = vld [vmem:[#allocation87_spill] sm:$0xff] }
 0x78e   :  { %v3818_v40 = vmul.f32 %v3815_v62, %v7770_v15  ;;  %v8870_v15 = vld [vmem:[#allocation62_spill] sm:$0xff]  ;;  %v8080_v62 = vld [vmem:[#allocation5 + $0x40] sm:$0xff]  ;;  %v8098_v59 = vld [vmem:[#allocation5 + $0x88] sm:$0xff] }
 0x78f   :  { %v3816_v52 = vadd.f32 0.5, %v3813_v26  ;;  %v8076_v2 = vld [vmem:[#allocation5 + $0x58] sm:$0xff] }
 0x790   :  { %v7993_v9 = vadd.f32 %v3819_v12, %v3818_v40  ;;  %3978 = vmatpush1.bf16.msra.mxu0 %v7761_v31  ;;  %4019 = vmatpush1.bf16.msra.mxu1 %v8864_v56  ;;  %v8872_v31 = vld [vmem:[#allocation40_spill] sm:$0xff]  ;;  %v8082_v12 = vld [vmem:[#allocation5 + $0x50] sm:$0xff]  ;;  %v8088_v56 = vld [vmem:[#allocation5 + $0x78] sm:$0xff] }
 0x791   :  { %3979 = vmatprep.subr.bf16.mxu0 %v8865_v34  ;;  %4020 = vmatprep.subr.bf16.mxu1 %v8866_v50  ;;  %v8086_v40 = vld [vmem:[#allocation5 + $0x68] sm:$0xff]  ;;  %v8092_v34 = vld [vmem:[#allocation5 + $0x60] sm:$0xff]  ;;  %v8094_v50 = vld [vmem:[#allocation5 + $0x70] sm:$0xff] }
 0x792   :  { %6181 = vtanh.f32 %v7993_v9  ;;  %v8112_v26 = vld [vmem:[#allocation5 + $0xb8] sm:$0xff] }
 0x794   :  { %3980 = vmatpush1.bf16.msra.mxu0 %v8867_v8  ;;  %4021 = vmatpush1.bf16.msra.mxu1 %v8868_v41  ;;  %v8100_v8 = vld [vmem:[#allocation5 + $0x98] sm:$0xff]  ;;  %v8104_v41 = vld [vmem:[#allocation5 + $0x80] sm:$0xff] }
 0x795   :  { %3981 = vmatprep.subr.bf16.mxu0 %v8869_v1  ;;  %4022 = vmatprep.subr.bf16.mxu1 %v8870_v15  ;;  %v8106_v1 = vld [vmem:[#allocation5 + $0x90] sm:$0xff]  ;;  %v8110_v15 = vld [vmem:[#allocation5 + $0xa8] sm:$0xff] }
 0x798   :  { %3982 = vmatpush1.bf16.msra.mxu0 %v8871_v60  ;;  %4023 = vmatpush1.bf16.msra.mxu1 %v8872_v31  ;;  %v8114_v60 = vld [vmem:[#allocation5 + $0xa0] sm:$0xff]  ;;  %v8118_v31 = vld [vmem:[#allocation5 + $0xb0] sm:$0xff] }
 0x799   :  { %3983 = vmatprep.subr.bf16.mxu0 %v8873_v6  ;;  %4024 = vmatprep.subr.bf16.mxu1 %v8874_v53  ;;  %v8122_v6 = vld [vmem:[#allocation5 + $0xc8] sm:$0xff]  ;;  %v8124_v53 = vld [vmem:[#allocation5 + $0xd8] sm:$0xff] }
 0x79c   :  { %v6182_v38 = vpop.eup %6181  ;;  %3984 = vmatpush1.bf16.msra.mxu0 %v7801_v3  ;;  %4025 = vmatpush1.bf16.msra.mxu1 %v8875_v30  ;;  %v8881_v3 = vld [vmem:[#allocation69_spill] sm:$0xff]  ;;  %v8134_v30 = vld [vmem:[#allocation5 + $0xe8] sm:$0xff] }
 0x79d   :  { %3985 = vmatprep.subr.bf16.mxu0 %v7805_v23  ;;  %4026 = vmatprep.subr.bf16.mxu1 %v8876_v55  ;;  %v3822_v45 = vmul.f32 %v6182_v38, %v3816_v52  ;;  %v8883_v23 = vld [vmem:[#allocation71_spill] sm:$0xff]  ;;  %v8130_v38 = vld [vmem:[#allocation5 + $0xd0] sm:$0xff]  ;;  %v8136_v55 = vld [vmem:[#allocation5 + $0xf8] sm:$0xff] }
 0x79e   :  { %v8128_v52 = vld [vmem:[#allocation5 + $0xc0] sm:$0xff] }
 0x79f   :  { %v3823_v20 = vpack.c.bf16 %v3822_v45, %v3822_v45  ;;  %v8140_v45 = vld [vmem:[#allocation5 + $0xe0] sm:$0xff] }
 0x7a0   :  { %3986 = vmatpush1.bf16.msra.mxu0 %v7811_v33  ;;  %4027 = vmatpush1.bf16.msra.mxu1 %v8877_v25  ;;  %v8884_v33 = vld [vmem:[#allocation72_spill] sm:$0xff] }
 0x7a1   :  { %4294 = vmatprep.subr.bf16.mxu0 %v8878_v22  ;;  %4335 = vmatprep.subr.bf16.mxu1 %v8879_v11  ;;  %v8146_v25 = vld [vmem:[#allocation4 + $0x8] sm:$0xff]  ;;  %v8148_v22 = vld [vmem:[#allocation4 + $0x18] sm:$0xff] }
 0x7a2   :  { %8901 = vst [vmem:[#allocation90_spill] sm:$0xff] %v8148_v22 }
 0x7a3   :  { %4004 = vmatmul.mubr.bf16.vlgmr.msra.gmra.mrb[68].mxu0 %v3823_v20  ;;  %4045 = vmatmul.mubr.bf16.vlgmr.msra.gmra.mrb[100].mxu1 %v3823_v20 }
 0x7a4   :  { %4295 = vmatpush1.bf16.msra.mxu0 %v8880_v61  ;;  %4336 = vmatpush1.bf16.msra.mxu1 %v8881_v3 }
 0x7a5   :  { %4296 = vmatprep.subr.bf16.mxu0 %v8882_v24  ;;  %4337 = vmatprep.subr.bf16.mxu1 %v8883_v23 }
 0x7a6   :  { %4326 = vmatprep.mubr.bf16.mxu0 %v8638_v44  ;;  %4367 = vmatprep.mubr.bf16.mxu1 %v8638_v44 }
 0x7a8   :  { %4297 = vmatpush1.bf16.msra.mxu0 %v8884_v33  ;;  %4338 = vmatpush1.bf16.msra.mxu1 %v8885_v28 }
 0x7a9   :  { %4298 = vmatprep.subr.bf16.mxu0 %v8886_v32  ;;  %4339 = vmatprep.subr.bf16.mxu1 %v8887_v7  ;;  %v4053_v7 = vld [vmem:[%s8442_s6] sm:$0xf] }
 0x7ac   :  { %4299 = vmatpush1.bf16.msra.mxu0 %v8888_v35  ;;  %4340 = vmatpush1.bf16.msra.mxu1 %v8889_v39  ;;  %v4058_v35 = vrot.slane %v4053_v7, %v8857_v14 }
 0x7ad   :  { %4300 = vmatprep.subr.bf16.mxu0 %v8890_v43  ;;  %4341 = vmatprep.subr.bf16.mxu1 %v8891_v0  ;;  %v4062_v0 = vrot.slane %v4053_v7, %v8858_v18  ;;  %v4066_v18 = vrot.slane %v4053_v7, %v6684_v57 }
 0x7b0   :  { %4301 = vmatpush1.bf16.msra.mxu0 %v8892_v49  ;;  %4342 = vmatpush1.bf16.msra.mxu1 %v8893_v48 }
 0x7b1   :  { %4302 = vmatprep.subr.bf16.mxu0 %v8894_v17  ;;  %4343 = vmatprep.subr.bf16.mxu1 %v8895_v5 }
 0x7b4   :  { %4303 = vmatpush1.bf16.msra.mxu0 %v8896_v63  ;;  %4344 = vmatpush1.bf16.msra.mxu1 %v8897_v19 }
 0x7b5   :  { %4304 = vmatprep.subr.bf16.mxu0 %v8898_v4  ;;  %4345 = vmatprep.subr.bf16.mxu1 %v8899_v10 }
 0x7b8   :  { %4305 = vmatpush1.bf16.msra.mxu0 %v8900_v13  ;;  %4346 = vmatpush1.bf16.msra.mxu1 %v7891_v36  ;;  %v8050_v36 = vld [vmem:[#allocation5 + $0x8] sm:$0xff] }
 0x7b9   :  { %4306 = vmatprep.subr.bf16.mxu0 %v7895_v42  ;;  %4347 = vmatprep.subr.bf16.mxu1 %v7897_v29  ;;  %v8052_v42 = vld [vmem:[#allocation5 + $0x18] sm:$0xff]  ;;  %v8074_v29 = vld [vmem:[#allocation5 + $0x48] sm:$0xff] }
 0x7bc   :  { %4307 = vmatpush1.bf16.msra.mxu0 %v7901_v54  ;;  %4348 = vmatpush1.bf16.msra.mxu1 %v7903_v46  ;;  %v8058_v54 = vld [vmem:[#allocation5 + $0x10] sm:$0xff]  ;;  %v8064_v46 = vld [vmem:[#allocation5 + $0x38] sm:$0xff] }
 0x7bd   :  { %4308 = vmatprep.subr.bf16.mxu0 %v7907_v47  ;;  %4349 = vmatprep.subr.bf16.mxu1 %v7909_v27  ;;  %v8056_v47 = vld [vmem:[#allocation5] sm:$0xff] }
 0x7be   :  { %v8068_v27 = vld [vmem:[#allocation5 + $0x20] sm:$0xff] }
 0x7c0   :  { %4309 = vmatpush1.bf16.msra.mxu0 %v7913_v51  ;;  %4350 = vmatpush1.bf16.msra.mxu1 %v7915_v21  ;;  %v8062_v21 = vld [vmem:[#allocation5 + $0x28] sm:$0xff]  ;;  %v8070_v51 = vld [vmem:[#allocation5 + $0x30] sm:$0xff] }
 0x7c1   :  { %4464 = vmatprep.subr.bf16.mxu0 %v8050_v36  ;;  %4505 = vmatprep.subr.bf16.mxu1 %v8052_v42 }
 0x7c3   :  { %4327 = vmatmul.mubr.bf16.vlgmr.msra.gmra.mrb[72].mxu0 %v3823_v20  ;;  %4368 = vmatmul.mubr.bf16.vlgmr.msra.gmra.mrb[104].mxu1 %v3823_v20  ;;  %v8142_v20 = vld [vmem:[#allocation5 + $0xf0] sm:$0xff] }
 0x7c4   :  { %4496 = vmatprep.mubr.bf16.mxu0 %v8638_v44  ;;  %4537 = vmatprep.mubr.bf16.mxu1 %v8638_v44 }
 0x7c5   :  { %4465 = vmatpush1.bf16.msra.mxu0 %v8056_v47  ;;  %4506 = vmatpush1.bf16.msra.mxu1 %v8058_v54 }
 0x7c6   :  { %4466 = vmatprep.subr.bf16.mxu0 %v8062_v21  ;;  %4507 = vmatprep.subr.bf16.mxu1 %v8064_v46 }
 0x7c9   :  { %4467 = vmatpush1.bf16.msra.mxu0 %v8068_v27  ;;  %4508 = vmatpush1.bf16.msra.mxu1 %v8070_v51 }
 0x7ca   :  { %4468 = vmatprep.subr.bf16.mxu0 %v8074_v29  ;;  %4509 = vmatprep.subr.bf16.mxu1 %v8076_v2 }
 0x7cd   :  { %4469 = vmatpush1.bf16.msra.mxu0 %v8080_v62  ;;  %4510 = vmatpush1.bf16.msra.mxu1 %v8082_v12 }
 0x7ce   :  { %4470 = vmatprep.subr.bf16.mxu0 %v8086_v40  ;;  %4511 = vmatprep.subr.bf16.mxu1 %v8088_v56 }
 0x7d1   :  { %4471 = vmatpush1.bf16.msra.mxu0 %v8092_v34  ;;  %4512 = vmatpush1.bf16.msra.mxu1 %v8094_v50 }
 0x7d2   :  { %4472 = vmatprep.subr.bf16.mxu0 %v8098_v59  ;;  %4513 = vmatprep.subr.bf16.mxu1 %v8100_v8 }
 0x7d5   :  { %4473 = vmatpush1.bf16.msra.mxu0 %v8104_v41  ;;  %4514 = vmatpush1.bf16.msra.mxu1 %v8106_v1 }
 0x7d6   :  { %4474 = vmatprep.subr.bf16.mxu0 %v8110_v15  ;;  %4515 = vmatprep.subr.bf16.mxu1 %v8112_v26 }
 0x7d9   :  { %4475 = vmatpush1.bf16.msra.mxu0 %v8114_v60  ;;  %4516 = vmatpush1.bf16.msra.mxu1 %v8118_v31 }
 0x7da   :  { %4476 = vmatprep.subr.bf16.mxu0 %v8122_v6  ;;  %4517 = vmatprep.subr.bf16.mxu1 %v8124_v53 }
 0x7dd   :  { %4477 = vmatpush1.bf16.msra.mxu0 %v8128_v52  ;;  %4518 = vmatpush1.bf16.msra.mxu1 %v8130_v38 }
 0x7de   :  { %4478 = vmatprep.subr.bf16.mxu0 %v8134_v30  ;;  %4519 = vmatprep.subr.bf16.mxu1 %v8136_v55 }
 0x7e1   :  { %4479 = vmatpush1.bf16.msra.mxu0 %v8140_v45  ;;  %4520 = vmatpush1.bf16.msra.mxu1 %v8142_v20 }
 0x7e2   :  { %4546 = vmatprep.subr.bf16.mxu0 %v8146_v25  ;;  %4587 = vmatprep.subr.bf16.mxu1 %v8148_v22 }
 0x856   :  { %v3923_v11 = vpop.f32.mrb[64].mxu0  ;;  %v3964_v61 = vpop.f32.mrb[96].mxu1 }
 0x857   :  { %v3925_v3 = vpop.f32.mrb[65].mxu0  ;;  %v3966_v24 = vpop.f32.mrb[97].mxu1 }
 0x858   :  { %v3927_v23 = vpop.f32.mrb[66].mxu0  ;;  %v3968_v33 = vpop.f32.mrb[98].mxu1 }
 0x859   :  { %v3928_v28 = vpop.f32.mrb[67].mxu0  ;;  %v3969_v32 = vpop.f32.mrb[99].mxu1  ;;  %v4070_v23 = vrot.slane %v4053_v7, %v6686_v58  ;;  %v8902_v7 = vld [vmem:[#allocation45_spill] sm:$0xff] }
 0x876   :  { %v4005_v39 = vpop.f32.mrb[68].mxu0  ;;  %v4046_v43 = vpop.f32.mrb[100].mxu1 }
 0x877   :  { %v4006_v49 = vadd.f32 %v4005_v39, %v3923_v11  ;;  %v4047_v48 = vadd.f32 %v4046_v43, %v3964_v61  ;;  %v4007_v17 = vpop.f32.mrb[69].mxu0  ;;  %v4048_v5 = vpop.f32.mrb[101].mxu1 }
 0x878   :  { %v4008_v63 = vadd.f32 %v4007_v17, %v3925_v3  ;;  %v4049_v19 = vadd.f32 %v4048_v5, %v3966_v24  ;;  %v4009_v4 = vpop.f32.mrb[70].mxu0  ;;  %v4050_v10 = vpop.f32.mrb[102].mxu1 }
 0x879   :  { %v4075_v13 = vadd.f32 %v4058_v35, %v4006_v49  ;;  %v4010_v33 = vpop.f32.mrb[71].mxu0  ;;  %v4051_v28 = vpop.f32.mrb[103].mxu1  ;;  %v4077_v11 = vadd.f32 %v4066_v18, %v4047_v48  ;;  %v8903_v10 = vld [vmem:[#allocation46_spill] sm:$0xff] }
 0x87a   :  { %v4076_v32 = vadd.f32 %v4062_v0, %v4008_v63  ;;  %v4078_v22 = vadd.f32 %v4070_v23, %v4049_v19 }
 0x87b   :  { %v4079_v37 = vmul.f32 0.5, %v4075_v13  ;;  %v4081_v61 = vmul.f32 0.5, %v4077_v11 }
 0x87c   :  { %v4080_v14 = vmul.f32 0.5, %v4076_v32 }
 0x87d   :  { %6183 = vtanh.f32 %v4079_v37 }
 0x87e   :  { %6185 = vtanh.f32 %v4080_v14 }
 0x87f   :  { %6187 = vtanh.f32 %v4078_v22 }
 0x880   :  { %6189 = vtanh.f32 %v4081_v61 }
 0x887   :  { %v6184_v3 = vpop.eup %6183 }
 0x888   :  { %v4085_v24 = vmul.f32 0.5, %v6184_v3  ;;  %v6186_v39 = vpop.eup %6185  ;;  %v8904_v3 = vld [vmem:[#allocation58_spill] sm:$0xff] }
 0x889   :  { %v4086_v35 = vmul.f32 0.5, %v6186_v39  ;;  %v6188_v49 = vpop.eup %6187 }
 0x88a   :  { %v4088_v43 = vadd.f32 0.5, %v4085_v24  ;;  %v6190_v37 = vpop.eup %6189 }
 0x88b   :  { %v4089_v17 = vadd.f32 0.5, %v4086_v35  ;;  %v4087_v18 = vmul.f32 0.5, %v6190_v37  ;;  %v8175_v37 = vld [vmem:[#allocation4 + $0x28] sm:$0xff] }
 0x88c   :  { %v4093_v5 = vmul.f32 %v6188_v49, %v4088_v43  ;;  %v8170_v49 = vld [vmem:[#allocation4] sm:$0xff] }
 0x88d   :  { %v4092_v0 = vmul.f32 %v4089_v17, %v7967_v16  ;;  %v4090_v61 = vadd.f32 0.5, %v4087_v18  ;;  %v8172_v17 = vld [vmem:[#allocation4 + $0x10] sm:$0xff]  ;;  %v8183_v18 = vld [vmem:[#allocation4 + $0x20] sm:$0xff] }
 0x88f   :  { %v8160_v63 = vadd.f32 %v4093_v5, %v4092_v0  ;;  %v8906_v5 = vld [vmem:[#allocation57_spill] sm:$0xff] }
 0x891   :  { %6191 = vtanh.f32 %v8160_v63 }
 0x896   :  { %v4328_v14 = vpop.f32.mrb[72].mxu0  ;;  %v4369_v22 = vpop.f32.mrb[104].mxu1 }
 0x897   :  { %v4376_v48 = vadd.f32 %v4328_v14, %v8902_v7  ;;  %v4330_v19 = vpop.f32.mrb[73].mxu0  ;;  %v4371_v4 = vpop.f32.mrb[105].mxu1  ;;  %v4378_v0 = vadd.f32 %v4369_v22, %v8906_v5  ;;  %v8177_v14 = vld [vmem:[#allocation4 + $0x38] sm:$0xff]  ;;  %v8185_v7 = vld [vmem:[#allocation4 + $0x30] sm:$0xff]  ;;  %v8187_v22 = vld [vmem:[#allocation4 + $0x48] sm:$0xff] }
 0x898   :  { %v4377_v13 = vadd.f32 %v4330_v19, %v8903_v10  ;;  %v4332_v23 = vpop.f32.mrb[74].mxu0  ;;  %v4373_v33 = vpop.f32.mrb[106].mxu1  ;;  %v4379_v24 = vadd.f32 %v4371_v4, %v8904_v3  ;;  %v8189_v19 = vld [vmem:[#allocation4 + $0x58] sm:$0xff] }
 0x899   :  { %v4380_v28 = vmul.f32 0.5, %v4376_v48  ;;  %v4333_v32 = vpop.f32.mrb[75].mxu0  ;;  %v4374_v11 = vpop.f32.mrb[107].mxu1  ;;  %v4382_v48 = vmul.f32 0.5, %v4378_v0  ;;  %v8197_v23 = vld [vmem:[#allocation4 + $0x40] sm:$0xff]  ;;  %v8199_v33 = vld [vmem:[#allocation4 + $0x50] sm:$0xff] }
 0x89a   :  { %v4381_v16 = vmul.f32 0.5, %v4377_v13  ;;  %v8201_v11 = vld [vmem:[#allocation4 + $0x68] sm:$0xff] }
 0x89b   :  { %6193 = vtanh.f32 %v4380_v28  ;;  %v6192_v39 = vpop.eup %6191  ;;  %v8214_v0 = vld [vmem:[#allocation4 + $0x88] sm:$0xff] }
 0x89c   :  { %6195 = vtanh.f32 %v4381_v16  ;;  %v8166_v43 = vmul.f32 %v6192_v39, %v4090_v61  ;;  %v8203_v16 = vld [vmem:[#allocation4 + $0x78] sm:$0xff]  ;;  %v8209_v39 = vld [vmem:[#allocation4 + $0x60] sm:$0xff]  ;;  %8909 = vst [vmem:[#allocation94_spill] sm:$0xff] %v8214_v0 }
 0x89d   :  { %6197 = vtanh.f32 %v4379_v24  ;;  %8907 = vst [vmem:[#allocation92_spill] sm:$0xff] %v8209_v39 }
 0x89e   :  { %8905 = vst [vmem:[#allocation91_spill] sm:$0xff] %v8166_v43  ;;  %v4431_v35 = vpack.c.bf16 %v8166_v43, %v8166_v43  ;;  %6199 = vtanh.f32 %v4382_v48  ;;  %v8216_v48 = vld [vmem:[#allocation4 + $0x98] sm:$0xff] }
 0x89f   :  { %8910 = vst [vmem:[#allocation95_spill] sm:$0xff] %v8216_v48 }
 0x8a0   :  { %4497 = vmatmul.mubr.bf16.vlgmr.msra.gmra.mrb[76].mxu0 %v4431_v35  ;;  %4538 = vmatmul.mubr.bf16.vlgmr.msra.gmra.mrb[108].mxu1 %v4431_v35  ;;  %v8211_v35 = vld [vmem:[#allocation4 + $0x70] sm:$0xff] }
 0x8a1   :  { %4547 = vmatpush1.bf16.msra.mxu0 %v8170_v49  ;;  %4588 = vmatpush1.bf16.msra.mxu1 %v8172_v17  ;;  %8908 = vst [vmem:[#allocation93_spill] sm:$0xff] %v8211_v35 }
 0x8a2   :  { %4548 = vmatprep.subr.bf16.mxu0 %v8175_v37  ;;  %4589 = vmatprep.subr.bf16.mxu1 %v8177_v14 }
 0x8a3   :  { %4578 = vmatprep.mubr.bf16.mxu0 %v8638_v44  ;;  %4619 = vmatprep.mubr.bf16.mxu1 %v8638_v44 }
 0x8a5   :  { %v6194_v4 = vpop.eup %6193  ;;  %4549 = vmatpush1.bf16.msra.mxu0 %v8183_v18  ;;  %4590 = vmatpush1.bf16.msra.mxu1 %v8185_v7 }
 0x8a6   :  { %v4386_v10 = vmul.f32 0.5, %v6194_v4  ;;  %v6196_v13 = vpop.eup %6195  ;;  %4550 = vmatprep.subr.bf16.mxu0 %v8187_v22  ;;  %4591 = vmatprep.subr.bf16.mxu1 %v8189_v19 }
 0x8a7   :  { %v4387_v32 = vmul.f32 0.5, %v6196_v13  ;;  %v6198_v61 = vpop.eup %6197  ;;  %v8226_v13 = vld [vmem:[#allocation4 + $0x90] sm:$0xff] }
 0x8a8   :  { %v4389_v28 = vadd.f32 0.5, %v4386_v10  ;;  %v8224_v10 = vld [vmem:[#allocation4 + $0x80] sm:$0xff]  ;;  %8913 = vst [vmem:[#allocation98_spill] sm:$0xff] %v8226_v13 }
 0x8a9   :  { %v4390_v3 = vadd.f32 0.5, %v4387_v32  ;;  %4551 = vmatpush1.bf16.msra.mxu0 %v8197_v23  ;;  %4592 = vmatpush1.bf16.msra.mxu1 %v8199_v33  ;;  %8912 = vst [vmem:[#allocation97_spill] sm:$0xff] %v8224_v10  ;;  %v6200_v32 = vpop.eup %6199 }
 0x8aa   :  { %v4394_v24 = vmul.f32 %v6198_v61, %v4389_v28  ;;  %4552 = vmatprep.subr.bf16.mxu0 %v8201_v11  ;;  %4593 = vmatprep.subr.bf16.mxu1 %v8203_v16  ;;  %v8231_v28 = vld [vmem:[#allocation4 + $0xb8] sm:$0xff]  ;;  %v8237_v61 = vld [vmem:[#allocation4 + $0xa0] sm:$0xff]  ;;  %v4388_v43 = vmul.f32 0.5, %v6200_v32 }
 0x8ab   :  { %v4393_v5 = vmul.f32 %v4390_v3, %v7993_v9  ;;  %v8229_v9 = vld [vmem:[#allocation4 + $0xa8] sm:$0xff]  ;;  %8915 = vst [vmem:[#allocation41_spill] sm:$0xff] %v8231_v28  ;;  %8916 = vst [vmem:[#allocation42_spill] sm:$0xff] %v8237_v61  ;;  %v8239_v3 = vld [vmem:[#allocation4 + $0xb0] sm:$0xff] }
 0x8ac   :  { %8914 = vst [vmem:[#allocation99_spill] sm:$0xff] %v8229_v9  ;;  %8917 = vst [vmem:[#allocation54_spill] sm:$0xff] %v8239_v3  ;;  %v8259_v32 = vld [vmem:[#allocation4 + $0xe0] sm:$0xff] }
 0x8ad   :  { %v8218_v4 = vadd.f32 %v4394_v24, %v4393_v5  ;;  %4553 = vmatpush1.bf16.msra.mxu0 %v8209_v39  ;;  %4594 = vmatpush1.bf16.msra.mxu1 %v8211_v35  ;;  %v8241_v24 = vld [vmem:[#allocation4 + $0xc8] sm:$0xff]  ;;  %v8243_v5 = vld [vmem:[#allocation4 + $0xd8] sm:$0xff]  ;;  %8924 = vst [vmem:[#allocation103_spill] sm:$0xff] %v8259_v32 }
 0x8ae   :  { %4554 = vmatprep.subr.bf16.mxu0 %v8214_v0  ;;  %4595 = vmatprep.subr.bf16.mxu1 %v8216_v48  ;;  %8918 = vst [vmem:[#allocation53_spill] sm:$0xff] %v8241_v24  ;;  %8919 = vst [vmem:[#allocation101_spill] sm:$0xff] %v8243_v5  ;;  %v4391_v48 = vadd.f32 0.5, %v4388_v43  ;;  %v6035_v43 = vld [vmem:[#allocation16] ss:$16 sps:$4 sm:$0xff]  }
 0x8af   :  { %8911 = vst [vmem:[#allocation96_spill] sm:$0xff] %v8218_v4  ;;  %6201 = vtanh.f32 %v8218_v4  ;;  %v6046_v39 = vld [vmem:[#allocation16 + $0x2c] ss:$16 sps:$4 sm:$0xff]   ;;  %v6062_v4 = vld [vmem:[#allocation16 + $0x88] ss:$16 sps:$4 sm:$0xff]  }
 0x8b1   :  { %4555 = vmatpush1.bf16.msra.mxu0 %v8224_v10  ;;  %4596 = vmatpush1.bf16.msra.mxu1 %v8226_v13  ;;  %v8253_v13 = vld [vmem:[#allocation4 + $0xe8] sm:$0xff]  ;;  %v8255_v10 = vld [vmem:[#allocation4 + $0xf8] sm:$0xff] }
 0x8b2   :  { %4556 = vmatprep.subr.bf16.mxu0 %v8229_v9  ;;  %4597 = vmatprep.subr.bf16.mxu1 %v8231_v28  ;;  %v8249_v9 = vld [vmem:[#allocation4 + $0xc0] sm:$0xff]  ;;  %v8251_v28 = vld [vmem:[#allocation4 + $0xd0] sm:$0xff]  ;;  %8922 = vst [vmem:[#allocation56_spill] sm:$0xff] %v8253_v13  ;;  %8923 = vst [vmem:[#allocation55_spill] sm:$0xff] %v8255_v10 }
 0x8b3   :  { %8920 = vst [vmem:[#allocation43_spill] sm:$0xff] %v8249_v9  ;;  %8921 = vst [vmem:[#allocation44_spill] sm:$0xff] %v8251_v28 }
 0x8b5   :  { %4557 = vmatpush1.bf16.msra.mxu0 %v8237_v61  ;;  %4598 = vmatpush1.bf16.msra.mxu1 %v8239_v3  ;;  %v6037_v3 = vld [vmem:[#allocation16 + $0x4] ss:$16 sps:$4 sm:$0xff]   ;;  %v6040_v61 = vld [vmem:[#allocation16 + $0xc] ss:$16 sps:$4 sm:$0xff]  }
 0x8b6   :  { %4558 = vmatprep.subr.bf16.mxu0 %v8241_v24  ;;  %4599 = vmatprep.subr.bf16.mxu1 %v8243_v5  ;;  %v8263_v5 = vld [vmem:[#allocation4 + $0xf0] sm:$0xff] }
 0x8b7   :  { %8925 = vst [vmem:[#allocation104_spill] sm:$0xff] %v8263_v5 }
 0x8b9   :  { %v6202_v0 = vpop.eup %6201  ;;  %4559 = vmatpush1.bf16.msra.mxu0 %v8249_v9  ;;  %4600 = vmatpush1.bf16.msra.mxu1 %v8251_v28  ;;  %v6038_v9 = vld [vmem:[#allocation16 + $0x8] ss:$16 sps:$4 sm:$0xff]   ;;  %v6043_v28 = vld [vmem:[#allocation16 + $0x24] ss:$16 sps:$4 sm:$0xff]  }
 0x8ba   :  { %4560 = vmatprep.subr.bf16.mxu0 %v8253_v13  ;;  %4601 = vmatprep.subr.bf16.mxu1 %v8255_v10  ;;  %v4397_v24 = vmul.f32 %v6202_v0, %v4391_v48  ;;  %v6041_v0 = vld [vmem:[#allocation16 + $0x20] ss:$16 sps:$4 sm:$0xff]   ;;  %v6044_v48 = vld [vmem:[#allocation16 + $0x28] ss:$16 sps:$4 sm:$0xff]   ;;  %v6058_v10 = vld [vmem:[#allocation16 + $0x6c] ss:$16 sps:$4 sm:$0xff]  }
 0x8bb   :  { %v6059_v13 = vld [vmem:[#allocation16 + $0x80] ss:$16 sps:$4 sm:$0xff]  }
 0x8bc   :  { %v8265_v35 = vpack.c.bf16 %v4397_v24, %v4397_v24  ;;  %v6049_v24 = vld [vmem:[#allocation16 + $0x44] ss:$16 sps:$4 sm:$0xff]  }
 0x8bd   :  { %4561 = vmatpush1.bf16.msra.mxu0 %v8259_v32  ;;  %4602 = vmatpush1.bf16.msra.mxu1 %v8263_v5  ;;  %v6052_v32 = vld [vmem:[#allocation16 + $0x4c] ss:$16 sps:$4 sm:$0xff]   ;;  %v6055_v5 = vld [vmem:[#allocation16 + $0x64] ss:$16 sps:$4 sm:$0xff]  }
 0x8be   :  { %4869 = vmatprep.subr.bf16.mxu0 %v6037_v3  ;;  %4910 = vmatprep.subr.bf16.mxu1 %v6040_v61  ;;  %v6047_v61 = vld [vmem:[#allocation16 + $0x40] ss:$16 sps:$4 sm:$0xff]   ;;  %v6050_v3 = vld [vmem:[#allocation16 + $0x48] ss:$16 sps:$4 sm:$0xff]  }
 0x8c0   :  { %4579 = vmatmul.mubr.bf16.vlgmr.msra.gmra.mrb[80].mxu0 %v8265_v35  ;;  %4620 = vmatmul.mubr.bf16.vlgmr.msra.gmra.mrb[112].mxu1 %v8265_v35 }
 0x8c1   :  { %4870 = vmatpush1.bf16.msra.mxu0 %v6035_v43  ;;  %4911 = vmatpush1.bf16.msra.mxu1 %v6038_v9  ;;  %v6053_v9 = vld [vmem:[#allocation16 + $0x60] ss:$16 sps:$4 sm:$0xff]   ;;  %v6056_v43 = vld [vmem:[#allocation16 + $0x68] ss:$16 sps:$4 sm:$0xff]  }
 0x8c2   :  { %4871 = vmatprep.subr.bf16.mxu0 %v6043_v28  ;;  %4912 = vmatprep.subr.bf16.mxu1 %v6046_v39  ;;  %v6061_v39 = vld [vmem:[#allocation16 + $0x84] ss:$16 sps:$4 sm:$0xff]   ;;  %v6064_v28 = vld [vmem:[#allocation16 + $0x8c] ss:$16 sps:$4 sm:$0xff]  }
 0x8c3   :  { %4901 = vmatprep.mubr.bf16.mxu0 %v8638_v44  ;;  %4942 = vmatprep.mubr.bf16.mxu1 %v8638_v44 }
 0x8c5   :  { %4872 = vmatpush1.bf16.msra.mxu0 %v6041_v0  ;;  %4913 = vmatpush1.bf16.msra.mxu1 %v6044_v48  ;;  %v6067_v0 = vld [vmem:[#allocation16 + $0xa4] ss:$16 sps:$4 sm:$0xff]   ;;  %v6070_v48 = vld [vmem:[#allocation16 + $0xac] ss:$16 sps:$4 sm:$0xff]  }
 0x8c6   :  { %4873 = vmatprep.subr.bf16.mxu0 %v6049_v24  ;;  %4914 = vmatprep.subr.bf16.mxu1 %v6052_v32  ;;  %v6065_v32 = vld [vmem:[#allocation16 + $0xa0] ss:$16 sps:$4 sm:$0xff]   ;;  %v6068_v24 = vld [vmem:[#allocation16 + $0xa8] ss:$16 sps:$4 sm:$0xff]  }
 0x8c9   :  { %4874 = vmatpush1.bf16.msra.mxu0 %v6047_v61  ;;  %4915 = vmatpush1.bf16.msra.mxu1 %v6050_v3  ;;  %v6073_v61 = vld [vmem:[#allocation16 + $0xc4] ss:$16 sps:$4 sm:$0xff]   ;;  %v6076_v3 = vld [vmem:[#allocation16 + $0xcc] ss:$16 sps:$4 sm:$0xff]  }
 0x8ca   :  { %4875 = vmatprep.subr.bf16.mxu0 %v6055_v5  ;;  %4916 = vmatprep.subr.bf16.mxu1 %v6058_v10  ;;  %v6071_v10 = vld [vmem:[#allocation16 + $0xc0] ss:$16 sps:$4 sm:$0xff]   ;;  %v6074_v5 = vld [vmem:[#allocation16 + $0xc8] ss:$16 sps:$4 sm:$0xff]  }
 0x8cd   :  { %4876 = vmatpush1.bf16.msra.mxu0 %v6053_v9  ;;  %4917 = vmatpush1.bf16.msra.mxu1 %v6056_v43  ;;  %v6079_v9 = vld [vmem:[#allocation16 + $0xe4] ss:$16 sps:$4 sm:$0xff]   ;;  %v6082_v43 = vld [vmem:[#allocation16 + $0xec] ss:$16 sps:$4 sm:$0xff]  }
 0x8ce   :  { %4877 = vmatprep.subr.bf16.mxu0 %v6061_v39  ;;  %4918 = vmatprep.subr.bf16.mxu1 %v6064_v28  ;;  %v6077_v39 = vld [vmem:[#allocation16 + $0xe0] ss:$16 sps:$4 sm:$0xff]   ;;  %v6080_v28 = vld [vmem:[#allocation16 + $0xe8] ss:$16 sps:$4 sm:$0xff]  }
 0x8d1   :  { %4878 = vmatpush1.bf16.msra.mxu0 %v6059_v13  ;;  %4919 = vmatpush1.bf16.msra.mxu1 %v6062_v4 }
 0x8d2   :  { %4879 = vmatprep.subr.bf16.mxu0 %v6067_v0  ;;  %4920 = vmatprep.subr.bf16.mxu1 %v6070_v48 }
 0x8d5   :  { %4880 = vmatpush1.bf16.msra.mxu0 %v6065_v32  ;;  %4921 = vmatpush1.bf16.msra.mxu1 %v6068_v24 }
 0x8d6   :  { %4881 = vmatprep.subr.bf16.mxu0 %v6073_v61  ;;  %4922 = vmatprep.subr.bf16.mxu1 %v6076_v3 }
 0x8d9   :  { %4882 = vmatpush1.bf16.msra.mxu0 %v6071_v10  ;;  %4923 = vmatpush1.bf16.msra.mxu1 %v6074_v5 }
 0x8da   :  { %4883 = vmatprep.subr.bf16.mxu0 %v6079_v9  ;;  %4924 = vmatprep.subr.bf16.mxu1 %v6082_v43 }
 0x8dd   :  { %4884 = vmatpush1.bf16.msra.mxu0 %v6077_v39  ;;  %4925 = vmatpush1.bf16.msra.mxu1 %v6080_v28 }
 0x8de   :  { %5039 = vmatprep.subr.bf16.mxu0 %v8050_v36  ;;  %5080 = vmatprep.subr.bf16.mxu1 %v8052_v42  ;;  %v8926_v36 = vld [vmem:[#allocation90_spill] sm:$0xff] }
 0x8e0   :  { %4902 = vmatmul.mubr.bf16.vlgmr.msra.gmra.mrb[84].mxu0 %v8265_v35  ;;  %4943 = vmatmul.mubr.bf16.vlgmr.msra.gmra.mrb[116].mxu1 %v8265_v35 }
 0x8e1   :  { %5040 = vmatpush1.bf16.msra.mxu0 %v8056_v47  ;;  %5081 = vmatpush1.bf16.msra.mxu1 %v8058_v54 }
 0x8e2   :  { %5041 = vmatprep.subr.bf16.mxu0 %v8062_v21  ;;  %5082 = vmatprep.subr.bf16.mxu1 %v8064_v46 }
 0x8e3   :  { %5071 = vmatprep.mubr.bf16.mxu0 %v8638_v44  ;;  %5112 = vmatprep.mubr.bf16.mxu1 %v8638_v44 }
 0x8e5   :  { %5042 = vmatpush1.bf16.msra.mxu0 %v8068_v27  ;;  %5083 = vmatpush1.bf16.msra.mxu1 %v8070_v51 }
 0x8e6   :  { %5043 = vmatprep.subr.bf16.mxu0 %v8074_v29  ;;  %5084 = vmatprep.subr.bf16.mxu1 %v8076_v2  ;;  %v4628_v2 = vld [vmem:[%s8442_s6] sm:$0xf] }
 0x8e9   :  { %5044 = vmatpush1.bf16.msra.mxu0 %v8080_v62  ;;  %5085 = vmatpush1.bf16.msra.mxu1 %v8082_v12  ;;  %v8927_v62 = vld [vmem:[#allocation35_spill] sm:$0xff] }
 0x8ea   :  { %5045 = vmatprep.subr.bf16.mxu0 %v8086_v40  ;;  %5086 = vmatprep.subr.bf16.mxu1 %v8088_v56  ;;  %v4633_v12 = vrot.slane %v4628_v2, %v8927_v62 }
 0x8ed   :  { %5046 = vmatpush1.bf16.msra.mxu0 %v8092_v34  ;;  %5087 = vmatpush1.bf16.msra.mxu1 %v8094_v50  ;;  %v8928_v34 = vld [vmem:[#allocation36_spill] sm:$0xff] }
 0x8ee   :  { %5047 = vmatprep.subr.bf16.mxu0 %v8098_v59  ;;  %5088 = vmatprep.subr.bf16.mxu1 %v8100_v8  ;;  %v4637_v50 = vrot.slane %v4628_v2, %v8928_v34 }
 0x8f1   :  { %5048 = vmatpush1.bf16.msra.mxu0 %v8104_v41  ;;  %5089 = vmatpush1.bf16.msra.mxu1 %v8106_v1 }
 0x8f2   :  { %5049 = vmatprep.subr.bf16.mxu0 %v8110_v15  ;;  %5090 = vmatprep.subr.bf16.mxu1 %v8112_v26 }
 0x8f5   :  { %5050 = vmatpush1.bf16.msra.mxu0 %v8114_v60  ;;  %5091 = vmatpush1.bf16.msra.mxu1 %v8118_v31 }
 0x8f6   :  { %5051 = vmatprep.subr.bf16.mxu0 %v8122_v6  ;;  %5092 = vmatprep.subr.bf16.mxu1 %v8124_v53  ;;  %v4645_v53 = vrot.slane %v4628_v2, %v6686_v58 }
 0x8f9   :  { %5052 = vmatpush1.bf16.msra.mxu0 %v8128_v52  ;;  %5093 = vmatpush1.bf16.msra.mxu1 %v8130_v38 }
 0x8fa   :  { %5053 = vmatprep.subr.bf16.mxu0 %v8134_v30  ;;  %5094 = vmatprep.subr.bf16.mxu1 %v8136_v55 }
 0x8fd   :  { %5054 = vmatpush1.bf16.msra.mxu0 %v8140_v45  ;;  %5095 = vmatpush1.bf16.msra.mxu1 %v8142_v20 }
 0x8fe   :  { %5121 = vmatprep.subr.bf16.mxu0 %v8146_v25  ;;  %5162 = vmatprep.subr.bf16.mxu1 %v8926_v36  ;;  %v4641_v25 = vrot.slane %v4628_v2, %v6684_v57 }
 0x973   :  { %v4498_v42 = vpop.f32.mrb[76].mxu0  ;;  %v4539_v47 = vpop.f32.mrb[108].mxu1 }
 0x974   :  { %v4500_v54 = vpop.f32.mrb[77].mxu0  ;;  %v4541_v21 = vpop.f32.mrb[109].mxu1 }
 0x975   :  { %v4502_v46 = vpop.f32.mrb[78].mxu0  ;;  %v4543_v27 = vpop.f32.mrb[110].mxu1 }
 0x976   :  { %v4503_v51 = vpop.f32.mrb[79].mxu0  ;;  %v4544_v29 = vpop.f32.mrb[111].mxu1  ;;  %v8930_v46 = vld [vmem:[#allocation48_spill] sm:$0xff] }
 0x993   :  { %v4580_v40 = vpop.f32.mrb[80].mxu0  ;;  %v4621_v56 = vpop.f32.mrb[112].mxu1 }
 0x994   :  { %v4581_v59 = vadd.f32 %v4580_v40, %v4498_v42  ;;  %v4622_v8 = vadd.f32 %v4621_v56, %v4539_v47  ;;  %v4582_v41 = vpop.f32.mrb[81].mxu0  ;;  %v4623_v1 = vpop.f32.mrb[113].mxu1  ;;  %v8929_v42 = vld [vmem:[#allocation47_spill] sm:$0xff] }
 0x995   :  { %v4583_v15 = vadd.f32 %v4582_v41, %v4500_v54  ;;  %v4624_v26 = vadd.f32 %v4623_v1, %v4541_v21  ;;  %v4584_v60 = vpop.f32.mrb[82].mxu0  ;;  %v4625_v31 = vpop.f32.mrb[114].mxu1 }
 0x996   :  { %v4650_v6 = vadd.f32 %v4633_v12, %v4581_v59  ;;  %v4585_v52 = vpop.f32.mrb[83].mxu0  ;;  %v4626_v38 = vpop.f32.mrb[115].mxu1  ;;  %v4652_v35 = vadd.f32 %v4641_v25, %v4622_v8  ;;  %v8942_v25 = vld [vmem:[#allocation42_spill] sm:$0xff] }
 0x997   :  { %v4651_v30 = vadd.f32 %v4637_v50, %v4583_v15  ;;  %v4653_v20 = vadd.f32 %v4645_v53, %v4624_v26  ;;  %v8931_v50 = vld [vmem:[#allocation60_spill] sm:$0xff]  ;;  %v8932_v15 = vld [vmem:[#allocation59_spill] sm:$0xff] }
 0x998   :  { %v4654_v55 = vmul.f32 0.5, %v4650_v6  ;;  %v4656_v4 = vmul.f32 0.5, %v4652_v35  ;;  %v8943_v35 = vld [vmem:[#allocation54_spill] sm:$0xff] }
 0x999   :  { %v4655_v45 = vmul.f32 0.5, %v4651_v30  ;;  %v8936_v30 = vld [vmem:[#allocation94_spill] sm:$0xff] }
 0x99a   :  { %6203 = vtanh.f32 %v4654_v55  ;;  %v8937_v55 = vld [vmem:[#allocation95_spill] sm:$0xff] }
 0x99b   :  { %6205 = vtanh.f32 %v4655_v45  ;;  %v8941_v45 = vld [vmem:[#allocation41_spill] sm:$0xff] }
 0x99c   :  { %6207 = vtanh.f32 %v4653_v20 }
 0x99d   :  { %6209 = vtanh.f32 %v4656_v4  ;;  %v8944_v4 = vld [vmem:[#allocation53_spill] sm:$0xff] }
 0x9a4   :  { %v6204_v13 = vpop.eup %6203 }
 0x9a5   :  { %v4660_v0 = vmul.f32 0.5, %v6204_v13  ;;  %v6206_v48 = vpop.eup %6205  ;;  %v8945_v13 = vld [vmem:[#allocation101_spill] sm:$0xff] }
 0x9a6   :  { %v4661_v24 = vmul.f32 0.5, %v6206_v48  ;;  %v6208_v61 = vpop.eup %6207 }
 0x9a7   :  { %v4663_v32 = vadd.f32 0.5, %v4660_v0  ;;  %v6210_v43 = vpop.eup %6209 }
 0x9a8   :  { %v4664_v3 = vadd.f32 0.5, %v4661_v24  ;;  %v4662_v36 = vmul.f32 0.5, %v6210_v43  ;;  %v8947_v24 = vld [vmem:[#allocation44_spill] sm:$0xff]  ;;  %v8950_v43 = vld [vmem:[#allocation103_spill] sm:$0xff] }
 0x9a9   :  { %v4668_v10 = vmul.f32 %v6208_v61, %v4663_v32  ;;  %v8946_v32 = vld [vmem:[#allocation43_spill] sm:$0xff]  ;;  %v8948_v61 = vld [vmem:[#allocation56_spill] sm:$0xff] }
 0x9aa   :  { %v4667_v5 = vmul.f32 %v4664_v3, %v8160_v63  ;;  %v4665_v56 = vadd.f32 0.5, %v4662_v36  ;;  %v8949_v3 = vld [vmem:[#allocation55_spill] sm:$0xff] }
 0x9ac   :  { %v8319_v9 = vadd.f32 %v4668_v10, %v4667_v5 }
 0x9ae   :  { %6211 = vtanh.f32 %v8319_v9 }
 0x9b3   :  { %v4903_v39 = vpop.f32.mrb[84].mxu0  ;;  %v4944_v28 = vpop.f32.mrb[116].mxu1 }
 0x9b4   :  { %v4951_v47 = vadd.f32 %v4903_v39, %v8929_v42  ;;  %v4905_v54 = vpop.f32.mrb[85].mxu0  ;;  %v4946_v21 = vpop.f32.mrb[117].mxu1  ;;  %v4953_v26 = vadd.f32 %v4944_v28, %v8932_v15  ;;  %v8951_v39 = vld [vmem:[#allocation104_spill] sm:$0xff] }
 0x9b5   :  { %v4952_v27 = vadd.f32 %v4905_v54, %v8930_v46  ;;  %v4907_v51 = vpop.f32.mrb[86].mxu0  ;;  %v4948_v29 = vpop.f32.mrb[118].mxu1  ;;  %v4954_v59 = vadd.f32 %v4946_v21, %v8931_v50 }
 0x9b6   :  { %v4955_v2 = vmul.f32 0.5, %v4951_v47  ;;  %v4908_v12 = vpop.f32.mrb[87].mxu0  ;;  %v4949_v40 = vpop.f32.mrb[119].mxu1  ;;  %v4957_v60 = vmul.f32 0.5, %v4953_v26  ;;  %v5203_v51 = vld [vmem:[%s8442_s6] sm:$0xf] }
 0x9b7   :  { %v4956_v63 = vmul.f32 0.5, %v4952_v27  ;;  %v5208_v29 = vrot.slane %v5203_v51, %v8927_v62  ;;  %v5212_v40 = vrot.slane %v5203_v51, %v8928_v34 }
 0x9b8   :  { %6213 = vtanh.f32 %v4955_v2  ;;  %v6212_v8 = vpop.eup %6211 }
 0x9b9   :  { %6215 = vtanh.f32 %v4956_v63  ;;  %v8325_v41 = vmul.f32 %v6212_v8, %v4665_v56 }
 0x9ba   :  { %6217 = vtanh.f32 %v4954_v59 }
 0x9bb   :  { %v5006_v1 = vpack.c.bf16 %v8325_v41, %v8325_v41  ;;  %6219 = vtanh.f32 %v4957_v60 }
 0x9bd   :  { %5072 = vmatmul.mubr.bf16.vlgmr.msra.gmra.mrb[88].mxu0 %v5006_v1  ;;  %5113 = vmatmul.mubr.bf16.vlgmr.msra.gmra.mrb[120].mxu1 %v5006_v1 }
 0x9be   :  { %5122 = vmatpush1.bf16.msra.mxu0 %v8170_v49  ;;  %5163 = vmatpush1.bf16.msra.mxu1 %v8172_v17 }
 0x9bf   :  { %5123 = vmatprep.subr.bf16.mxu0 %v8175_v37  ;;  %5164 = vmatprep.subr.bf16.mxu1 %v8177_v14 }
 0x9c0   :  { %5153 = vmatprep.mubr.bf16.mxu0 %v8638_v44  ;;  %5194 = vmatprep.mubr.bf16.mxu1 %v8638_v44 }
 0x9c2   :  { %v6214_v31 = vpop.eup %6213  ;;  %5124 = vmatpush1.bf16.msra.mxu0 %v8183_v18  ;;  %5165 = vmatpush1.bf16.msra.mxu1 %v8185_v7  ;;  %v8933_v18 = vld [vmem:[#allocation96_spill] sm:$0xff] }
 0x9c3   :  { %v4961_v6 = vmul.f32 0.5, %v6214_v31  ;;  %v6216_v53 = vpop.eup %6215  ;;  %5125 = vmatprep.subr.bf16.mxu0 %v8187_v22  ;;  %5166 = vmatprep.subr.bf16.mxu1 %v8189_v19  ;;  %v8934_v22 = vld [vmem:[#allocation92_spill] sm:$0xff]  ;;  %v8935_v19 = vld [vmem:[#allocation93_spill] sm:$0xff]  ;;  %v5220_v31 = vrot.slane %v5203_v51, %v6686_v58 }
 0x9c4   :  { %v4962_v17 = vmul.f32 0.5, %v6216_v53  ;;  %v6218_v37 = vpop.eup %6217 }
 0x9c5   :  { %v4964_v49 = vadd.f32 0.5, %v4961_v6 }
 0x9c6   :  { %v4965_v14 = vadd.f32 0.5, %v4962_v17  ;;  %5126 = vmatpush1.bf16.msra.mxu0 %v8197_v23  ;;  %5167 = vmatpush1.bf16.msra.mxu1 %v8199_v33  ;;  %v6220_v23 = vpop.eup %6219  ;;  %v8938_v33 = vld [vmem:[#allocation97_spill] sm:$0xff] }
 0x9c7   :  { %v4969_v52 = vmul.f32 %v6218_v37, %v4964_v49  ;;  %5127 = vmatprep.subr.bf16.mxu0 %v8201_v11  ;;  %5168 = vmatprep.subr.bf16.mxu1 %v8203_v16  ;;  %v8939_v11 = vld [vmem:[#allocation98_spill] sm:$0xff]  ;;  %v8940_v16 = vld [vmem:[#allocation99_spill] sm:$0xff]  ;;  %v4963_v20 = vmul.f32 0.5, %v6220_v23 }
 0x9c8   :  { %v4968_v7 = vmul.f32 %v4965_v14, %v8933_v18 }
 0x9c9   :  { %v4966_v0 = vadd.f32 0.5, %v4963_v20 }
 0x9ca   :  { %v8345_v38 = vadd.f32 %v4969_v52, %v4968_v7  ;;  %5128 = vmatpush1.bf16.msra.mxu0 %v8934_v22  ;;  %5169 = vmatpush1.bf16.msra.mxu1 %v8935_v19  ;;  %v5216_v52 = vrot.slane %v5203_v51, %v6684_v57 }
 0x9cb   :  { %5129 = vmatprep.subr.bf16.mxu0 %v8936_v30  ;;  %5170 = vmatprep.subr.bf16.mxu1 %v8937_v55 }
 0x9cc   :  { %6221 = vtanh.f32 %v8345_v38 }
 0x9ce   :  { %5130 = vmatpush1.bf16.msra.mxu0 %v8938_v33  ;;  %5171 = vmatpush1.bf16.msra.mxu1 %v8939_v11 }
 0x9cf   :  { %5131 = vmatprep.subr.bf16.mxu0 %v8940_v16  ;;  %5172 = vmatprep.subr.bf16.mxu1 %v8941_v45 }
 0x9d2   :  { %5132 = vmatpush1.bf16.msra.mxu0 %v8942_v25  ;;  %5173 = vmatpush1.bf16.msra.mxu1 %v8943_v35 }
 0x9d3   :  { %5133 = vmatprep.subr.bf16.mxu0 %v8944_v4  ;;  %5174 = vmatprep.subr.bf16.mxu1 %v8945_v13 }
 0x9d6   :  { %v6222_v48 = vpop.eup %6221  ;;  %5134 = vmatpush1.bf16.msra.mxu0 %v8946_v32  ;;  %5175 = vmatpush1.bf16.msra.mxu1 %v8947_v24 }
 0x9d7   :  { %5135 = vmatprep.subr.bf16.mxu0 %v8948_v61  ;;  %5176 = vmatprep.subr.bf16.mxu1 %v8949_v3  ;;  %v4972_v10 = vmul.f32 %v6222_v48, %v4966_v0 }
 0x9d9   :  { %v4973_v5 = vpack.c.bf16 %v4972_v10, %v4972_v10 }
 0x9da   :  { %5136 = vmatpush1.bf16.msra.mxu0 %v8950_v43  ;;  %5177 = vmatpush1.bf16.msra.mxu1 %v8951_v39 }
 0x9dd   :  { %5154 = vmatmul.mubr.bf16.vlgmr.msra.gmra.mrb[92].mxu0 %v4973_v5  ;;  %5195 = vmatmul.mubr.bf16.vlgmr.msra.gmra.mrb[124].mxu1 %v4973_v5 }
 0xa90   :  { %v5073_v28 = vpop.f32.mrb[88].mxu0  ;;  %v5114_v36 = vpop.f32.mrb[120].mxu1 }
 0xa91   :  { %v5075_v42 = vpop.f32.mrb[89].mxu0  ;;  %v5116_v47 = vpop.f32.mrb[121].mxu1 }
 0xa92   :  { %v5077_v54 = vpop.f32.mrb[90].mxu0  ;;  %v5118_v21 = vpop.f32.mrb[122].mxu1 }
 0xa93   :  { %v5078_v46 = vpop.f32.mrb[91].mxu0  ;;  %v5119_v27 = vpop.f32.mrb[123].mxu1 }
 0xab0   :  { %v5155_v2 = vpop.f32.mrb[92].mxu0  ;;  %v5196_v12 = vpop.f32.mrb[124].mxu1 }
 0xab1   :  { %v5156_v63 = vadd.f32 %v5155_v2, %v5073_v28  ;;  %v5197_v56 = vadd.f32 %v5196_v12, %v5114_v36  ;;  %v5157_v50 = vpop.f32.mrb[93].mxu0  ;;  %v5198_v59 = vpop.f32.mrb[125].mxu1 }
 0xab2   :  { %v5158_v8 = vadd.f32 %v5157_v50, %v5075_v42  ;;  %v5199_v1 = vadd.f32 %v5198_v59, %v5116_v47  ;;  %v5159_v15 = vpop.f32.mrb[94].mxu0  ;;  %v5200_v26 = vpop.f32.mrb[126].mxu1 }
 0xab3   :  { %v5225_v60 = vadd.f32 %v5208_v29, %v5156_v63  ;;  %v5160_v6 = vpop.f32.mrb[95].mxu0  ;;  %v5201_v53 = vpop.f32.mrb[127].mxu1  ;;  %v5227_v18 = vadd.f32 %v5216_v52, %v5197_v56 }
 0xab4   :  { %v5226_v49 = vadd.f32 %v5212_v40, %v5158_v8  ;;  %v5228_v14 = vadd.f32 %v5220_v31, %v5199_v1 }
 0xab5   :  { %v5229_v17 = vmul.f32 0.5, %v5225_v60  ;;  %v5231_v7 = vmul.f32 0.5, %v5227_v18 }
 0xab6   :  { %v5230_v37 = vmul.f32 0.5, %v5226_v49 }
 0xab7   :  { %6223 = vtanh.f32 %v5229_v17 }
 0xab8   :  { %6225 = vtanh.f32 %v5230_v37 }
 0xab9   :  { %6227 = vtanh.f32 %v5228_v14 }
 0xaba   :  { %6229 = vtanh.f32 %v5231_v7 }
 0xac1   :  { %v6224_v22 = vpop.eup %6223 }
 0xac2   :  { %v5235_v19 = vmul.f32 0.5, %v6224_v22  ;;  %v6226_v30 = vpop.eup %6225 }
 0xac3   :  { %v5236_v23 = vmul.f32 0.5, %v6226_v30  ;;  %v6228_v58 = vpop.eup %6227 }
 0xac4   :  { %v5238_v55 = vadd.f32 0.5, %v5235_v19  ;;  %v6230_v20 = vpop.eup %6229 }
 0xac5   :  { %v5239_v33 = vadd.f32 0.5, %v5236_v23  ;;  %v5237_v25 = vmul.f32 0.5, %v6230_v20 }
 0xac6   :  { %v5243_v11 = vmul.f32 %v6228_v58, %v5238_v55 }
 0xac7   :  { %v5242_v16 = vmul.f32 %v5239_v33, %v8319_v9  ;;  %v5240_v57 = vadd.f32 0.5, %v5237_v25 }
 0xac9   :  { %v5244_v45 = vadd.f32 %v5243_v11, %v5242_v16 }
 0xacb   :  { %6231 = vtanh.f32 %v5244_v45 }
 0xad5   :  { %v6232_v35 = vpop.eup %6231 }
 0xad6   :  { %v5246_v4 = vmul.f32 %v6232_v35, %v5240_v57 }
 0xad7   :  { %6419 = dma.done.wait [#allocation7 + $0x2], 2048 }
 0xad8   :  { %6420 = vsyncadd [#allocation7 + $0x2], 4294965248  ;;  %5323 = vmatprep.mubr.bf16.mxu0 %v8638_v44  ;;  %5380 = vst [vmem:[#allocation18] sm:$0xff] %v4972_v10  ;;  %v5264_v13 = vld [vmem:[#allocation6 + $0x8] sm:$0xff]  ;;  %v5263_v0 = vld [vmem:[#allocation6] sm:$0xff]  ;;  %v5262_v40 = vpack.c.bf16 %v5246_v4, %v8325_v41  ;;  %s6448_s6 = smov [#allocation18]  }
 0xad9   :  { %5381 = vst [vmem:[#allocation18 + $0x8] sm:$0xff] %v5246_v4  ;;  %5382 = vst [vmem:[#allocation20] sm:$0xff] %v8345_v38  ;;  %v5266_v48 = vld [vmem:[#allocation6 + $0x18] sm:$0xff]  ;;  %5291 = vmatprep.subr.bf16.mxu0 %v5264_v13  ;;  %v5265_v9 = vld [vmem:[#allocation6 + $0x10] sm:$0xff]  ;;  %s5401_s9 = sshll.u32 %s6448_s6, 4  ;;  %s5402_s9 = int_to_ptr.vmem [resolvable:$true] %s5401_s9 }
 0xada   :  { %5383 = vst [vmem:[#allocation20 + $0x8] sm:$0xff] %v5244_v45  ;;  %5292 = vmatpush1.bf16.msra.mxu0 %v5263_v0  ;;  %v5268_v32 = vld [vmem:[#allocation6 + $0x28] sm:$0xff]  ;;  %v5267_v24 = vld [vmem:[#allocation6 + $0x20] sm:$0xff]  ;;  %v5270_v61 = vld [vmem:[#allocation6 + $0x38] sm:$0xff]  ;;  %s6343_s21 = scalar_lea.vmem %s5402_s9, 256  ;;  %p6348_p13 = scmp.lt.s32.totalorder %s5402_s9, %s5402_s9 }
 0xadb   :  { %5293 = vmatprep.subr.bf16.mxu0 %v5266_v48  ;;  %v5269_v3 = vld [vmem:[#allocation6 + $0x30] sm:$0xff]  ;;  %v5272_v10 = vld [vmem:[#allocation6 + $0x48] sm:$0xff]  ;;  %v5271_v38 = vld [vmem:[#allocation6 + $0x40] sm:$0xff]  ;;  %p6344_p12 = scmp.ne.s32.totalorder %s5402_s9, %s6343_s21  ;;  %p6349_p0 = scmp.lt.s32.totalorder %s6343_s21, %s6343_s21 }
 0xadc   :  { %v5274_v5 = vld [vmem:[#allocation6 + $0x58] sm:$0xff]  ;;  %v5273_v43 = vld [vmem:[#allocation6 + $0x50] sm:$0xff]  ;;  %v5276_v39 = vld [vmem:[#allocation6 + $0x68] sm:$0xff] }
 0xadd   :  { %v5275_v28 = vld [vmem:[#allocation6 + $0x60] sm:$0xff]  ;;  %v5278_v36 = vld [vmem:[#allocation6 + $0x78] sm:$0xff]  ;;  %v5277_v42 = vld [vmem:[#allocation6 + $0x70] sm:$0xff]  ;;  %p6350_p1 = por %p6349_p0, %p6348_p13 }
 0xade   :  { %5294 = vmatpush1.bf16.msra.mxu0 %v5265_v9  ;;  %v8952_v47 = vld [vmem:[#allocation105_spill] sm:$0xff]  ;;  %v8953_v54 = vld [vmem:[#allocation63_spill] sm:$0xff]  ;;  %v8954_v46 = vld [vmem:[#allocation100_spill] sm:$0xff] }
 0xadf   :  { %5295 = vmatprep.subr.bf16.mxu0 %v5268_v32  ;;  %v5259_v21 = vpack.c.bf16 %v8953_v54, %v8952_v47  ;;  %v8955_v27 = vld [vmem:[#allocation102_spill] sm:$0xff]  ;;  %v8956_v29 = vld [vmem:[#allocation89_spill] sm:$0xff]  ;;  %v8957_v2 = vld [vmem:[#allocation91_spill] sm:$0xff]  ;;  %p6351_p2 = pnand %p6350_p1, %p6344_p12 }
 0xae0   :  { %v5260_v51 = vpack.c.bf16 %v8955_v27, %v8954_v46  ;;  %v5261_v12 = vpack.c.bf16 %v8957_v2, %v8956_v29 }
 0xae2   :  { %5296 = vmatpush1.bf16.msra.mxu0 %v5267_v24 }
 0xae3   :  { %5297 = vmatprep.subr.bf16.mxu0 %v5270_v61 }
 0xae6   :  { %5298 = vmatpush1.bf16.msra.mxu0 %v5269_v3 }
 0xae7   :  { %5299 = vmatprep.subr.bf16.mxu0 %v5272_v10 }
 0xaea   :  { %5300 = vmatpush1.bf16.msra.mxu0 %v5271_v38 }
 0xaeb   :  { %5301 = vmatprep.subr.bf16.mxu0 %v5274_v5 }
 0xaee   :  { %5302 = vmatpush1.bf16.msra.mxu0 %v5273_v43 }
 0xaef   :  { %5303 = vmatprep.subr.bf16.mxu0 %v5276_v39 }
 0xaf2   :  { %5304 = vmatpush1.bf16.msra.mxu0 %v5275_v28 }
 0xaf3   :  { %5305 = vmatprep.subr.bf16.mxu0 %v5278_v36 }
 0xaf6   :  { %5306 = vmatpush1.bf16.msra.mxu0 %v5277_v42 }
 0xaf9   :  { %5324 = vmatmul.mubr.bf16.vlgmr.msra.gmra.mrb[96].mxu0 %v5259_v21 }
 0xafa   :  { %5333 = vmatprep.mubr.bf16.mxu0 %v8638_v44 }
 0xb01   :  { %5334 = vmatmul.mubr.bf16.gmra.mrb[100].mxu0 %v5260_v51 }
 0xb02   :  { %5343 = vmatprep.mubr.bf16.mxu0 %v8638_v44 }
 0xb09   :  { %5344 = vmatmul.mubr.bf16.gmra.mrb[104].mxu0 %v5261_v12 }
 0xb0a   :  { %5353 = vmatprep.mubr.bf16.mxu0 %v8638_v44 }
 0xb11   :  { %5354 = vmatmul.mubr.bf16.gmra.mrb[108].mxu0 %v5262_v40 }
 0xb12   :  { %6354 = shalt.err (!%p6351_p2)
}
 0xb13   :  { %s6355_s10 = scalar_lea.hbm %s8448_s12, 256 }
 0xb14   :  { %p6356_p3 = scmp.ne.s32.totalorder %s8448_s12, %s6355_s10  ;;  %p6359_p4 = scmp.lt.u32.totalorder %s6355_s10, %s8448_s12 }
 0xb16   :  { %p6361_p5 = pnand %p6359_p4, %p6356_p3 }
 0xb18   :  { %6364 = shalt.err (!%p6361_p5)
}
 0xb19   :  { %5407 = dma.vmem_to_hbm [thread:$0]  %s5402_s9, 256, %s8448_s12, [#allocation19], %s6426_s18, %s6426_s18, %s6427_s19  }
 0xb1a   :  { %s6449_s17 = smov [#allocation20]  }
 0xb1b   :  { %s5413_s22 = sshll.u32 %s6449_s17, 4  ;;  %s5414_s22 = int_to_ptr.vmem [resolvable:$true] %s5413_s22 }
 0xb1c   :  { %s6365_s25 = scalar_lea.vmem %s5414_s22, 256  ;;  %p6370_p7 = scmp.lt.s32.totalorder %s5414_s22, %s5414_s22 }
 0xb1d   :  { %p6366_p6 = scmp.ne.s32.totalorder %s5414_s22, %s6365_s25  ;;  %p6371_p8 = scmp.lt.s32.totalorder %s6365_s25, %s6365_s25 }
 0xb1f   :  { %p6372_p9 = por %p6371_p8, %p6370_p7 }
 0xb21   :  { %p6373_p10 = pnand %p6372_p9, %p6366_p6 }
 0xb23   :  { %6376 = shalt.err (!%p6373_p10)
}
 0xb24   :  { %s6377_s29 = scalar_lea.hbm %s8449_s13, 256 }
 0xb25   :  { %p6378_p11 = scmp.ne.s32.totalorder %s8449_s13, %s6377_s29  ;;  %p6381_p12 = scmp.lt.u32.totalorder %s6377_s29, %s8449_s13 }
 0xb27   :  { %p6383_p13 = pnand %p6381_p12, %p6378_p11 }
 0xb29   :  { %6386 = shalt.err (!%p6383_p13)
}
 0xb2a   :  { %5419 = dma.vmem_to_hbm [thread:$0]  %s5414_s22, 256, %s8449_s13, [#allocation19], %s6426_s18, %s6426_s18, %s6427_s19  }
 0xb2b   :  { %v5279_v44 = vld [vmem:[%s8443_s7] sm:$0x3]  ;;  %s6450_s7 = smov [#allocation17]  }
 0xb2c   :  { %v5284_v41 = vrot.slane %v5279_v44, %v8927_v62  ;;  %v5288_v63 = vrot.slane %v5279_v44, %v8928_v34  ;;  %s5389_s13 = sshll.u32 %s6450_s7, 4  ;;  %s5390_s13 = int_to_ptr.vmem [resolvable:$true] %s5389_s13 }
 0xb2d   :  { %s6387_s18 = scalar_lea.vmem %s5390_s13, 2048  ;;  %p6392_p1 = scmp.lt.s32.totalorder %s5390_s13, %s5390_s13 }
 0xb2e   :  { %p6388_p0 = scmp.ne.s32.totalorder %s5390_s13, %s6387_s18  ;;  %p6393_p2 = scmp.lt.s32.totalorder %s6387_s18, %s6387_s18 }
 0xb30   :  { %p6394_p3 = por %p6393_p2, %p6392_p1 }
 0xb32   :  { %p6395_p4 = pnand %p6394_p3, %p6388_p0 }
 0xbcc   :  { %v5325_v56 = vpop.f32.mrb[96].mxu0 }
 0xbcd   :  { %v5326_v50 = vadd.f32 %v5325_v56, %v5284_v41  ;;  %v5327_v59 = vpop.f32.mrb[97].mxu0 }
 0xbce   :  { %v5328_v8 = vadd.f32 %v5327_v59, %v5288_v63  ;;  %v5329_v1 = vpop.f32.mrb[98].mxu0 }
 0xbcf   :  { %5364 = vst [vmem:[#allocation17] sm:$0xff] %v5326_v50  ;;  %v5330_v15 = vadd.f32 %v5329_v1, %v5284_v41  ;;  %v5331_v26 = vpop.f32.mrb[99].mxu0 }
 0xbd0   :  { %5365 = vst [vmem:[#allocation17 + $0x8] sm:$0xff] %v5328_v8  ;;  %v5332_v60 = vadd.f32 %v5331_v26, %v5288_v63 }
 0xbd1   :  { %5366 = vst [vmem:[#allocation17 + $0x10] sm:$0xff] %v5330_v15 }
 0xbd2   :  { %5367 = vst [vmem:[#allocation17 + $0x18] sm:$0xff] %v5332_v60 }
 0xbd4   :  { %v5335_v31 = vpop.f32.mrb[100].mxu0 }
 0xbd5   :  { %v5336_v6 = vadd.f32 %v5335_v31, %v5284_v41  ;;  %v5337_v53 = vpop.f32.mrb[101].mxu0 }
 0xbd6   :  { %v5338_v49 = vadd.f32 %v5337_v53, %v5288_v63  ;;  %v5339_v17 = vpop.f32.mrb[102].mxu0 }
 0xbd7   :  { %5368 = vst [vmem:[#allocation17 + $0x20] sm:$0xff] %v5336_v6  ;;  %v5340_v62 = vadd.f32 %v5339_v17, %v5284_v41  ;;  %v5341_v34 = vpop.f32.mrb[103].mxu0 }
 0xbd8   :  { %5369 = vst [vmem:[#allocation17 + $0x28] sm:$0xff] %v5338_v49  ;;  %v5342_v37 = vadd.f32 %v5341_v34, %v5288_v63 }
 0xbd9   :  { %5370 = vst [vmem:[#allocation17 + $0x30] sm:$0xff] %v5340_v62 }
 0xbda   :  { %5371 = vst [vmem:[#allocation17 + $0x38] sm:$0xff] %v5342_v37 }
 0xbdc   :  { %v5345_v14 = vpop.f32.mrb[104].mxu0 }
 0xbdd   :  { %v5346_v52 = vadd.f32 %v5345_v14, %v5284_v41  ;;  %v5347_v18 = vpop.f32.mrb[105].mxu0 }
 0xbde   :  { %v5348_v7 = vadd.f32 %v5347_v18, %v5288_v63  ;;  %v5349_v22 = vpop.f32.mrb[106].mxu0 }
 0xbdf   :  { %5372 = vst [vmem:[#allocation17 + $0x40] sm:$0xff] %v5346_v52  ;;  %v5350_v19 = vadd.f32 %v5349_v22, %v5284_v41  ;;  %v5351_v30 = vpop.f32.mrb[107].mxu0 }
 0xbe0   :  { %5373 = vst [vmem:[#allocation17 + $0x48] sm:$0xff] %v5348_v7  ;;  %v5352_v55 = vadd.f32 %v5351_v30, %v5288_v63 }
 0xbe1   :  { %5374 = vst [vmem:[#allocation17 + $0x50] sm:$0xff] %v5350_v19 }
 0xbe2   :  { %5375 = vst [vmem:[#allocation17 + $0x58] sm:$0xff] %v5352_v55 }
 0xbe4   :  { %v5355_v23 = vpop.f32.mrb[108].mxu0 }
 0xbe5   :  { %v5356_v58 = vadd.f32 %v5355_v23, %v5284_v41  ;;  %v5357_v33 = vpop.f32.mrb[109].mxu0 }
 0xbe6   :  { %v5358_v11 = vadd.f32 %v5357_v33, %v5288_v63  ;;  %v5359_v16 = vpop.f32.mrb[110].mxu0 }
 0xbe7   :  { %5376 = vst [vmem:[#allocation17 + $0x60] sm:$0xff] %v5356_v58  ;;  %v5360_v45 = vadd.f32 %v5359_v16, %v5284_v41  ;;  %v5361_v20 = vpop.f32.mrb[111].mxu0 }
 0xbe8   :  { %5377 = vst [vmem:[#allocation17 + $0x68] sm:$0xff] %v5358_v11  ;;  %v5362_v25 = vadd.f32 %v5361_v20, %v5288_v63 }
 0xbe9   :  { %5378 = vst [vmem:[#allocation17 + $0x70] sm:$0xff] %v5360_v45 }
 0xbea   :  { %5379 = vst [vmem:[#allocation17 + $0x78] sm:$0xff] %v5362_v25 }
 0xbeb   :  { %6398 = shalt.err (!%p6395_p4)
}
 0xbec   :  { %s6399_s4 = scalar_lea.hbm %s8447_s11, 2048 }
 0xbed   :  { %p6400_p5 = scmp.ne.s32.totalorder %s8447_s11, %s6399_s4  ;;  %p6403_p6 = scmp.lt.u32.totalorder %s6399_s4, %s8447_s11 }
 0xbef   :  { %p6405_p7 = pnand %p6403_p6, %p6400_p5 }
 0xbf1   :  { %6408 = shalt.err (!%p6405_p7)
}
 0xbf2   :  { %5395 = dma.vmem_to_hbm [thread:$0]  %s5390_s13, 2048, %s8447_s11, [#allocation10], %s8608_s2, %s8608_s2, %s6430_s26  }
 0xbf3   :  { %6421 = dma.done.wait [#allocation10], 2048  }
 0xbf4   :  { %6422 = vsyncadd [#allocation10], 4294965248 }
 0xbf5   :  { %6423 = dma.done.wait [#allocation19], 512  }
 0xbf6   :  { %6424 = vsyncadd [#allocation19], 4294966784 }
 0xbf7   :  { %5429 = vsyncpa [#allocation9], 1 }
 0xbf8   :  { %5430 = vsyncpa [#allocation12], 1 }
 0xbf9   :  { %5431 = vsyncpa [#allocation15], 1 }
 0xbfa   :  { %5432 = vsyncpa [#allocation10], 1 }
 0xbfb   :  { %5433 = vsyncpa [#allocation19], 1 }
 0xbfc   :  { %5434 = vsyncmov [#allocation7] }
 0xbff   :  { %s5435_s16 = vpop.sfrf %5434 }
 0xc00   :  { %p5752_p8 = scmp.ne.s32.totalorder %s5435_s16, 0 }
 0xc02   :  { %5439 = shalt.err (%p5752_p8)  }
 0xc03   :  { %5441 = vsyncmov [#allocation7 + $0x1] }
 0xc06   :  { %s5442_s1 = vpop.sfrf %5441 }
 0xc07   :  { %p5753_p9 = scmp.ne.s32.totalorder %s5442_s1, 0 }
 0xc09   :  { %5446 = shalt.err (%p5753_p9)  }
 0xc0a   :  { %5448 = vsyncmov [#allocation7 + $0x2] }
 0xc0d   :  { %s5449_s17 = vpop.sfrf %5448 }
 0xc0e   :  { %p5754_p10 = scmp.ne.s32.totalorder %s5449_s17, 0 }
 0xc10   :  { %5453 = shalt.err (%p5754_p10)  }

</bundles_post_ra>
